<compile_context>
chip_gen: v6e
topology: v6e:2x2x1
jax: 0.10.0
libtpu: 0.0.40
codegen_flags: <defaults>
</compile_context>

<pallas_src>
import functools

import jax
import jax.numpy as jnp
from jax.experimental import pallas as pl
from jax.experimental.pallas import tpu as pltpu

_EPS = 1e-5


# ----------------------------------------------------------------------------
# Host-side helpers: banded conv matrices and lane-vector BN/PReLU parameters
# ----------------------------------------------------------------------------
def _band_matrix(w, T):
    """(Cout, Cin, K) 1-D 'same' conv weights -> (Cin*T, Cout*T) band matrix."""
    Cout, Cin, K = w.shape
    pad = (K - 1) // 2
    s = jnp.arange(T)[:, None]            # input time
    t = jnp.arange(T)[None, :]            # output time
    k = s - t + pad                       # tap index
    valid = (k >= 0) & (k < K)
    kc = jnp.clip(k, 0, K - 1)
    wk = w[:, :, kc]                      # (Cout, Cin, T, T)
    wk = jnp.where(valid[None, None], wk, 0.0)
    return jnp.transpose(wk, (1, 2, 0, 3)).reshape(Cin * T, Cout * T)


def _depth_matrices(w9, w5, T, T5):
    """Fold Conv3d(1,1,(9,1,1)) + Conv2d(1,1,(1,5),stride 5) into 3 matrices.

    Returns (3, 3T, T5): per conv-branch map from its (B*E, 3T) output to the
    (B*E, T5) depth-aggregated features (biases handled separately).
    """
    tt = jnp.arange(T)[:, None]
    t5 = jnp.arange(T5)[None, :]
    k = tt - 5 * t5
    valid = (k >= 0) & (k < 5)
    w5k = jnp.where(valid, w5[jnp.clip(k, 0, 4)], 0.0)          # (T, T5)
    mats = []
    for br in range(3):
        mats.append(jnp.concatenate([w9[br * 3 + c] * w5k for c in range(3)],
                                    axis=0))                    # (3T, T5)
    return jnp.stack(mats)                                      # (3, 3T, T5)


# ----------------------------------------------------------------------------
# Kernel A: one conv branch = 3x (band-matmul conv + BatchNorm(batch) + PReLU)
# ----------------------------------------------------------------------------
def _conv_branch_kernel(x_ref, w1_ref, w2_ref, w3_ref, bias_ref, gamma_ref,
                        beta_ref, a_ref, o_ref, *, t_len, n_rows):
    inv = 1.0 / float(n_rows * t_len)

    def bn_prelu(y, l):
        # y: (n_rows, 3*t_len).  Per-channel batch-stat BN, applied in one
        # full-width vectorized pass via concatenated mean / inv-std vectors.
        col_sum = jnp.sum(y, axis=0, keepdims=True)                  # (1, 3T)
        means = []
        for c in range(3):
            mc = jnp.sum(col_sum[:, c * t_len:(c + 1) * t_len],
                         axis=1, keepdims=True) * inv                # (1, 1)
            means.append(jnp.broadcast_to(mc, (1, t_len)))
        mean_vec = jnp.concatenate(means, axis=1)                    # (1, 3T)
        d = y - mean_vec
        sq_sum = jnp.sum(d * d, axis=0, keepdims=True)               # (1, 3T)
        istds = []
        for c in range(3):
            vc = jnp.sum(sq_sum[:, c * t_len:(c + 1) * t_len],
                         axis=1, keepdims=True) * inv                # (1, 1)
            istds.append(jnp.broadcast_to(jax.lax.rsqrt(vc + _EPS), (1, t_len)))
        istd_vec = jnp.concatenate(istds, axis=1)                    # (1, 3T)
        yn = d * istd_vec * gamma_ref[0, l] + beta_ref[0, l]
        return jnp.where(yn >= 0.0, yn, a_ref[0, l] * yn)            # PReLU

    h = x_ref[...]                                                   # (rows, T)
    h = bn_prelu(jnp.dot(h, w1_ref[0], preferred_element_type=jnp.float32)
                 + bias_ref[0, 0], 0)
    h = bn_prelu(jnp.dot(h, w2_ref[0], preferred_element_type=jnp.float32)
                 + bias_ref[0, 1], 1)
    h = bn_prelu(jnp.dot(h, w3_ref[0], preferred_element_type=jnp.float32)
                 + bias_ref[0, 2], 2)
    o_ref[0] = h                                                     # (rows, 3T)


def conv_stage(x_flat, wb1, wb2, wb3, bias_l, gamma_l, beta_l, a_l):
    n_rows, T = x_flat.shape
    T3 = 3 * T
    kern = functools.partial(_conv_branch_kernel, t_len=T, n_rows=n_rows)
    flops = 3 * 2 * (n_rows * T * T3 + 2 * n_rows * T3 * T3)
    bytes_acc = 4 * (3 * n_rows * T + wb1.size + wb2.size + wb3.size
                     + bias_l.size + gamma_l.size + beta_l.size + a_l.size
                     + 3 * n_rows * T3)
    return pl.pallas_call(
        kern,
        grid=(3,),
        out_shape=jax.ShapeDtypeStruct((3, n_rows, T3), jnp.float32),
        in_specs=[
            pl.BlockSpec((n_rows, T), lambda b: (0, 0)),
            pl.BlockSpec((1, T, T3), lambda b: (b, 0, 0)),
            pl.BlockSpec((1, T3, T3), lambda b: (b, 0, 0)),
            pl.BlockSpec((1, T3, T3), lambda b: (b, 0, 0)),
            pl.BlockSpec((1, 3, T3), lambda b: (b, 0, 0)),
            pl.BlockSpec((1, 3, T3), lambda b: (b, 0, 0)),
            pl.BlockSpec((1, 3, T3), lambda b: (b, 0, 0)),
            pl.BlockSpec((1, 3, T3), lambda b: (b, 0, 0)),
        ],
        out_specs=pl.BlockSpec((1, n_rows, T3), lambda b: (b, 0, 0)),
        compiler_params=pltpu.CompilerParams(
            dimension_semantics=("parallel",)),
        cost_estimate=pl.CostEstimate(flops=int(flops), transcendentals=27,
                                      bytes_accessed=int(bytes_acc)),
    )(x_flat, wb1, wb2, wb3, bias_l, gamma_l, beta_l, a_l)


# ----------------------------------------------------------------------------
# Kernel B: depth stage + 4x (GAT + GraphNorm + PReLU) + pool + MLP + softmax
# ----------------------------------------------------------------------------
def _graph_head_kernel(xb_ref, dm_ref, dscal_ref, adj_ref, eye_ref,
                       g1w_ref, gw_ref, asrc_ref, adst_ref, gbias_ref,
                       gnw_ref, gnb_ref, gnms_ref, ga_ref,
                       pool_ref, invc_ref,
                       w1_ref, b1_ref, w2_ref, b2_ref, w3_ref, b3_ref,
                       o_ref, *, heads, cdim, t5, n_layers):
    n_nodes = adj_ref.shape[0]

    # ---- depthAggri + depthConv1 (folded) + BatchNorm2d(1) + PReLU --------
    agg = (jnp.dot(xb_ref[0], dm_ref[0], preferred_element_type=jnp.float32)
           + jnp.dot(xb_ref[1], dm_ref[1], preferred_element_type=jnp.float32)
           + jnp.dot(xb_ref[2], dm_ref[2], preferred_element_type=jnp.float32))
    agg = agg + dscal_ref[0]                                    # folded biases
    inv_nt = 1.0 / float(n_nodes * t5)
    m = jnp.sum(jnp.sum(agg, axis=1, keepdims=True),
                axis=0, keepdims=True) * inv_nt
    d = agg - m
    v = jnp.sum(jnp.sum(d * d, axis=1, keepdims=True),
                axis=0, keepdims=True) * inv_nt
    y = d * jax.lax.rsqrt(v + _EPS) * dscal_ref[1] + dscal_ref[2]
    h = jnp.where(y >= 0.0, y, dscal_ref[3] * y)                # (N, T5) nodes

    adj = adj_ref[...]
    eye = eye_ref[...]
    neg = jnp.float32(-1e30)
    inv_n = 1.0 / float(n_nodes)

    # ---- 4x dense GATConv + GraphNorm(single graph) + PReLU ----------------
    for i in range(n_layers):
        if i == 0:
            xp = jnp.dot(h, g1w_ref[...], preferred_element_type=jnp.float32)
        else:
            xp = jnp.dot(h, gw_ref[i - 1], preferred_element_type=jnp.float32)
        outs = []
        for hd in range(heads):
            xph = xp[:, hd * cdim:(hd + 1) * cdim]                          # (N, C)
            a_dst = jnp.sum(xph * adst_ref[i, hd], axis=-1, keepdims=True)  # (N, 1)
            a_src = jnp.sum(xph * asrc_ref[i, hd], axis=-1, keepdims=True)  # (N, 1)
            # column -> row without an explicit transpose: diag + sublane sum
            a_src_row = jnp.sum(a_src * eye, axis=0, keepdims=True)         # (1, N)
            s = a_dst + a_src_row                                           # (N, N)
            s = jnp.where(s >= 0.0, s, 0.2 * s)                 # leaky_relu(0.2)
            s = jnp.where(adj > 0.0, s, neg)                    # mask non-edges
            mx = jnp.max(s, axis=-1, keepdims=True)
            p = jnp.exp(s - mx)
            att = p / jnp.sum(p, axis=-1, keepdims=True)
            outs.append(jnp.dot(att, xph, preferred_element_type=jnp.float32))
        g = jnp.concatenate(outs, axis=-1) + gbias_ref[i]                   # (N, F)

        mean = jnp.sum(g, axis=0, keepdims=True) * inv_n                    # (1, F)
        xc = g - mean * gnms_ref[i]
        var = jnp.sum(xc * xc, axis=0, keepdims=True) * inv_n
        gn = gnw_ref[i] * xc * jax.lax.rsqrt(var + _EPS) + gnb_ref[i]
        h = jnp.where(gn >= 0.0, gn, ga_ref[i] * gn)                        # PReLU

    # ---- global_mean_pool + Linear/ELU x3 + softmax ------------------------
    pooled = jnp.dot(pool_ref[...], h,
                     preferred_element_type=jnp.float32) * invc_ref[...]    # (G, F)
    z = jnp.dot(pooled, w1_ref[...], preferred_element_type=jnp.float32) + b1_ref[...]
    z = jnp.where(z > 0.0, z, jnp.exp(z) - 1.0)                 # ELU(alpha=1)
    z = jnp.dot(z, w2_ref[...], preferred_element_type=jnp.float32) + b2_ref[...]
    z = jnp.where(z > 0.0, z, jnp.exp(z) - 1.0)
    z = jnp.dot(z, w3_ref[...], preferred_element_type=jnp.float32) + b3_ref[...]
    z = jnp.where(z > 0.0, z, jnp.exp(z) - 1.0)
    mx = jnp.max(z, axis=-1, keepdims=True)
    e = jnp.exp(z - mx)
    o_ref[...] = e / jnp.sum(e, axis=-1, keepdims=True)


def graph_head_stage(xb, dm, dscal, adj, eye, g1w, gw_rest, asrc, adst, gbias,
                     gnw, gnb, gnms, ga, pool, invc, W1, b1, W2, b2, W3, b3,
                     *, heads, cdim, t5, n_layers, n_class):
    G = pool.shape[0]
    n_nodes = adj.shape[0]
    F = heads * cdim
    vmem = pl.BlockSpec(memory_space=pltpu.MemorySpace.VMEM)
    smem = pl.BlockSpec(memory_space=pltpu.MemorySpace.SMEM)
    kern = functools.partial(_graph_head_kernel, heads=heads, cdim=cdim,
                             t5=t5, n_layers=n_layers)
    flops = (2 * 3 * n_nodes * dm.shape[1] * t5
             + n_layers * (2 * n_nodes * F * F
                           + heads * (2 * n_nodes * n_nodes * cdim
                                      + 6 * n_nodes * cdim))
             + 2 * (G * n_nodes * F + G * F * 16 + G * 16 * 8 + G * 8 * n_class))
    trans = (n_layers * heads * n_nodes * n_nodes
             + 2 * G * (16 + 8 + 2 * n_class) + 4 * n_layers * F + 64)
    bytes_acc = 4 * (xb.size + dm.size + adj.size + eye.size + g1w.size
                     + gw_rest.size + asrc.size + adst.size + gbias.size
                     + gnw.size + gnb.size + gnms.size + pool.size + invc.size
                     + W1.size + b1.size + W2.size + b2.size + W3.size + b3.size
                     + G * n_class)
    in_specs = [vmem, vmem, smem, vmem, vmem,
                vmem, vmem, vmem, vmem, vmem,
                vmem, vmem, vmem, smem,
                vmem, vmem,
                vmem, vmem, vmem, vmem, vmem, vmem]
    return pl.pallas_call(
        kern,
        out_shape=jax.ShapeDtypeStruct((G, n_class), jnp.float32),
        in_specs=in_specs,
        out_specs=vmem,
        cost_estimate=pl.CostEstimate(flops=int(flops), transcendentals=int(trans),
                                      bytes_accessed=int(bytes_acc)),
    )(xb, dm, dscal, adj, eye, g1w, gw_rest, asrc, adst, gbias,
      gnw, gnb, gnms, ga, pool, invc, W1, b1, W2, b2, W3, b3)


# ----------------------------------------------------------------------------
# Parameter init (deterministic, synthetic)
# ----------------------------------------------------------------------------
def init_params(key, n_node_features, n_class, ghidd_lst, n_head):
    keys = iter(jax.random.split(key, 256))

    def nrm(shape, s=0.2):
        return jax.random.normal(next(keys), shape, jnp.float32) * s

    p = {}
    conv_cfg = {
        'c1_1': (3, 1, 15), 'c2_1': (3, 1, 7), 'c3_1': (3, 1, 3),
        'c1_2': (3, 3, 15), 'c2_2': (3, 3, 7), 'c3_2': (3, 3, 3),
        'c1_3': (3, 3, 15), 'c2_3': (3, 3, 7), 'c3_3': (3, 3, 3),
    }
    for name, (co, ci, k) in conv_cfg.items():
        p[name] = dict(w=nrm((co, ci, k)), b=nrm((co,), 0.05),
                       gamma=1.0 + nrm((co,), 0.1), beta=nrm((co,), 0.05),
                       a=jnp.full((1,), 0.25, jnp.float32))
    p['depth'] = dict(w9=nrm((9,)), b9=nrm((1,), 0.05),
                      w5=nrm((5,)), b5=nrm((1,), 0.05),
                      gamma=1.0 + nrm((1,), 0.1), beta=nrm((1,), 0.05),
                      a=jnp.full((1,), 0.25, jnp.float32))
    gat_in = [n_node_features, ghidd_lst[0] * n_head,
              ghidd_lst[1] * n_head, ghidd_lst[2] * n_head]
    for i in range(4):
        fin, c = gat_in[i], ghidd_lst[i]
        F = n_head * c
        p[f'gat{i + 1}'] = dict(W=nrm((fin, F)),
                                att_src=nrm((n_head, c)),
                                att_dst=nrm((n_head, c)),
                                bias=nrm((1, F), 0.05))
        p[f'gbn{i + 1}'] = dict(weight=1.0 + nrm((1, F), 0.1),
                                bias=nrm((1, F), 0.05),
                                mean_scale=1.0 + nrm((1, F), 0.1),
                                a=jnp.full((1, 1), 0.25, jnp.float32))
    p['L1'] = dict(W=nrm((ghidd_lst[3] * n_head, 16)), b=nrm((1, 16), 0.05))
    p['L2'] = dict(W=nrm((16, 8)), b=nrm((1, 8), 0.05))
    p['L3'] = dict(W=nrm((8, n_class)), b=nrm((1, n_class), 0.05))
    return p


# ----------------------------------------------------------------------------
# Full forward pass (2 pallas_calls)
# ----------------------------------------------------------------------------
@functools.partial(jax.jit, static_argnames=('n_head', 'ghidd_lst', 'num_graphs'))
def eeg_gat_forward(x, edge_index, batch, params, *, n_head, ghidd_lst,
                    num_graphs):
    assert len(set(ghidd_lst)) == 1, "stacked GAT weights require equal hidden sizes"
    B, E, T = x.shape
    n_rows = B * E
    T5 = T // 5
    x_flat = x.reshape(n_rows, T).astype(jnp.float32)

    # --- conv stage: band matrices + lane-tiled BN/PReLU params, 3 branches
    branch_layers = [('c1_1', 'c1_2', 'c1_3'),
                     ('c2_1', 'c2_2', 'c2_3'),
                     ('c3_1', 'c3_2', 'c3_3')]
    wb1, wb2, wb3 = [], [], []
    bias_l, gamma_l, beta_l, a_l = [], [], [], []
    for names in branch_layers:
        wb1.append(_band_matrix(params[names[0]]['w'], T))
        wb2.append(_band_matrix(params[names[1]]['w'], T))
        wb3.append(_band_matrix(params[names[2]]['w'], T))
        bb, gg, be, aa = [], [], [], []
        for nm in names:
            c = params[nm]
            bb.append(jnp.repeat(c['b'], T))
            gg.append(jnp.repeat(c['gamma'], T))
            be.append(jnp.repeat(c['beta'], T))
            aa.append(jnp.full((3 * T,), c['a'][0], jnp.float32))
        bias_l.append(jnp.stack(bb))
        gamma_l.append(jnp.stack(gg))
        beta_l.append(jnp.stack(be))
        a_l.append(jnp.stack(aa))

    xb = conv_stage(x_flat, jnp.stack(wb1), jnp.stack(wb2), jnp.stack(wb3),
                    jnp.stack(bias_l), jnp.stack(gamma_l), jnp.stack(beta_l),
                    jnp.stack(a_l))                              # (3, B*E, 3T)

    # --- graph stage inputs
    d = params['depth']
    dm = _depth_matrices(d['w9'], d['w5'], T, T5)                # (3, 3T, T5)
    dconst = d['b9'][0] * jnp.sum(d['w5']) + d['b5'][0]
    dscal = jnp.stack([dconst, d['gamma'][0], d['beta'][0], d['a'][0]])

    N = n_rows
    # adjacency: adj[i, j] = 1 iff directed edge j -> i exists, plus self loops
    adj = jnp.zeros((N, N), jnp.float32).at[edge_index[1], edge_index[0]].set(1.0)
    adj = jnp.maximum(adj, jnp.eye(N, dtype=jnp.float32))
    eye = jnp.eye(N, dtype=jnp.float32)

    g1w = params['gat1']['W']                                    # (T5, F)
    gw_rest = jnp.stack([params['gat2']['W'], params['gat3']['W'],
                         params['gat4']['W']])                   # (3, F, F)
    asrc = jnp.stack([params[f'gat{i + 1}']['att_src'] for i in range(4)])
    adst = jnp.stack([params[f'gat{i + 1}']['att_dst'] for i in range(4)])
    gbias = jnp.stack([params[f'gat{i + 1}']['bias'].reshape(-1) for i in range(4)])
    gnw = jnp.stack([params[f'gbn{i + 1}']['weight'].reshape(-1) for i in range(4)])
    gnb = jnp.stack([params[f'gbn{i + 1}']['bias'].reshape(-1) for i in range(4)])
    gnms = jnp.stack([params[f'gbn{i + 1}']['mean_scale'].reshape(-1) for i in range(4)])
    ga = jnp.stack([params[f'gbn{i + 1}']['a'].reshape(()) for i in range(4)])

    pool = jax.nn.one_hot(batch, num_graphs, dtype=jnp.float32).T    # (G, N)
    counts = jnp.sum(pool, axis=1, keepdims=True)
    invc = 1.0 / jnp.maximum(counts, 1.0)

    return graph_head_stage(xb, dm, dscal, adj, eye, g1w, gw_rest, asrc, adst,
                            gbias, gnw, gnb, gnms, ga, pool, invc,
                            params['L1']['W'], params['L1']['b'],
                            params['L2']['W'], params['L2']['b'],
                            params['L3']['W'], params['L3']['b'],
                            heads=n_head, cdim=ghidd_lst[0], t5=T5,
                            n_layers=4, n_class=params['L3']['W'].shape[1])


# ----------------------------------------------------------------------------
if __name__ == "__main__":
    key = jax.random.PRNGKey(0)
    B, E, T = 2, 4, 40                     # batch, EEG electrodes, time samples
    n_head = 4
    ghidd_lst = (8, 8, 8, 8)               # Ghidd_lst[3]*n_head == 32 == L1 in-dim
    n_class = 3
    n_node_features = T // 5               # output width of depthConv1 (1x5, stride 5)

    kx, kp = jax.random.split(key)
    x = jax.random.normal(kx, (B, E, T), jnp.float32)

    # fully-connected directed graph (no self loops) within each sample
    src, dst = [], []
    for g in range(B):
        for i in range(E):
            for j in range(E):
                if i != j:
                    src.append(g * E + i)
                    dst.append(g * E + j)
    edge_index = jnp.array([src, dst], dtype=jnp.int32)        # (2, 24)
    batch = jnp.repeat(jnp.arange(B, dtype=jnp.int32), E)      # (8,)

    params = init_params(kp, n_node_features, n_class, ghidd_lst, n_head)

    out = eeg_gat_forward(x, edge_index, batch, params,
                          n_head=n_head, ghidd_lst=ghidd_lst, num_graphs=B)
    out = jax.block_until_ready(out)
    assert out.shape == (B, n_class)
    assert bool(jnp.all(jnp.isfinite(out)))
    print("KERNEL_OK")
</pallas_src>

<mosaic_0001>
module attributes {stable_mosaic.version = 11 : i64} {
  func.func @_conv_branch_kernel(%arg0: i32, %arg1: memref<8x40xf32, #tpu.memory_space<vmem>>, %arg2: memref<1x40x120xf32, #tpu.memory_space<vmem>>, %arg3: memref<1x120x120xf32, #tpu.memory_space<vmem>>, %arg4: memref<1x120x120xf32, #tpu.memory_space<vmem>>, %arg5: memref<1x3x120xf32, #tpu.memory_space<vmem>>, %arg6: memref<1x3x120xf32, #tpu.memory_space<vmem>>, %arg7: memref<1x3x120xf32, #tpu.memory_space<vmem>>, %arg8: memref<1x3x120xf32, #tpu.memory_space<vmem>>, %arg9: memref<1x8x120xf32, #tpu.memory_space<vmem>>) attributes {dimension_semantics = [#tpu.dimension_semantics<parallel>], iteration_bounds = array<i64: 3>, scalar_prefetch = 0 : i64, scratch_operands = 0 : i64, tpu.core_type = #tpu.core_type<tc>, window_params = [{pipeline_mode = #tpu.pipeline_mode<synchronous>, transform_indices = @transform_0, window_bounds = array<i64: 8, 40>}, {transform_indices = @transform_1, window_bounds = array<i64: 1, 40, 120>}, {transform_indices = @transform_2, window_bounds = array<i64: 1, 120, 120>}, {transform_indices = @transform_3, window_bounds = array<i64: 1, 120, 120>}, {transform_indices = @transform_4, window_bounds = array<i64: 1, 3, 120>}, {transform_indices = @transform_5, window_bounds = array<i64: 1, 3, 120>}, {transform_indices = @transform_6, window_bounds = array<i64: 1, 3, 120>}, {transform_indices = @transform_7, window_bounds = array<i64: 1, 3, 120>}, {transform_indices = @transform_8, window_bounds = array<i64: 1, 8, 120>}]} {
    %c0 = arith.constant 0 : index
    %c0_0 = arith.constant 0 : index
    %0 = vector.load %arg1[%c0, %c0_0] : memref<8x40xf32, #tpu.memory_space<vmem>>, vector<8x40xf32>
    %c0_1 = arith.constant 0 : index
    %c0_2 = arith.constant 0 : index
    %c0_3 = arith.constant 0 : index
    %1 = vector.load %arg2[%c0_1, %c0_2, %c0_3] : memref<1x40x120xf32, #tpu.memory_space<vmem>>, vector<1x40x120xf32>
    %2 = vector.shape_cast %1 : vector<1x40x120xf32> to vector<40x120xf32>
    %cst = arith.constant dense<0.000000e+00> : vector<8x120xf32>
    %3 = tpu.matmul %0, %2, %cst {dimension_numbers = #tpu.dot_dimension_numbers<[1], [0], [0], [1], [0, 0, 1, 1], [], []>} : vector<8x40xf32>, vector<40x120xf32>, vector<8x120xf32> -> vector<8x120xf32>
    %c0_4 = arith.constant 0 : index
    %c0_5 = arith.constant 0 : index
    %c0_6 = arith.constant 0 : index
    %4 = vector.load %arg5[%c0_4, %c0_5, %c0_6] : memref<1x3x120xf32, #tpu.memory_space<vmem>>, vector<1x1x120xf32>
    %5 = vector.shape_cast %4 : vector<1x1x120xf32> to vector<120xf32>
    %6 = vector.shape_cast %5 : vector<120xf32> to vector<1x120xf32>
    %7 = vector.broadcast %6 : vector<1x120xf32> to vector<8x120xf32>
    %8 = arith.addf %3, %7 : vector<8x120xf32>
    %cst_7 = arith.constant dense<0.000000e+00> : vector<120xf32>
    %9 = vector.multi_reduction <add>, %8, %cst_7 [0] : vector<8x120xf32> to vector<120xf32>
    %10 = vector.shape_cast %9 : vector<120xf32> to vector<1x120xf32>
    %11 = vector.extract_strided_slice %10 {offsets = [0, 0], sizes = [1, 40], strides = [1, 1]} : vector<1x120xf32> to vector<1x40xf32>
    %cst_8 = arith.constant dense<0.000000e+00> : vector<1xf32>
    %12 = vector.multi_reduction <add>, %11, %cst_8 [1] : vector<1x40xf32> to vector<1xf32>
    %13 = vector.shape_cast %12 : vector<1xf32> to vector<1x1xf32>
    %cst_9 = arith.constant 3.125000e-03 : f32
    %14 = vector.broadcast %cst_9 : f32 to vector<1x1xf32>
    %15 = arith.mulf %13, %14 : vector<1x1xf32>
    %16 = vector.shape_cast %15 : vector<1x1xf32> to vector<1x1xf32>
    %17 = vector.broadcast %16 : vector<1x1xf32> to vector<1x40xf32>
    %18 = vector.extract_strided_slice %10 {offsets = [0, 40], sizes = [1, 40], strides = [1, 1]} : vector<1x120xf32> to vector<1x40xf32>
    %cst_10 = arith.constant dense<0.000000e+00> : vector<1xf32>
    %19 = vector.multi_reduction <add>, %18, %cst_10 [1] : vector<1x40xf32> to vector<1xf32>
    %20 = vector.shape_cast %19 : vector<1xf32> to vector<1x1xf32>
    %cst_11 = arith.constant 3.125000e-03 : f32
    %21 = vector.broadcast %cst_11 : f32 to vector<1x1xf32>
    %22 = arith.mulf %20, %21 : vector<1x1xf32>
    %23 = vector.shape_cast %22 : vector<1x1xf32> to vector<1x1xf32>
    %24 = vector.broadcast %23 : vector<1x1xf32> to vector<1x40xf32>
    %25 = vector.extract_strided_slice %10 {offsets = [0, 80], sizes = [1, 40], strides = [1, 1]} : vector<1x120xf32> to vector<1x40xf32>
    %cst_12 = arith.constant dense<0.000000e+00> : vector<1xf32>
    %26 = vector.multi_reduction <add>, %25, %cst_12 [1] : vector<1x40xf32> to vector<1xf32>
    %27 = vector.shape_cast %26 : vector<1xf32> to vector<1x1xf32>
    %cst_13 = arith.constant 3.125000e-03 : f32
    %28 = vector.broadcast %cst_13 : f32 to vector<1x1xf32>
    %29 = arith.mulf %27, %28 : vector<1x1xf32>
    %30 = vector.shape_cast %29 : vector<1x1xf32> to vector<1x1xf32>
    %31 = vector.broadcast %30 : vector<1x1xf32> to vector<1x40xf32>
    %32 = tpu.concatenate %17, %24, %31 in 1 : vector<1x40xf32>, vector<1x40xf32>, vector<1x40xf32> -> vector<1x120xf32>
    %33 = vector.broadcast %32 : vector<1x120xf32> to vector<8x120xf32>
    %34 = arith.subf %8, %33 : vector<8x120xf32>
    %35 = arith.mulf %34, %34 : vector<8x120xf32>
    %cst_14 = arith.constant dense<0.000000e+00> : vector<120xf32>
    %36 = vector.multi_reduction <add>, %35, %cst_14 [0] : vector<8x120xf32> to vector<120xf32>
    %37 = vector.shape_cast %36 : vector<120xf32> to vector<1x120xf32>
    %38 = vector.extract_strided_slice %37 {offsets = [0, 0], sizes = [1, 40], strides = [1, 1]} : vector<1x120xf32> to vector<1x40xf32>
    %cst_15 = arith.constant dense<0.000000e+00> : vector<1xf32>
    %39 = vector.multi_reduction <add>, %38, %cst_15 [1] : vector<1x40xf32> to vector<1xf32>
    %40 = vector.shape_cast %39 : vector<1xf32> to vector<1x1xf32>
    %cst_16 = arith.constant 3.125000e-03 : f32
    %41 = vector.broadcast %cst_16 : f32 to vector<1x1xf32>
    %42 = arith.mulf %40, %41 : vector<1x1xf32>
    %cst_17 = arith.constant 9.99999974E-6 : f32
    %43 = vector.broadcast %cst_17 : f32 to vector<1x1xf32>
    %44 = arith.addf %42, %43 : vector<1x1xf32>
    %45 = math.rsqrt %44 : vector<1x1xf32>
    %46 = vector.shape_cast %45 : vector<1x1xf32> to vector<1x1xf32>
    %47 = vector.broadcast %46 : vector<1x1xf32> to vector<1x40xf32>
    %48 = vector.extract_strided_slice %37 {offsets = [0, 40], sizes = [1, 40], strides = [1, 1]} : vector<1x120xf32> to vector<1x40xf32>
    %cst_18 = arith.constant dense<0.000000e+00> : vector<1xf32>
    %49 = vector.multi_reduction <add>, %48, %cst_18 [1] : vector<1x40xf32> to vector<1xf32>
    %50 = vector.shape_cast %49 : vector<1xf32> to vector<1x1xf32>
    %cst_19 = arith.constant 3.125000e-03 : f32
    %51 = vector.broadcast %cst_19 : f32 to vector<1x1xf32>
    %52 = arith.mulf %50, %51 : vector<1x1xf32>
    %cst_20 = arith.constant 9.99999974E-6 : f32
    %53 = vector.broadcast %cst_20 : f32 to vector<1x1xf32>
    %54 = arith.addf %52, %53 : vector<1x1xf32>
    %55 = math.rsqrt %54 : vector<1x1xf32>
    %56 = vector.shape_cast %55 : vector<1x1xf32> to vector<1x1xf32>
    %57 = vector.broadcast %56 : vector<1x1xf32> to vector<1x40xf32>
    %58 = vector.extract_strided_slice %37 {offsets = [0, 80], sizes = [1, 40], strides = [1, 1]} : vector<1x120xf32> to vector<1x40xf32>
    %cst_21 = arith.constant dense<0.000000e+00> : vector<1xf32>
    %59 = vector.multi_reduction <add>, %58, %cst_21 [1] : vector<1x40xf32> to vector<1xf32>
    %60 = vector.shape_cast %59 : vector<1xf32> to vector<1x1xf32>
    %cst_22 = arith.constant 3.125000e-03 : f32
    %61 = vector.broadcast %cst_22 : f32 to vector<1x1xf32>
    %62 = arith.mulf %60, %61 : vector<1x1xf32>
    %cst_23 = arith.constant 9.99999974E-6 : f32
    %63 = vector.broadcast %cst_23 : f32 to vector<1x1xf32>
    %64 = arith.addf %62, %63 : vector<1x1xf32>
    %65 = math.rsqrt %64 : vector<1x1xf32>
    %66 = vector.shape_cast %65 : vector<1x1xf32> to vector<1x1xf32>
    %67 = vector.broadcast %66 : vector<1x1xf32> to vector<1x40xf32>
    %68 = tpu.concatenate %47, %57, %67 in 1 : vector<1x40xf32>, vector<1x40xf32>, vector<1x40xf32> -> vector<1x120xf32>
    %69 = vector.broadcast %68 : vector<1x120xf32> to vector<8x120xf32>
    %70 = arith.mulf %34, %69 : vector<8x120xf32>
    %c0_24 = arith.constant 0 : index
    %c0_25 = arith.constant 0 : index
    %c0_26 = arith.constant 0 : index
    %71 = vector.load %arg6[%c0_24, %c0_25, %c0_26] : memref<1x3x120xf32, #tpu.memory_space<vmem>>, vector<1x1x120xf32>
    %72 = vector.shape_cast %71 : vector<1x1x120xf32> to vector<120xf32>
    %73 = vector.shape_cast %72 : vector<120xf32> to vector<1x120xf32>
    %74 = vector.broadcast %73 : vector<1x120xf32> to vector<8x120xf32>
    %75 = arith.mulf %70, %74 : vector<8x120xf32>
    %c0_27 = arith.constant 0 : index
    %c0_28 = arith.constant 0 : index
    %c0_29 = arith.constant 0 : index
    %76 = vector.load %arg7[%c0_27, %c0_28, %c0_29] : memref<1x3x120xf32, #tpu.memory_space<vmem>>, vector<1x1x120xf32>
    %77 = vector.shape_cast %76 : vector<1x1x120xf32> to vector<120xf32>
    %78 = vector.shape_cast %77 : vector<120xf32> to vector<1x120xf32>
    %79 = vector.broadcast %78 : vector<1x120xf32> to vector<8x120xf32>
    %80 = arith.addf %75, %79 : vector<8x120xf32>
    %cst_30 = arith.constant 0.000000e+00 : f32
    %81 = vector.broadcast %cst_30 : f32 to vector<8x120xf32>
    %82 = arith.cmpf oge, %80, %81 : vector<8x120xf32>
    %c0_31 = arith.constant 0 : index
    %c0_32 = arith.constant 0 : index
    %c0_33 = arith.constant 0 : index
    %83 = vector.load %arg8[%c0_31, %c0_32, %c0_33] : memref<1x3x120xf32, #tpu.memory_space<vmem>>, vector<1x1x120xf32>
    %84 = vector.shape_cast %83 : vector<1x1x120xf32> to vector<120xf32>
    %85 = vector.shape_cast %84 : vector<120xf32> to vector<1x120xf32>
    %86 = vector.broadcast %85 : vector<1x120xf32> to vector<8x120xf32>
    %87 = arith.mulf %86, %80 : vector<8x120xf32>
    %88 = arith.select %82, %80, %87 : vector<8x120xi1>, vector<8x120xf32>
    %c0_34 = arith.constant 0 : index
    %c0_35 = arith.constant 0 : index
    %c0_36 = arith.constant 0 : index
    %89 = vector.load %arg3[%c0_34, %c0_35, %c0_36] : memref<1x120x120xf32, #tpu.memory_space<vmem>>, vector<1x120x120xf32>
    %90 = vector.shape_cast %89 : vector<1x120x120xf32> to vector<120x120xf32>
    %cst_37 = arith.constant dense<0.000000e+00> : vector<8x120xf32>
    %91 = tpu.matmul %88, %90, %cst_37 {dimension_numbers = #tpu.dot_dimension_numbers<[1], [0], [0], [1], [0, 0, 1, 1], [], []>} : vector<8x120xf32>, vector<120x120xf32>, vector<8x120xf32> -> vector<8x120xf32>
    %c0_38 = arith.constant 0 : index
    %c1 = arith.constant 1 : index
    %c0_39 = arith.constant 0 : index
    %92 = vector.load %arg5[%c0_38, %c1, %c0_39] : memref<1x3x120xf32, #tpu.memory_space<vmem>>, vector<1x1x120xf32>
    %93 = vector.shape_cast %92 : vector<1x1x120xf32> to vector<120xf32>
    %94 = vector.shape_cast %93 : vector<120xf32> to vector<1x120xf32>
    %95 = vector.broadcast %94 : vector<1x120xf32> to vector<8x120xf32>
    %96 = arith.addf %91, %95 : vector<8x120xf32>
    %cst_40 = arith.constant dense<0.000000e+00> : vector<120xf32>
    %97 = vector.multi_reduction <add>, %96, %cst_40 [0] : vector<8x120xf32> to vector<120xf32>
    %98 = vector.shape_cast %97 : vector<120xf32> to vector<1x120xf32>
    %99 = vector.extract_strided_slice %98 {offsets = [0, 0], sizes = [1, 40], strides = [1, 1]} : vector<1x120xf32> to vector<1x40xf32>
    %cst_41 = arith.constant dense<0.000000e+00> : vector<1xf32>
    %100 = vector.multi_reduction <add>, %99, %cst_41 [1] : vector<1x40xf32> to vector<1xf32>
    %101 = vector.shape_cast %100 : vector<1xf32> to vector<1x1xf32>
    %cst_42 = arith.constant 3.125000e-03 : f32
    %102 = vector.broadcast %cst_42 : f32 to vector<1x1xf32>
    %103 = arith.mulf %101, %102 : vector<1x1xf32>
    %104 = vector.shape_cast %103 : vector<1x1xf32> to vector<1x1xf32>
    %105 = vector.broadcast %104 : vector<1x1xf32> to vector<1x40xf32>
    %106 = vector.extract_strided_slice %98 {offsets = [0, 40], sizes = [1, 40], strides = [1, 1]} : vector<1x120xf32> to vector<1x40xf32>
    %cst_43 = arith.constant dense<0.000000e+00> : vector<1xf32>
    %107 = vector.multi_reduction <add>, %106, %cst_43 [1] : vector<1x40xf32> to vector<1xf32>
    %108 = vector.shape_cast %107 : vector<1xf32> to vector<1x1xf32>
    %cst_44 = arith.constant 3.125000e-03 : f32
    %109 = vector.broadcast %cst_44 : f32 to vector<1x1xf32>
    %110 = arith.mulf %108, %109 : vector<1x1xf32>
    %111 = vector.shape_cast %110 : vector<1x1xf32> to vector<1x1xf32>
    %112 = vector.broadcast %111 : vector<1x1xf32> to vector<1x40xf32>
    %113 = vector.extract_strided_slice %98 {offsets = [0, 80], sizes = [1, 40], strides = [1, 1]} : vector<1x120xf32> to vector<1x40xf32>
    %cst_45 = arith.constant dense<0.000000e+00> : vector<1xf32>
    %114 = vector.multi_reduction <add>, %113, %cst_45 [1] : vector<1x40xf32> to vector<1xf32>
    %115 = vector.shape_cast %114 : vector<1xf32> to vector<1x1xf32>
    %cst_46 = arith.constant 3.125000e-03 : f32
    %116 = vector.broadcast %cst_46 : f32 to vector<1x1xf32>
    %117 = arith.mulf %115, %116 : vector<1x1xf32>
    %118 = vector.shape_cast %117 : vector<1x1xf32> to vector<1x1xf32>
    %119 = vector.broadcast %118 : vector<1x1xf32> to vector<1x40xf32>
    %120 = tpu.concatenate %105, %112, %119 in 1 : vector<1x40xf32>, vector<1x40xf32>, vector<1x40xf32> -> vector<1x120xf32>
    %121 = vector.broadcast %120 : vector<1x120xf32> to vector<8x120xf32>
    %122 = arith.subf %96, %121 : vector<8x120xf32>
    %123 = arith.mulf %122, %122 : vector<8x120xf32>
    %cst_47 = arith.constant dense<0.000000e+00> : vector<120xf32>
    %124 = vector.multi_reduction <add>, %123, %cst_47 [0] : vector<8x120xf32> to vector<120xf32>
    %125 = vector.shape_cast %124 : vector<120xf32> to vector<1x120xf32>
    %126 = vector.extract_strided_slice %125 {offsets = [0, 0], sizes = [1, 40], strides = [1, 1]} : vector<1x120xf32> to vector<1x40xf32>
    %cst_48 = arith.constant dense<0.000000e+00> : vector<1xf32>
    %127 = vector.multi_reduction <add>, %126, %cst_48 [1] : vector<1x40xf32> to vector<1xf32>
    %128 = vector.shape_cast %127 : vector<1xf32> to vector<1x1xf32>
    %cst_49 = arith.constant 3.125000e-03 : f32
    %129 = vector.broadcast %cst_49 : f32 to vector<1x1xf32>
    %130 = arith.mulf %128, %129 : vector<1x1xf32>
    %cst_50 = arith.constant 9.99999974E-6 : f32
    %131 = vector.broadcast %cst_50 : f32 to vector<1x1xf32>
    %132 = arith.addf %130, %131 : vector<1x1xf32>
    %133 = math.rsqrt %132 : vector<1x1xf32>
    %134 = vector.shape_cast %133 : vector<1x1xf32> to vector<1x1xf32>
    %135 = vector.broadcast %134 : vector<1x1xf32> to vector<1x40xf32>
    %136 = vector.extract_strided_slice %125 {offsets = [0, 40], sizes = [1, 40], strides = [1, 1]} : vector<1x120xf32> to vector<1x40xf32>
    %cst_51 = arith.constant dense<0.000000e+00> : vector<1xf32>
    %137 = vector.multi_reduction <add>, %136, %cst_51 [1] : vector<1x40xf32> to vector<1xf32>
    %138 = vector.shape_cast %137 : vector<1xf32> to vector<1x1xf32>
    %cst_52 = arith.constant 3.125000e-03 : f32
    %139 = vector.broadcast %cst_52 : f32 to vector<1x1xf32>
    %140 = arith.mulf %138, %139 : vector<1x1xf32>
    %cst_53 = arith.constant 9.99999974E-6 : f32
    %141 = vector.broadcast %cst_53 : f32 to vector<1x1xf32>
    %142 = arith.addf %140, %141 : vector<1x1xf32>
    %143 = math.rsqrt %142 : vector<1x1xf32>
    %144 = vector.shape_cast %143 : vector<1x1xf32> to vector<1x1xf32>
    %145 = vector.broadcast %144 : vector<1x1xf32> to vector<1x40xf32>
    %146 = vector.extract_strided_slice %125 {offsets = [0, 80], sizes = [1, 40], strides = [1, 1]} : vector<1x120xf32> to vector<1x40xf32>
    %cst_54 = arith.constant dense<0.000000e+00> : vector<1xf32>
    %147 = vector.multi_reduction <add>, %146, %cst_54 [1] : vector<1x40xf32> to vector<1xf32>
    %148 = vector.shape_cast %147 : vector<1xf32> to vector<1x1xf32>
    %cst_55 = arith.constant 3.125000e-03 : f32
    %149 = vector.broadcast %cst_55 : f32 to vector<1x1xf32>
    %150 = arith.mulf %148, %149 : vector<1x1xf32>
    %cst_56 = arith.constant 9.99999974E-6 : f32
    %151 = vector.broadcast %cst_56 : f32 to vector<1x1xf32>
    %152 = arith.addf %150, %151 : vector<1x1xf32>
    %153 = math.rsqrt %152 : vector<1x1xf32>
    %154 = vector.shape_cast %153 : vector<1x1xf32> to vector<1x1xf32>
    %155 = vector.broadcast %154 : vector<1x1xf32> to vector<1x40xf32>
    %156 = tpu.concatenate %135, %145, %155 in 1 : vector<1x40xf32>, vector<1x40xf32>, vector<1x40xf32> -> vector<1x120xf32>
    %157 = vector.broadcast %156 : vector<1x120xf32> to vector<8x120xf32>
    %158 = arith.mulf %122, %157 : vector<8x120xf32>
    %c0_57 = arith.constant 0 : index
    %c1_58 = arith.constant 1 : index
    %c0_59 = arith.constant 0 : index
    %159 = vector.load %arg6[%c0_57, %c1_58, %c0_59] : memref<1x3x120xf32, #tpu.memory_space<vmem>>, vector<1x1x120xf32>
    %160 = vector.shape_cast %159 : vector<1x1x120xf32> to vector<120xf32>
    %161 = vector.shape_cast %160 : vector<120xf32> to vector<1x120xf32>
    %162 = vector.broadcast %161 : vector<1x120xf32> to vector<8x120xf32>
    %163 = arith.mulf %158, %162 : vector<8x120xf32>
    %c0_60 = arith.constant 0 : index
    %c1_61 = arith.constant 1 : index
    %c0_62 = arith.constant 0 : index
    %164 = vector.load %arg7[%c0_60, %c1_61, %c0_62] : memref<1x3x120xf32, #tpu.memory_space<vmem>>, vector<1x1x120xf32>
    %165 = vector.shape_cast %164 : vector<1x1x120xf32> to vector<120xf32>
    %166 = vector.shape_cast %165 : vector<120xf32> to vector<1x120xf32>
    %167 = vector.broadcast %166 : vector<1x120xf32> to vector<8x120xf32>
    %168 = arith.addf %163, %167 : vector<8x120xf32>
    %cst_63 = arith.constant 0.000000e+00 : f32
    %169 = vector.broadcast %cst_63 : f32 to vector<8x120xf32>
    %170 = arith.cmpf oge, %168, %169 : vector<8x120xf32>
    %c0_64 = arith.constant 0 : index
    %c1_65 = arith.constant 1 : index
    %c0_66 = arith.constant 0 : index
    %171 = vector.load %arg8[%c0_64, %c1_65, %c0_66] : memref<1x3x120xf32, #tpu.memory_space<vmem>>, vector<1x1x120xf32>
    %172 = vector.shape_cast %171 : vector<1x1x120xf32> to vector<120xf32>
    %173 = vector.shape_cast %172 : vector<120xf32> to vector<1x120xf32>
    %174 = vector.broadcast %173 : vector<1x120xf32> to vector<8x120xf32>
    %175 = arith.mulf %174, %168 : vector<8x120xf32>
    %176 = arith.select %170, %168, %175 : vector<8x120xi1>, vector<8x120xf32>
    %c0_67 = arith.constant 0 : index
    %c0_68 = arith.constant 0 : index
    %c0_69 = arith.constant 0 : index
    %177 = vector.load %arg4[%c0_67, %c0_68, %c0_69] : memref<1x120x120xf32, #tpu.memory_space<vmem>>, vector<1x120x120xf32>
    %178 = vector.shape_cast %177 : vector<1x120x120xf32> to vector<120x120xf32>
    %cst_70 = arith.constant dense<0.000000e+00> : vector<8x120xf32>
    %179 = tpu.matmul %176, %178, %cst_70 {dimension_numbers = #tpu.dot_dimension_numbers<[1], [0], [0], [1], [0, 0, 1, 1], [], []>} : vector<8x120xf32>, vector<120x120xf32>, vector<8x120xf32> -> vector<8x120xf32>
    %c0_71 = arith.constant 0 : index
    %c2 = arith.constant 2 : index
    %c0_72 = arith.constant 0 : index
    %180 = vector.load %arg5[%c0_71, %c2, %c0_72] : memref<1x3x120xf32, #tpu.memory_space<vmem>>, vector<1x1x120xf32>
    %181 = vector.shape_cast %180 : vector<1x1x120xf32> to vector<120xf32>
    %182 = vector.shape_cast %181 : vector<120xf32> to vector<1x120xf32>
    %183 = vector.broadcast %182 : vector<1x120xf32> to vector<8x120xf32>
    %184 = arith.addf %179, %183 : vector<8x120xf32>
    %cst_73 = arith.constant dense<0.000000e+00> : vector<120xf32>
    %185 = vector.multi_reduction <add>, %184, %cst_73 [0] : vector<8x120xf32> to vector<120xf32>
    %186 = vector.shape_cast %185 : vector<120xf32> to vector<1x120xf32>
    %187 = vector.extract_strided_slice %186 {offsets = [0, 0], sizes = [1, 40], strides = [1, 1]} : vector<1x120xf32> to vector<1x40xf32>
    %cst_74 = arith.constant dense<0.000000e+00> : vector<1xf32>
    %188 = vector.multi_reduction <add>, %187, %cst_74 [1] : vector<1x40xf32> to vector<1xf32>
    %189 = vector.shape_cast %188 : vector<1xf32> to vector<1x1xf32>
    %cst_75 = arith.constant 3.125000e-03 : f32
    %190 = vector.broadcast %cst_75 : f32 to vector<1x1xf32>
    %191 = arith.mulf %189, %190 : vector<1x1xf32>
    %192 = vector.shape_cast %191 : vector<1x1xf32> to vector<1x1xf32>
    %193 = vector.broadcast %192 : vector<1x1xf32> to vector<1x40xf32>
    %194 = vector.extract_strided_slice %186 {offsets = [0, 40], sizes = [1, 40], strides = [1, 1]} : vector<1x120xf32> to vector<1x40xf32>
    %cst_76 = arith.constant dense<0.000000e+00> : vector<1xf32>
    %195 = vector.multi_reduction <add>, %194, %cst_76 [1] : vector<1x40xf32> to vector<1xf32>
    %196 = vector.shape_cast %195 : vector<1xf32> to vector<1x1xf32>
    %cst_77 = arith.constant 3.125000e-03 : f32
    %197 = vector.broadcast %cst_77 : f32 to vector<1x1xf32>
    %198 = arith.mulf %196, %197 : vector<1x1xf32>
    %199 = vector.shape_cast %198 : vector<1x1xf32> to vector<1x1xf32>
    %200 = vector.broadcast %199 : vector<1x1xf32> to vector<1x40xf32>
    %201 = vector.extract_strided_slice %186 {offsets = [0, 80], sizes = [1, 40], strides = [1, 1]} : vector<1x120xf32> to vector<1x40xf32>
    %cst_78 = arith.constant dense<0.000000e+00> : vector<1xf32>
    %202 = vector.multi_reduction <add>, %201, %cst_78 [1] : vector<1x40xf32> to vector<1xf32>
    %203 = vector.shape_cast %202 : vector<1xf32> to vector<1x1xf32>
    %cst_79 = arith.constant 3.125000e-03 : f32
    %204 = vector.broadcast %cst_79 : f32 to vector<1x1xf32>
    %205 = arith.mulf %203, %204 : vector<1x1xf32>
    %206 = vector.shape_cast %205 : vector<1x1xf32> to vector<1x1xf32>
    %207 = vector.broadcast %206 : vector<1x1xf32> to vector<1x40xf32>
    %208 = tpu.concatenate %193, %200, %207 in 1 : vector<1x40xf32>, vector<1x40xf32>, vector<1x40xf32> -> vector<1x120xf32>
    %209 = vector.broadcast %208 : vector<1x120xf32> to vector<8x120xf32>
    %210 = arith.subf %184, %209 : vector<8x120xf32>
    %211 = arith.mulf %210, %210 : vector<8x120xf32>
    %cst_80 = arith.constant dense<0.000000e+00> : vector<120xf32>
    %212 = vector.multi_reduction <add>, %211, %cst_80 [0] : vector<8x120xf32> to vector<120xf32>
    %213 = vector.shape_cast %212 : vector<120xf32> to vector<1x120xf32>
    %214 = vector.extract_strided_slice %213 {offsets = [0, 0], sizes = [1, 40], strides = [1, 1]} : vector<1x120xf32> to vector<1x40xf32>
    %cst_81 = arith.constant dense<0.000000e+00> : vector<1xf32>
    %215 = vector.multi_reduction <add>, %214, %cst_81 [1] : vector<1x40xf32> to vector<1xf32>
    %216 = vector.shape_cast %215 : vector<1xf32> to vector<1x1xf32>
    %cst_82 = arith.constant 3.125000e-03 : f32
    %217 = vector.broadcast %cst_82 : f32 to vector<1x1xf32>
    %218 = arith.mulf %216, %217 : vector<1x1xf32>
    %cst_83 = arith.constant 9.99999974E-6 : f32
    %219 = vector.broadcast %cst_83 : f32 to vector<1x1xf32>
    %220 = arith.addf %218, %219 : vector<1x1xf32>
    %221 = math.rsqrt %220 : vector<1x1xf32>
    %222 = vector.shape_cast %221 : vector<1x1xf32> to vector<1x1xf32>
    %223 = vector.broadcast %222 : vector<1x1xf32> to vector<1x40xf32>
    %224 = vector.extract_strided_slice %213 {offsets = [0, 40], sizes = [1, 40], strides = [1, 1]} : vector<1x120xf32> to vector<1x40xf32>
    %cst_84 = arith.constant dense<0.000000e+00> : vector<1xf32>
    %225 = vector.multi_reduction <add>, %224, %cst_84 [1] : vector<1x40xf32> to vector<1xf32>
    %226 = vector.shape_cast %225 : vector<1xf32> to vector<1x1xf32>
    %cst_85 = arith.constant 3.125000e-03 : f32
    %227 = vector.broadcast %cst_85 : f32 to vector<1x1xf32>
    %228 = arith.mulf %226, %227 : vector<1x1xf32>
    %cst_86 = arith.constant 9.99999974E-6 : f32
    %229 = vector.broadcast %cst_86 : f32 to vector<1x1xf32>
    %230 = arith.addf %228, %229 : vector<1x1xf32>
    %231 = math.rsqrt %230 : vector<1x1xf32>
    %232 = vector.shape_cast %231 : vector<1x1xf32> to vector<1x1xf32>
    %233 = vector.broadcast %232 : vector<1x1xf32> to vector<1x40xf32>
    %234 = vector.extract_strided_slice %213 {offsets = [0, 80], sizes = [1, 40], strides = [1, 1]} : vector<1x120xf32> to vector<1x40xf32>
    %cst_87 = arith.constant dense<0.000000e+00> : vector<1xf32>
    %235 = vector.multi_reduction <add>, %234, %cst_87 [1] : vector<1x40xf32> to vector<1xf32>
    %236 = vector.shape_cast %235 : vector<1xf32> to vector<1x1xf32>
    %cst_88 = arith.constant 3.125000e-03 : f32
    %237 = vector.broadcast %cst_88 : f32 to vector<1x1xf32>
    %238 = arith.mulf %236, %237 : vector<1x1xf32>
    %cst_89 = arith.constant 9.99999974E-6 : f32
    %239 = vector.broadcast %cst_89 : f32 to vector<1x1xf32>
    %240 = arith.addf %238, %239 : vector<1x1xf32>
    %241 = math.rsqrt %240 : vector<1x1xf32>
    %242 = vector.shape_cast %241 : vector<1x1xf32> to vector<1x1xf32>
    %243 = vector.broadcast %242 : vector<1x1xf32> to vector<1x40xf32>
    %244 = tpu.concatenate %223, %233, %243 in 1 : vector<1x40xf32>, vector<1x40xf32>, vector<1x40xf32> -> vector<1x120xf32>
    %245 = vector.broadcast %244 : vector<1x120xf32> to vector<8x120xf32>
    %246 = arith.mulf %210, %245 : vector<8x120xf32>
    %c0_90 = arith.constant 0 : index
    %c2_91 = arith.constant 2 : index
    %c0_92 = arith.constant 0 : index
    %247 = vector.load %arg6[%c0_90, %c2_91, %c0_92] : memref<1x3x120xf32, #tpu.memory_space<vmem>>, vector<1x1x120xf32>
    %248 = vector.shape_cast %247 : vector<1x1x120xf32> to vector<120xf32>
    %249 = vector.shape_cast %248 : vector<120xf32> to vector<1x120xf32>
    %250 = vector.broadcast %249 : vector<1x120xf32> to vector<8x120xf32>
    %251 = arith.mulf %246, %250 : vector<8x120xf32>
    %c0_93 = arith.constant 0 : index
    %c2_94 = arith.constant 2 : index
    %c0_95 = arith.constant 0 : index
    %252 = vector.load %arg7[%c0_93, %c2_94, %c0_95] : memref<1x3x120xf32, #tpu.memory_space<vmem>>, vector<1x1x120xf32>
    %253 = vector.shape_cast %252 : vector<1x1x120xf32> to vector<120xf32>
    %254 = vector.shape_cast %253 : vector<120xf32> to vector<1x120xf32>
    %255 = vector.broadcast %254 : vector<1x120xf32> to vector<8x120xf32>
    %256 = arith.addf %251, %255 : vector<8x120xf32>
    %cst_96 = arith.constant 0.000000e+00 : f32
    %257 = vector.broadcast %cst_96 : f32 to vector<8x120xf32>
    %258 = arith.cmpf oge, %256, %257 : vector<8x120xf32>
    %c0_97 = arith.constant 0 : index
    %c2_98 = arith.constant 2 : index
    %c0_99 = arith.constant 0 : index
    %259 = vector.load %arg8[%c0_97, %c2_98, %c0_99] : memref<1x3x120xf32, #tpu.memory_space<vmem>>, vector<1x1x120xf32>
    %260 = vector.shape_cast %259 : vector<1x1x120xf32> to vector<120xf32>
    %261 = vector.shape_cast %260 : vector<120xf32> to vector<1x120xf32>
    %262 = vector.broadcast %261 : vector<1x120xf32> to vector<8x120xf32>
    %263 = arith.mulf %262, %256 : vector<8x120xf32>
    %264 = arith.select %258, %256, %263 : vector<8x120xi1>, vector<8x120xf32>
    %c0_100 = arith.constant 0 : index
    %c0_101 = arith.constant 0 : index
    %c0_102 = arith.constant 0 : index
    %265 = vector.load %arg9[%c0_100, %c0_101, %c0_102] : memref<1x8x120xf32, #tpu.memory_space<vmem>>, vector<1x8x120xf32>
    %266 = vector.shape_cast %265 : vector<1x8x120xf32> to vector<8x120xf32>
    %267 = vector.shape_cast %264 : vector<8x120xf32> to vector<1x8x120xf32>
    tpu.vector_store %arg9[%c0_100, %c0_101, %c0_102], %267 {strides = array<i32>} : memref<1x8x120xf32, #tpu.memory_space<vmem>>, vector<1x8x120xf32>,
    return
  }
  func.func @transform_0(%arg0: i32) -> (i32, i32) {
    %c0_i32 = arith.constant 0 : i32
    %c0_i32_0 = arith.constant 0 : i32
    %c0_i32_1 = arith.constant 0 : i32
    return %c0_i32, %c0_i32_0 : i32, i32
  }
  func.func @transform_1(%arg0: i32) -> (i32, i32, i32) {
    %c0_i32 = arith.constant 0 : i32
    %c0_i32_0 = arith.constant 0 : i32
    %c0_i32_1 = arith.constant 0 : i32
    return %arg0, %c0_i32, %c0_i32_0 : i32, i32, i32
  }
  func.func @transform_2(%arg0: i32) -> (i32, i32, i32) {
    %c0_i32 = arith.constant 0 : i32
    %c0_i32_0 = arith.constant 0 : i32
    %c0_i32_1 = arith.constant 0 : i32
    return %arg0, %c0_i32, %c0_i32_0 : i32, i32, i32
  }
  func.func @transform_3(%arg0: i32) -> (i32, i32, i32) {
    %c0_i32 = arith.constant 0 : i32
    %c0_i32_0 = arith.constant 0 : i32
    %c0_i32_1 = arith.constant 0 : i32
    return %arg0, %c0_i32, %c0_i32_0 : i32, i32, i32
  }
  func.func @transform_4(%arg0: i32) -> (i32, i32, i32) {
    %c0_i32 = arith.constant 0 : i32
    %c0_i32_0 = arith.constant 0 : i32
    %c0_i32_1 = arith.constant 0 : i32
    return %arg0, %c0_i32, %c0_i32_0 : i32, i32, i32
  }
  func.func @transform_5(%arg0: i32) -> (i32, i32, i32) {
    %c0_i32 = arith.constant 0 : i32
    %c0_i32_0 = arith.constant 0 : i32
    %c0_i32_1 = arith.constant 0 : i32
    return %arg0, %c0_i32, %c0_i32_0 : i32, i32, i32
  }
  func.func @transform_6(%arg0: i32) -> (i32, i32, i32) {
    %c0_i32 = arith.constant 0 : i32
    %c0_i32_0 = arith.constant 0 : i32
    %c0_i32_1 = arith.constant 0 : i32
    return %arg0, %c0_i32, %c0_i32_0 : i32, i32, i32
  }
  func.func @transform_7(%arg0: i32) -> (i32, i32, i32) {
    %c0_i32 = arith.constant 0 : i32
    %c0_i32_0 = arith.constant 0 : i32
    %c0_i32_1 = arith.constant 0 : i32
    return %arg0, %c0_i32, %c0_i32_0 : i32, i32, i32
  }
  func.func @transform_8(%arg0: i32) -> (i32, i32, i32) {
    %c0_i32 = arith.constant 0 : i32
    %c0_i32_0 = arith.constant 0 : i32
    %c0_i32_1 = arith.constant 0 : i32
    return %arg0, %c0_i32, %c0_i32_0 : i32, i32, i32
  }
}

module attributes {stable_mosaic.version = 11 : i64} {
  func.func @_graph_head_kernel(%arg0: memref<3x8x120xf32, #tpu.memory_space<vmem>>, %arg1: memref<3x120x8xf32, #tpu.memory_space<vmem>>, %arg2: memref<4xf32, #tpu.memory_space<smem>>, %arg3: memref<8x8xf32, #tpu.memory_space<vmem>>, %arg4: memref<8x8xf32, #tpu.memory_space<vmem>>, %arg5: memref<8x32xf32, #tpu.memory_space<vmem>>, %arg6: memref<3x32x32xf32, #tpu.memory_space<vmem>>, %arg7: memref<4x4x8xf32, #tpu.memory_space<vmem>>, %arg8: memref<4x4x8xf32, #tpu.memory_space<vmem>>, %arg9: memref<4x32xf32, #tpu.memory_space<vmem>>, %arg10: memref<4x32xf32, #tpu.memory_space<vmem>>, %arg11: memref<4x32xf32, #tpu.memory_space<vmem>>, %arg12: memref<4x32xf32, #tpu.memory_space<vmem>>, %arg13: memref<4xf32, #tpu.memory_space<smem>>, %arg14: memref<2x8xf32, #tpu.memory_space<vmem>>, %arg15: memref<2x1xf32, #tpu.memory_space<vmem>>, %arg16: memref<32x16xf32, #tpu.memory_space<vmem>>, %arg17: memref<1x16xf32, #tpu.memory_space<vmem>>, %arg18: memref<16x8xf32, #tpu.memory_space<vmem>>, %arg19: memref<1x8xf32, #tpu.memory_space<vmem>>, %arg20: memref<8x3xf32, #tpu.memory_space<vmem>>, %arg21: memref<1x3xf32, #tpu.memory_space<vmem>>, %arg22: memref<2x3xf32, #tpu.memory_space<vmem>>) attributes {dimension_semantics = [], scalar_prefetch = 0 : i64, scratch_operands = 0 : i64, tpu.core_type = #tpu.core_type<tc>} {
    %c0 = arith.constant 0 : index
    %c0_0 = arith.constant 0 : index
    %c0_1 = arith.constant 0 : index
    %0 = vector.load %arg0[%c0, %c0_0, %c0_1] : memref<3x8x120xf32, #tpu.memory_space<vmem>>, vector<1x8x120xf32>
    %1 = vector.shape_cast %0 : vector<1x8x120xf32> to vector<8x120xf32>
    %c0_2 = arith.constant 0 : index
    %c0_3 = arith.constant 0 : index
    %c0_4 = arith.constant 0 : index
    %2 = vector.load %arg1[%c0_2, %c0_3, %c0_4] : memref<3x120x8xf32, #tpu.memory_space<vmem>>, vector<1x120x8xf32>
    %3 = vector.shape_cast %2 : vector<1x120x8xf32> to vector<120x8xf32>
    %cst = arith.constant dense<0.000000e+00> : vector<8x8xf32>
    %4 = tpu.matmul %1, %3, %cst {dimension_numbers = #tpu.dot_dimension_numbers<[1], [0], [0], [1], [0, 0, 1, 1], [], []>} : vector<8x120xf32>, vector<120x8xf32>, vector<8x8xf32> -> vector<8x8xf32>
    %c1 = arith.constant 1 : index
    %c0_5 = arith.constant 0 : index
    %c0_6 = arith.constant 0 : index
    %5 = vector.load %arg0[%c1, %c0_5, %c0_6] : memref<3x8x120xf32, #tpu.memory_space<vmem>>, vector<1x8x120xf32>
    %6 = vector.shape_cast %5 : vector<1x8x120xf32> to vector<8x120xf32>
    %c1_7 = arith.constant 1 : index
    %c0_8 = arith.constant 0 : index
    %c0_9 = arith.constant 0 : index
    %7 = vector.load %arg1[%c1_7, %c0_8, %c0_9] : memref<3x120x8xf32, #tpu.memory_space<vmem>>, vector<1x120x8xf32>
    %8 = vector.shape_cast %7 : vector<1x120x8xf32> to vector<120x8xf32>
    %cst_10 = arith.constant dense<0.000000e+00> : vector<8x8xf32>
    %9 = tpu.matmul %6, %8, %cst_10 {dimension_numbers = #tpu.dot_dimension_numbers<[1], [0], [0], [1], [0, 0, 1, 1], [], []>} : vector<8x120xf32>, vector<120x8xf32>, vector<8x8xf32> -> vector<8x8xf32>
    %10 = arith.addf %4, %9 : vector<8x8xf32>
    %c2 = arith.constant 2 : index
    %c0_11 = arith.constant 0 : index
    %c0_12 = arith.constant 0 : index
    %11 = vector.load %arg0[%c2, %c0_11, %c0_12] : memref<3x8x120xf32, #tpu.memory_space<vmem>>, vector<1x8x120xf32>
    %12 = vector.shape_cast %11 : vector<1x8x120xf32> to vector<8x120xf32>
    %c2_13 = arith.constant 2 : index
    %c0_14 = arith.constant 0 : index
    %c0_15 = arith.constant 0 : index
    %13 = vector.load %arg1[%c2_13, %c0_14, %c0_15] : memref<3x120x8xf32, #tpu.memory_space<vmem>>, vector<1x120x8xf32>
    %14 = vector.shape_cast %13 : vector<1x120x8xf32> to vector<120x8xf32>
    %cst_16 = arith.constant dense<0.000000e+00> : vector<8x8xf32>
    %15 = tpu.matmul %12, %14, %cst_16 {dimension_numbers = #tpu.dot_dimension_numbers<[1], [0], [0], [1], [0, 0, 1, 1], [], []>} : vector<8x120xf32>, vector<120x8xf32>, vector<8x8xf32> -> vector<8x8xf32>
    %16 = arith.addf %10, %15 : vector<8x8xf32>
    %c0_17 = arith.constant 0 : index
    %17 = memref.load %arg2[%c0_17] : memref<4xf32, #tpu.memory_space<smem>>
    %18 = vector.broadcast %17 : f32 to vector<8x8xf32>
    %19 = arith.addf %16, %18 : vector<8x8xf32>
    %cst_18 = arith.constant dense<0.000000e+00> : vector<8xf32>
    %20 = vector.multi_reduction <add>, %19, %cst_18 [1] : vector<8x8xf32> to vector<8xf32>
    %21 = vector.shape_cast %20 : vector<8xf32> to vector<8x1xf32>
    %cst_19 = arith.constant dense<0.000000e+00> : vector<1xf32>
    %22 = vector.multi_reduction <add>, %21, %cst_19 [0] : vector<8x1xf32> to vector<1xf32>
    %23 = vector.shape_cast %22 : vector<1xf32> to vector<1x1xf32>
    %cst_20 = arith.constant 1.562500e-02 : f32
    %24 = vector.broadcast %cst_20 : f32 to vector<1x1xf32>
    %25 = arith.mulf %23, %24 : vector<1x1xf32>
    %26 = vector.broadcast %25 : vector<1x1xf32> to vector<8x8xf32>
    %27 = arith.subf %19, %26 : vector<8x8xf32>
    %28 = arith.mulf %27, %27 : vector<8x8xf32>
    %cst_21 = arith.constant dense<0.000000e+00> : vector<8xf32>
    %29 = vector.multi_reduction <add>, %28, %cst_21 [1] : vector<8x8xf32> to vector<8xf32>
    %30 = vector.shape_cast %29 : vector<8xf32> to vector<8x1xf32>
    %cst_22 = arith.constant dense<0.000000e+00> : vector<1xf32>
    %31 = vector.multi_reduction <add>, %30, %cst_22 [0] : vector<8x1xf32> to vector<1xf32>
    %32 = vector.shape_cast %31 : vector<1xf32> to vector<1x1xf32>
    %cst_23 = arith.constant 1.562500e-02 : f32
    %33 = vector.broadcast %cst_23 : f32 to vector<1x1xf32>
    %34 = arith.mulf %32, %33 : vector<1x1xf32>
    %cst_24 = arith.constant 9.99999974E-6 : f32
    %35 = vector.broadcast %cst_24 : f32 to vector<1x1xf32>
    %36 = arith.addf %34, %35 : vector<1x1xf32>
    %37 = math.rsqrt %36 : vector<1x1xf32>
    %38 = vector.broadcast %37 : vector<1x1xf32> to vector<8x8xf32>
    %39 = arith.mulf %27, %38 : vector<8x8xf32>
    %c1_25 = arith.constant 1 : index
    %40 = memref.load %arg2[%c1_25] : memref<4xf32, #tpu.memory_space<smem>>
    %41 = vector.broadcast %40 : f32 to vector<8x8xf32>
    %42 = arith.mulf %39, %41 : vector<8x8xf32>
    %c2_26 = arith.constant 2 : index
    %43 = memref.load %arg2[%c2_26] : memref<4xf32, #tpu.memory_space<smem>>
    %44 = vector.broadcast %43 : f32 to vector<8x8xf32>
    %45 = arith.addf %42, %44 : vector<8x8xf32>
    %cst_27 = arith.constant 0.000000e+00 : f32
    %46 = vector.broadcast %cst_27 : f32 to vector<8x8xf32>
    %47 = arith.cmpf oge, %45, %46 : vector<8x8xf32>
    %c3 = arith.constant 3 : index
    %48 = memref.load %arg2[%c3] : memref<4xf32, #tpu.memory_space<smem>>
    %49 = vector.broadcast %48 : f32 to vector<8x8xf32>
    %50 = arith.mulf %49, %45 : vector<8x8xf32>
    %51 = arith.select %47, %45, %50 : vector<8x8xi1>, vector<8x8xf32>
    %c0_28 = arith.constant 0 : index
    %c0_29 = arith.constant 0 : index
    %52 = vector.load %arg3[%c0_28, %c0_29] : memref<8x8xf32, #tpu.memory_space<vmem>>, vector<8x8xf32>
    %c0_30 = arith.constant 0 : index
    %c0_31 = arith.constant 0 : index
    %53 = vector.load %arg4[%c0_30, %c0_31] : memref<8x8xf32, #tpu.memory_space<vmem>>, vector<8x8xf32>
    %c0_32 = arith.constant 0 : index
    %c0_33 = arith.constant 0 : index
    %54 = vector.load %arg5[%c0_32, %c0_33] : memref<8x32xf32, #tpu.memory_space<vmem>>, vector<8x32xf32>
    %cst_34 = arith.constant dense<0.000000e+00> : vector<8x32xf32>
    %55 = tpu.matmul %51, %54, %cst_34 {dimension_numbers = #tpu.dot_dimension_numbers<[1], [0], [0], [1], [0, 0, 1, 1], [], []>} : vector<8x8xf32>, vector<8x32xf32>, vector<8x32xf32> -> vector<8x32xf32>
    %56 = vector.extract_strided_slice %55 {offsets = [0, 0], sizes = [8, 8], strides = [1, 1]} : vector<8x32xf32> to vector<8x8xf32>
    %c0_35 = arith.constant 0 : index
    %c0_36 = arith.constant 0 : index
    %c0_37 = arith.constant 0 : index
    %57 = vector.load %arg8[%c0_35, %c0_36, %c0_37] : memref<4x4x8xf32, #tpu.memory_space<vmem>>, vector<1x1x8xf32>
    %58 = vector.shape_cast %57 : vector<1x1x8xf32> to vector<8xf32>
    %59 = vector.shape_cast %58 : vector<8xf32> to vector<1x8xf32>
    %60 = vector.broadcast %59 : vector<1x8xf32> to vector<8x8xf32>
    %61 = arith.mulf %56, %60 : vector<8x8xf32>
    %cst_38 = arith.constant dense<0.000000e+00> : vector<8xf32>
    %62 = vector.multi_reduction <add>, %61, %cst_38 [1] : vector<8x8xf32> to vector<8xf32>
    %63 = vector.shape_cast %62 : vector<8xf32> to vector<8x1xf32>
    %c0_39 = arith.constant 0 : index
    %c0_40 = arith.constant 0 : index
    %c0_41 = arith.constant 0 : index
    %64 = vector.load %arg7[%c0_39, %c0_40, %c0_41] : memref<4x4x8xf32, #tpu.memory_space<vmem>>, vector<1x1x8xf32>
    %65 = vector.shape_cast %64 : vector<1x1x8xf32> to vector<8xf32>
    %66 = vector.shape_cast %65 : vector<8xf32> to vector<1x8xf32>
    %67 = vector.broadcast %66 : vector<1x8xf32> to vector<8x8xf32>
    %68 = arith.mulf %56, %67 : vector<8x8xf32>
    %cst_42 = arith.constant dense<0.000000e+00> : vector<8xf32>
    %69 = vector.multi_reduction <add>, %68, %cst_42 [1] : vector<8x8xf32> to vector<8xf32>
    %70 = vector.shape_cast %69 : vector<8xf32> to vector<8x1xf32>
    %71 = vector.broadcast %70 : vector<8x1xf32> to vector<8x8xf32>
    %72 = arith.mulf %71, %53 : vector<8x8xf32>
    %cst_43 = arith.constant dense<0.000000e+00> : vector<8xf32>
    %73 = vector.multi_reduction <add>, %72, %cst_43 [0] : vector<8x8xf32> to vector<8xf32>
    %74 = vector.shape_cast %73 : vector<8xf32> to vector<1x8xf32>
    %75 = vector.broadcast %63 : vector<8x1xf32> to vector<8x8xf32>
    %76 = vector.broadcast %74 : vector<1x8xf32> to vector<8x8xf32>
    %77 = arith.addf %75, %76 : vector<8x8xf32>
    %cst_44 = arith.constant 0.000000e+00 : f32
    %78 = vector.broadcast %cst_44 : f32 to vector<8x8xf32>
    %79 = arith.cmpf oge, %77, %78 : vector<8x8xf32>
    %cst_45 = arith.constant 2.000000e-01 : f32
    %80 = vector.broadcast %cst_45 : f32 to vector<8x8xf32>
    %81 = arith.mulf %80, %77 : vector<8x8xf32>
    %82 = arith.select %79, %77, %81 : vector<8x8xi1>, vector<8x8xf32>
    %cst_46 = arith.constant 0.000000e+00 : f32
    %83 = vector.broadcast %cst_46 : f32 to vector<8x8xf32>
    %84 = arith.cmpf ogt, %52, %83 : vector<8x8xf32>
    %cst_47 = arith.constant -1.000000e+30 : f32
    %85 = vector.broadcast %cst_47 : f32 to vector<8x8xf32>
    %86 = arith.select %84, %82, %85 : vector<8x8xi1>, vector<8x8xf32>
    %cst_48 = arith.constant dense<0xFF800000> : vector<8xf32>
    %87 = vector.multi_reduction <maximumf>, %86, %cst_48 [1] : vector<8x8xf32> to vector<8xf32>
    %88 = vector.shape_cast %87 : vector<8xf32> to vector<8x1xf32>
    %89 = vector.broadcast %88 : vector<8x1xf32> to vector<8x8xf32>
    %90 = arith.subf %86, %89 : vector<8x8xf32>
    %91 = math.exp %90 : vector<8x8xf32>
    %cst_49 = arith.constant dense<0.000000e+00> : vector<8xf32>
    %92 = vector.multi_reduction <add>, %91, %cst_49 [1] : vector<8x8xf32> to vector<8xf32>
    %93 = vector.shape_cast %92 : vector<8xf32> to vector<8x1xf32>
    %94 = vector.broadcast %93 : vector<8x1xf32> to vector<8x8xf32>
    %95 = arith.divf %91, %94 : vector<8x8xf32>
    %cst_50 = arith.constant dense<0.000000e+00> : vector<8x8xf32>
    %96 = tpu.matmul %95, %56, %cst_50 {dimension_numbers = #tpu.dot_dimension_numbers<[1], [0], [0], [1], [0, 0, 1, 1], [], []>} : vector<8x8xf32>, vector<8x8xf32>, vector<8x8xf32> -> vector<8x8xf32>
    %97 = vector.extract_strided_slice %55 {offsets = [0, 8], sizes = [8, 8], strides = [1, 1]} : vector<8x32xf32> to vector<8x8xf32>
    %c0_51 = arith.constant 0 : index
    %c1_52 = arith.constant 1 : index
    %c0_53 = arith.constant 0 : index
    %98 = vector.load %arg8[%c0_51, %c1_52, %c0_53] : memref<4x4x8xf32, #tpu.memory_space<vmem>>, vector<1x1x8xf32>
    %99 = vector.shape_cast %98 : vector<1x1x8xf32> to vector<8xf32>
    %100 = vector.shape_cast %99 : vector<8xf32> to vector<1x8xf32>
    %101 = vector.broadcast %100 : vector<1x8xf32> to vector<8x8xf32>
    %102 = arith.mulf %97, %101 : vector<8x8xf32>
    %cst_54 = arith.constant dense<0.000000e+00> : vector<8xf32>
    %103 = vector.multi_reduction <add>, %102, %cst_54 [1] : vector<8x8xf32> to vector<8xf32>
    %104 = vector.shape_cast %103 : vector<8xf32> to vector<8x1xf32>
    %c0_55 = arith.constant 0 : index
    %c1_56 = arith.constant 1 : index
    %c0_57 = arith.constant 0 : index
    %105 = vector.load %arg7[%c0_55, %c1_56, %c0_57] : memref<4x4x8xf32, #tpu.memory_space<vmem>>, vector<1x1x8xf32>
    %106 = vector.shape_cast %105 : vector<1x1x8xf32> to vector<8xf32>
    %107 = vector.shape_cast %106 : vector<8xf32> to vector<1x8xf32>
    %108 = vector.broadcast %107 : vector<1x8xf32> to vector<8x8xf32>
    %109 = arith.mulf %97, %108 : vector<8x8xf32>
    %cst_58 = arith.constant dense<0.000000e+00> : vector<8xf32>
    %110 = vector.multi_reduction <add>, %109, %cst_58 [1] : vector<8x8xf32> to vector<8xf32>
    %111 = vector.shape_cast %110 : vector<8xf32> to vector<8x1xf32>
    %112 = vector.broadcast %111 : vector<8x1xf32> to vector<8x8xf32>
    %113 = arith.mulf %112, %53 : vector<8x8xf32>
    %cst_59 = arith.constant dense<0.000000e+00> : vector<8xf32>
    %114 = vector.multi_reduction <add>, %113, %cst_59 [0] : vector<8x8xf32> to vector<8xf32>
    %115 = vector.shape_cast %114 : vector<8xf32> to vector<1x8xf32>
    %116 = vector.broadcast %104 : vector<8x1xf32> to vector<8x8xf32>
    %117 = vector.broadcast %115 : vector<1x8xf32> to vector<8x8xf32>
    %118 = arith.addf %116, %117 : vector<8x8xf32>
    %cst_60 = arith.constant 0.000000e+00 : f32
    %119 = vector.broadcast %cst_60 : f32 to vector<8x8xf32>
    %120 = arith.cmpf oge, %118, %119 : vector<8x8xf32>
    %cst_61 = arith.constant 2.000000e-01 : f32
    %121 = vector.broadcast %cst_61 : f32 to vector<8x8xf32>
    %122 = arith.mulf %121, %118 : vector<8x8xf32>
    %123 = arith.select %120, %118, %122 : vector<8x8xi1>, vector<8x8xf32>
    %cst_62 = arith.constant 0.000000e+00 : f32
    %124 = vector.broadcast %cst_62 : f32 to vector<8x8xf32>
    %125 = arith.cmpf ogt, %52, %124 : vector<8x8xf32>
    %cst_63 = arith.constant -1.000000e+30 : f32
    %126 = vector.broadcast %cst_63 : f32 to vector<8x8xf32>
    %127 = arith.select %125, %123, %126 : vector<8x8xi1>, vector<8x8xf32>
    %cst_64 = arith.constant dense<0xFF800000> : vector<8xf32>
    %128 = vector.multi_reduction <maximumf>, %127, %cst_64 [1] : vector<8x8xf32> to vector<8xf32>
    %129 = vector.shape_cast %128 : vector<8xf32> to vector<8x1xf32>
    %130 = vector.broadcast %129 : vector<8x1xf32> to vector<8x8xf32>
    %131 = arith.subf %127, %130 : vector<8x8xf32>
    %132 = math.exp %131 : vector<8x8xf32>
    %cst_65 = arith.constant dense<0.000000e+00> : vector<8xf32>
    %133 = vector.multi_reduction <add>, %132, %cst_65 [1] : vector<8x8xf32> to vector<8xf32>
    %134 = vector.shape_cast %133 : vector<8xf32> to vector<8x1xf32>
    %135 = vector.broadcast %134 : vector<8x1xf32> to vector<8x8xf32>
    %136 = arith.divf %132, %135 : vector<8x8xf32>
    %cst_66 = arith.constant dense<0.000000e+00> : vector<8x8xf32>
    %137 = tpu.matmul %136, %97, %cst_66 {dimension_numbers = #tpu.dot_dimension_numbers<[1], [0], [0], [1], [0, 0, 1, 1], [], []>} : vector<8x8xf32>, vector<8x8xf32>, vector<8x8xf32> -> vector<8x8xf32>
    %138 = vector.extract_strided_slice %55 {offsets = [0, 16], sizes = [8, 8], strides = [1, 1]} : vector<8x32xf32> to vector<8x8xf32>
    %c0_67 = arith.constant 0 : index
    %c2_68 = arith.constant 2 : index
    %c0_69 = arith.constant 0 : index
    %139 = vector.load %arg8[%c0_67, %c2_68, %c0_69] : memref<4x4x8xf32, #tpu.memory_space<vmem>>, vector<1x1x8xf32>
    %140 = vector.shape_cast %139 : vector<1x1x8xf32> to vector<8xf32>
    %141 = vector.shape_cast %140 : vector<8xf32> to vector<1x8xf32>
    %142 = vector.broadcast %141 : vector<1x8xf32> to vector<8x8xf32>
    %143 = arith.mulf %138, %142 : vector<8x8xf32>
    %cst_70 = arith.constant dense<0.000000e+00> : vector<8xf32>
    %144 = vector.multi_reduction <add>, %143, %cst_70 [1] : vector<8x8xf32> to vector<8xf32>
    %145 = vector.shape_cast %144 : vector<8xf32> to vector<8x1xf32>
    %c0_71 = arith.constant 0 : index
    %c2_72 = arith.constant 2 : index
    %c0_73 = arith.constant 0 : index
    %146 = vector.load %arg7[%c0_71, %c2_72, %c0_73] : memref<4x4x8xf32, #tpu.memory_space<vmem>>, vector<1x1x8xf32>
    %147 = vector.shape_cast %146 : vector<1x1x8xf32> to vector<8xf32>
    %148 = vector.shape_cast %147 : vector<8xf32> to vector<1x8xf32>
    %149 = vector.broadcast %148 : vector<1x8xf32> to vector<8x8xf32>
    %150 = arith.mulf %138, %149 : vector<8x8xf32>
    %cst_74 = arith.constant dense<0.000000e+00> : vector<8xf32>
    %151 = vector.multi_reduction <add>, %150, %cst_74 [1] : vector<8x8xf32> to vector<8xf32>
    %152 = vector.shape_cast %151 : vector<8xf32> to vector<8x1xf32>
    %153 = vector.broadcast %152 : vector<8x1xf32> to vector<8x8xf32>
    %154 = arith.mulf %153, %53 : vector<8x8xf32>
    %cst_75 = arith.constant dense<0.000000e+00> : vector<8xf32>
    %155 = vector.multi_reduction <add>, %154, %cst_75 [0] : vector<8x8xf32> to vector<8xf32>
    %156 = vector.shape_cast %155 : vector<8xf32> to vector<1x8xf32>
    %157 = vector.broadcast %145 : vector<8x1xf32> to vector<8x8xf32>
    %158 = vector.broadcast %156 : vector<1x8xf32> to vector<8x8xf32>
    %159 = arith.addf %157, %158 : vector<8x8xf32>
    %cst_76 = arith.constant 0.000000e+00 : f32
    %160 = vector.broadcast %cst_76 : f32 to vector<8x8xf32>
    %161 = arith.cmpf oge, %159, %160 : vector<8x8xf32>
    %cst_77 = arith.constant 2.000000e-01 : f32
    %162 = vector.broadcast %cst_77 : f32 to vector<8x8xf32>
    %163 = arith.mulf %162, %159 : vector<8x8xf32>
    %164 = arith.select %161, %159, %163 : vector<8x8xi1>, vector<8x8xf32>
    %cst_78 = arith.constant 0.000000e+00 : f32
    %165 = vector.broadcast %cst_78 : f32 to vector<8x8xf32>
    %166 = arith.cmpf ogt, %52, %165 : vector<8x8xf32>
    %cst_79 = arith.constant -1.000000e+30 : f32
    %167 = vector.broadcast %cst_79 : f32 to vector<8x8xf32>
    %168 = arith.select %166, %164, %167 : vector<8x8xi1>, vector<8x8xf32>
    %cst_80 = arith.constant dense<0xFF800000> : vector<8xf32>
    %169 = vector.multi_reduction <maximumf>, %168, %cst_80 [1] : vector<8x8xf32> to vector<8xf32>
    %170 = vector.shape_cast %169 : vector<8xf32> to vector<8x1xf32>
    %171 = vector.broadcast %170 : vector<8x1xf32> to vector<8x8xf32>
    %172 = arith.subf %168, %171 : vector<8x8xf32>
    %173 = math.exp %172 : vector<8x8xf32>
    %cst_81 = arith.constant dense<0.000000e+00> : vector<8xf32>
    %174 = vector.multi_reduction <add>, %173, %cst_81 [1] : vector<8x8xf32> to vector<8xf32>
    %175 = vector.shape_cast %174 : vector<8xf32> to vector<8x1xf32>
    %176 = vector.broadcast %175 : vector<8x1xf32> to vector<8x8xf32>
    %177 = arith.divf %173, %176 : vector<8x8xf32>
    %cst_82 = arith.constant dense<0.000000e+00> : vector<8x8xf32>
    %178 = tpu.matmul %177, %138, %cst_82 {dimension_numbers = #tpu.dot_dimension_numbers<[1], [0], [0], [1], [0, 0, 1, 1], [], []>} : vector<8x8xf32>, vector<8x8xf32>, vector<8x8xf32> -> vector<8x8xf32>
    %179 = vector.extract_strided_slice %55 {offsets = [0, 24], sizes = [8, 8], strides = [1, 1]} : vector<8x32xf32> to vector<8x8xf32>
    %c0_83 = arith.constant 0 : index
    %c3_84 = arith.constant 3 : index
    %c0_85 = arith.constant 0 : index
    %180 = vector.load %arg8[%c0_83, %c3_84, %c0_85] : memref<4x4x8xf32, #tpu.memory_space<vmem>>, vector<1x1x8xf32>
    %181 = vector.shape_cast %180 : vector<1x1x8xf32> to vector<8xf32>
    %182 = vector.shape_cast %181 : vector<8xf32> to vector<1x8xf32>
    %183 = vector.broadcast %182 : vector<1x8xf32> to vector<8x8xf32>
    %184 = arith.mulf %179, %183 : vector<8x8xf32>
    %cst_86 = arith.constant dense<0.000000e+00> : vector<8xf32>
    %185 = vector.multi_reduction <add>, %184, %cst_86 [1] : vector<8x8xf32> to vector<8xf32>
    %186 = vector.shape_cast %185 : vector<8xf32> to vector<8x1xf32>
    %c0_87 = arith.constant 0 : index
    %c3_88 = arith.constant 3 : index
    %c0_89 = arith.constant 0 : index
    %187 = vector.load %arg7[%c0_87, %c3_88, %c0_89] : memref<4x4x8xf32, #tpu.memory_space<vmem>>, vector<1x1x8xf32>
    %188 = vector.shape_cast %187 : vector<1x1x8xf32> to vector<8xf32>
    %189 = vector.shape_cast %188 : vector<8xf32> to vector<1x8xf32>
    %190 = vector.broadcast %189 : vector<1x8xf32> to vector<8x8xf32>
    %191 = arith.mulf %179, %190 : vector<8x8xf32>
    %cst_90 = arith.constant dense<0.000000e+00> : vector<8xf32>
    %192 = vector.multi_reduction <add>, %191, %cst_90 [1] : vector<8x8xf32> to vector<8xf32>
    %193 = vector.shape_cast %192 : vector<8xf32> to vector<8x1xf32>
    %194 = vector.broadcast %193 : vector<8x1xf32> to vector<8x8xf32>
    %195 = arith.mulf %194, %53 : vector<8x8xf32>
    %cst_91 = arith.constant dense<0.000000e+00> : vector<8xf32>
    %196 = vector.multi_reduction <add>, %195, %cst_91 [0] : vector<8x8xf32> to vector<8xf32>
    %197 = vector.shape_cast %196 : vector<8xf32> to vector<1x8xf32>
    %198 = vector.broadcast %186 : vector<8x1xf32> to vector<8x8xf32>
    %199 = vector.broadcast %197 : vector<1x8xf32> to vector<8x8xf32>
    %200 = arith.addf %198, %199 : vector<8x8xf32>
    %cst_92 = arith.constant 0.000000e+00 : f32
    %201 = vector.broadcast %cst_92 : f32 to vector<8x8xf32>
    %202 = arith.cmpf oge, %200, %201 : vector<8x8xf32>
    %cst_93 = arith.constant 2.000000e-01 : f32
    %203 = vector.broadcast %cst_93 : f32 to vector<8x8xf32>
    %204 = arith.mulf %203, %200 : vector<8x8xf32>
    %205 = arith.select %202, %200, %204 : vector<8x8xi1>, vector<8x8xf32>
    %cst_94 = arith.constant 0.000000e+00 : f32
    %206 = vector.broadcast %cst_94 : f32 to vector<8x8xf32>
    %207 = arith.cmpf ogt, %52, %206 : vector<8x8xf32>
    %cst_95 = arith.constant -1.000000e+30 : f32
    %208 = vector.broadcast %cst_95 : f32 to vector<8x8xf32>
    %209 = arith.select %207, %205, %208 : vector<8x8xi1>, vector<8x8xf32>
    %cst_96 = arith.constant dense<0xFF800000> : vector<8xf32>
    %210 = vector.multi_reduction <maximumf>, %209, %cst_96 [1] : vector<8x8xf32> to vector<8xf32>
    %211 = vector.shape_cast %210 : vector<8xf32> to vector<8x1xf32>
    %212 = vector.broadcast %211 : vector<8x1xf32> to vector<8x8xf32>
    %213 = arith.subf %209, %212 : vector<8x8xf32>
    %214 = math.exp %213 : vector<8x8xf32>
    %cst_97 = arith.constant dense<0.000000e+00> : vector<8xf32>
    %215 = vector.multi_reduction <add>, %214, %cst_97 [1] : vector<8x8xf32> to vector<8xf32>
    %216 = vector.shape_cast %215 : vector<8xf32> to vector<8x1xf32>
    %217 = vector.broadcast %216 : vector<8x1xf32> to vector<8x8xf32>
    %218 = arith.divf %214, %217 : vector<8x8xf32>
    %cst_98 = arith.constant dense<0.000000e+00> : vector<8x8xf32>
    %219 = tpu.matmul %218, %179, %cst_98 {dimension_numbers = #tpu.dot_dimension_numbers<[1], [0], [0], [1], [0, 0, 1, 1], [], []>} : vector<8x8xf32>, vector<8x8xf32>, vector<8x8xf32> -> vector<8x8xf32>
    %220 = tpu.concatenate %96, %137, %178, %219 in 1 : vector<8x8xf32>, vector<8x8xf32>, vector<8x8xf32>, vector<8x8xf32> -> vector<8x32xf32>
    %c0_99 = arith.constant 0 : index
    %c0_100 = arith.constant 0 : index
    %221 = vector.load %arg9[%c0_99, %c0_100] : memref<4x32xf32, #tpu.memory_space<vmem>>, vector<1x32xf32>
    %222 = vector.shape_cast %221 : vector<1x32xf32> to vector<32xf32>
    %223 = vector.shape_cast %222 : vector<32xf32> to vector<1x32xf32>
    %224 = vector.broadcast %223 : vector<1x32xf32> to vector<8x32xf32>
    %225 = arith.addf %220, %224 : vector<8x32xf32>
    %cst_101 = arith.constant dense<0.000000e+00> : vector<32xf32>
    %226 = vector.multi_reduction <add>, %225, %cst_101 [0] : vector<8x32xf32> to vector<32xf32>
    %227 = vector.shape_cast %226 : vector<32xf32> to vector<1x32xf32>
    %cst_102 = arith.constant 1.250000e-01 : f32
    %228 = vector.broadcast %cst_102 : f32 to vector<1x32xf32>
    %229 = arith.mulf %227, %228 : vector<1x32xf32>
    %c0_103 = arith.constant 0 : index
    %c0_104 = arith.constant 0 : index
    %230 = vector.load %arg12[%c0_103, %c0_104] : memref<4x32xf32, #tpu.memory_space<vmem>>, vector<1x32xf32>
    %231 = vector.shape_cast %230 : vector<1x32xf32> to vector<32xf32>
    %232 = vector.shape_cast %231 : vector<32xf32> to vector<1x32xf32>
    %233 = arith.mulf %229, %232 : vector<1x32xf32>
    %234 = vector.broadcast %233 : vector<1x32xf32> to vector<8x32xf32>
    %235 = arith.subf %225, %234 : vector<8x32xf32>
    %236 = arith.mulf %235, %235 : vector<8x32xf32>
    %cst_105 = arith.constant dense<0.000000e+00> : vector<32xf32>
    %237 = vector.multi_reduction <add>, %236, %cst_105 [0] : vector<8x32xf32> to vector<32xf32>
    %238 = vector.shape_cast %237 : vector<32xf32> to vector<1x32xf32>
    %cst_106 = arith.constant 1.250000e-01 : f32
    %239 = vector.broadcast %cst_106 : f32 to vector<1x32xf32>
    %240 = arith.mulf %238, %239 : vector<1x32xf32>
    %c0_107 = arith.constant 0 : index
    %c0_108 = arith.constant 0 : index
    %241 = vector.load %arg10[%c0_107, %c0_108] : memref<4x32xf32, #tpu.memory_space<vmem>>, vector<1x32xf32>
    %242 = vector.shape_cast %241 : vector<1x32xf32> to vector<32xf32>
    %243 = vector.shape_cast %242 : vector<32xf32> to vector<1x32xf32>
    %244 = vector.broadcast %243 : vector<1x32xf32> to vector<8x32xf32>
    %245 = arith.mulf %244, %235 : vector<8x32xf32>
    %cst_109 = arith.constant 9.99999974E-6 : f32
    %246 = vector.broadcast %cst_109 : f32 to vector<1x32xf32>
    %247 = arith.addf %240, %246 : vector<1x32xf32>
    %248 = math.rsqrt %247 : vector<1x32xf32>
    %249 = vector.broadcast %248 : vector<1x32xf32> to vector<8x32xf32>
    %250 = arith.mulf %245, %249 : vector<8x32xf32>
    %c0_110 = arith.constant 0 : index
    %c0_111 = arith.constant 0 : index
    %251 = vector.load %arg11[%c0_110, %c0_111] : memref<4x32xf32, #tpu.memory_space<vmem>>, vector<1x32xf32>
    %252 = vector.shape_cast %251 : vector<1x32xf32> to vector<32xf32>
    %253 = vector.shape_cast %252 : vector<32xf32> to vector<1x32xf32>
    %254 = vector.broadcast %253 : vector<1x32xf32> to vector<8x32xf32>
    %255 = arith.addf %250, %254 : vector<8x32xf32>
    %cst_112 = arith.constant 0.000000e+00 : f32
    %256 = vector.broadcast %cst_112 : f32 to vector<8x32xf32>
    %257 = arith.cmpf oge, %255, %256 : vector<8x32xf32>
    %c0_113 = arith.constant 0 : index
    %258 = memref.load %arg13[%c0_113] : memref<4xf32, #tpu.memory_space<smem>>
    %259 = vector.broadcast %258 : f32 to vector<8x32xf32>
    %260 = arith.mulf %259, %255 : vector<8x32xf32>
    %261 = arith.select %257, %255, %260 : vector<8x32xi1>, vector<8x32xf32>
    %c0_114 = arith.constant 0 : index
    %c0_115 = arith.constant 0 : index
    %c0_116 = arith.constant 0 : index
    %262 = vector.load %arg6[%c0_114, %c0_115, %c0_116] : memref<3x32x32xf32, #tpu.memory_space<vmem>>, vector<1x32x32xf32>
    %263 = vector.shape_cast %262 : vector<1x32x32xf32> to vector<32x32xf32>
    %cst_117 = arith.constant dense<0.000000e+00> : vector<8x32xf32>
    %264 = tpu.matmul %261, %263, %cst_117 {dimension_numbers = #tpu.dot_dimension_numbers<[1], [0], [0], [1], [0, 0, 1, 1], [], []>} : vector<8x32xf32>, vector<32x32xf32>, vector<8x32xf32> -> vector<8x32xf32>
    %265 = vector.extract_strided_slice %264 {offsets = [0, 0], sizes = [8, 8], strides = [1, 1]} : vector<8x32xf32> to vector<8x8xf32>
    %c1_118 = arith.constant 1 : index
    %c0_119 = arith.constant 0 : index
    %c0_120 = arith.constant 0 : index
    %266 = vector.load %arg8[%c1_118, %c0_119, %c0_120] : memref<4x4x8xf32, #tpu.memory_space<vmem>>, vector<1x1x8xf32>
    %267 = vector.shape_cast %266 : vector<1x1x8xf32> to vector<8xf32>
    %268 = vector.shape_cast %267 : vector<8xf32> to vector<1x8xf32>
    %269 = vector.broadcast %268 : vector<1x8xf32> to vector<8x8xf32>
    %270 = arith.mulf %265, %269 : vector<8x8xf32>
    %cst_121 = arith.constant dense<0.000000e+00> : vector<8xf32>
    %271 = vector.multi_reduction <add>, %270, %cst_121 [1] : vector<8x8xf32> to vector<8xf32>
    %272 = vector.shape_cast %271 : vector<8xf32> to vector<8x1xf32>
    %c1_122 = arith.constant 1 : index
    %c0_123 = arith.constant 0 : index
    %c0_124 = arith.constant 0 : index
    %273 = vector.load %arg7[%c1_122, %c0_123, %c0_124] : memref<4x4x8xf32, #tpu.memory_space<vmem>>, vector<1x1x8xf32>
    %274 = vector.shape_cast %273 : vector<1x1x8xf32> to vector<8xf32>
    %275 = vector.shape_cast %274 : vector<8xf32> to vector<1x8xf32>
    %276 = vector.broadcast %275 : vector<1x8xf32> to vector<8x8xf32>
    %277 = arith.mulf %265, %276 : vector<8x8xf32>
    %cst_125 = arith.constant dense<0.000000e+00> : vector<8xf32>
    %278 = vector.multi_reduction <add>, %277, %cst_125 [1] : vector<8x8xf32> to vector<8xf32>
    %279 = vector.shape_cast %278 : vector<8xf32> to vector<8x1xf32>
    %280 = vector.broadcast %279 : vector<8x1xf32> to vector<8x8xf32>
    %281 = arith.mulf %280, %53 : vector<8x8xf32>
    %cst_126 = arith.constant dense<0.000000e+00> : vector<8xf32>
    %282 = vector.multi_reduction <add>, %281, %cst_126 [0] : vector<8x8xf32> to vector<8xf32>
    %283 = vector.shape_cast %282 : vector<8xf32> to vector<1x8xf32>
    %284 = vector.broadcast %272 : vector<8x1xf32> to vector<8x8xf32>
    %285 = vector.broadcast %283 : vector<1x8xf32> to vector<8x8xf32>
    %286 = arith.addf %284, %285 : vector<8x8xf32>
    %cst_127 = arith.constant 0.000000e+00 : f32
    %287 = vector.broadcast %cst_127 : f32 to vector<8x8xf32>
    %288 = arith.cmpf oge, %286, %287 : vector<8x8xf32>
    %cst_128 = arith.constant 2.000000e-01 : f32
    %289 = vector.broadcast %cst_128 : f32 to vector<8x8xf32>
    %290 = arith.mulf %289, %286 : vector<8x8xf32>
    %291 = arith.select %288, %286, %290 : vector<8x8xi1>, vector<8x8xf32>
    %cst_129 = arith.constant 0.000000e+00 : f32
    %292 = vector.broadcast %cst_129 : f32 to vector<8x8xf32>
    %293 = arith.cmpf ogt, %52, %292 : vector<8x8xf32>
    %cst_130 = arith.constant -1.000000e+30 : f32
    %294 = vector.broadcast %cst_130 : f32 to vector<8x8xf32>
    %295 = arith.select %293, %291, %294 : vector<8x8xi1>, vector<8x8xf32>
    %cst_131 = arith.constant dense<0xFF800000> : vector<8xf32>
    %296 = vector.multi_reduction <maximumf>, %295, %cst_131 [1] : vector<8x8xf32> to vector<8xf32>
    %297 = vector.shape_cast %296 : vector<8xf32> to vector<8x1xf32>
    %298 = vector.broadcast %297 : vector<8x1xf32> to vector<8x8xf32>
    %299 = arith.subf %295, %298 : vector<8x8xf32>
    %300 = math.exp %299 : vector<8x8xf32>
    %cst_132 = arith.constant dense<0.000000e+00> : vector<8xf32>
    %301 = vector.multi_reduction <add>, %300, %cst_132 [1] : vector<8x8xf32> to vector<8xf32>
    %302 = vector.shape_cast %301 : vector<8xf32> to vector<8x1xf32>
    %303 = vector.broadcast %302 : vector<8x1xf32> to vector<8x8xf32>
    %304 = arith.divf %300, %303 : vector<8x8xf32>
    %cst_133 = arith.constant dense<0.000000e+00> : vector<8x8xf32>
    %305 = tpu.matmul %304, %265, %cst_133 {dimension_numbers = #tpu.dot_dimension_numbers<[1], [0], [0], [1], [0, 0, 1, 1], [], []>} : vector<8x8xf32>, vector<8x8xf32>, vector<8x8xf32> -> vector<8x8xf32>
    %306 = vector.extract_strided_slice %264 {offsets = [0, 8], sizes = [8, 8], strides = [1, 1]} : vector<8x32xf32> to vector<8x8xf32>
    %c1_134 = arith.constant 1 : index
    %c1_135 = arith.constant 1 : index
    %c0_136 = arith.constant 0 : index
    %307 = vector.load %arg8[%c1_134, %c1_135, %c0_136] : memref<4x4x8xf32, #tpu.memory_space<vmem>>, vector<1x1x8xf32>
    %308 = vector.shape_cast %307 : vector<1x1x8xf32> to vector<8xf32>
    %309 = vector.shape_cast %308 : vector<8xf32> to vector<1x8xf32>
    %310 = vector.broadcast %309 : vector<1x8xf32> to vector<8x8xf32>
    %311 = arith.mulf %306, %310 : vector<8x8xf32>
    %cst_137 = arith.constant dense<0.000000e+00> : vector<8xf32>
    %312 = vector.multi_reduction <add>, %311, %cst_137 [1] : vector<8x8xf32> to vector<8xf32>
    %313 = vector.shape_cast %312 : vector<8xf32> to vector<8x1xf32>
    %c1_138 = arith.constant 1 : index
    %c1_139 = arith.constant 1 : index
    %c0_140 = arith.constant 0 : index
    %314 = vector.load %arg7[%c1_138, %c1_139, %c0_140] : memref<4x4x8xf32, #tpu.memory_space<vmem>>, vector<1x1x8xf32>
    %315 = vector.shape_cast %314 : vector<1x1x8xf32> to vector<8xf32>
    %316 = vector.shape_cast %315 : vector<8xf32> to vector<1x8xf32>
    %317 = vector.broadcast %316 : vector<1x8xf32> to vector<8x8xf32>
    %318 = arith.mulf %306, %317 : vector<8x8xf32>
    %cst_141 = arith.constant dense<0.000000e+00> : vector<8xf32>
    %319 = vector.multi_reduction <add>, %318, %cst_141 [1] : vector<8x8xf32> to vector<8xf32>
    %320 = vector.shape_cast %319 : vector<8xf32> to vector<8x1xf32>
    %321 = vector.broadcast %320 : vector<8x1xf32> to vector<8x8xf32>
    %322 = arith.mulf %321, %53 : vector<8x8xf32>
    %cst_142 = arith.constant dense<0.000000e+00> : vector<8xf32>
    %323 = vector.multi_reduction <add>, %322, %cst_142 [0] : vector<8x8xf32> to vector<8xf32>
    %324 = vector.shape_cast %323 : vector<8xf32> to vector<1x8xf32>
    %325 = vector.broadcast %313 : vector<8x1xf32> to vector<8x8xf32>
    %326 = vector.broadcast %324 : vector<1x8xf32> to vector<8x8xf32>
    %327 = arith.addf %325, %326 : vector<8x8xf32>
    %cst_143 = arith.constant 0.000000e+00 : f32
    %328 = vector.broadcast %cst_143 : f32 to vector<8x8xf32>
    %329 = arith.cmpf oge, %327, %328 : vector<8x8xf32>
    %cst_144 = arith.constant 2.000000e-01 : f32
    %330 = vector.broadcast %cst_144 : f32 to vector<8x8xf32>
    %331 = arith.mulf %330, %327 : vector<8x8xf32>
    %332 = arith.select %329, %327, %331 : vector<8x8xi1>, vector<8x8xf32>
    %cst_145 = arith.constant 0.000000e+00 : f32
    %333 = vector.broadcast %cst_145 : f32 to vector<8x8xf32>
    %334 = arith.cmpf ogt, %52, %333 : vector<8x8xf32>
    %cst_146 = arith.constant -1.000000e+30 : f32
    %335 = vector.broadcast %cst_146 : f32 to vector<8x8xf32>
    %336 = arith.select %334, %332, %335 : vector<8x8xi1>, vector<8x8xf32>
    %cst_147 = arith.constant dense<0xFF800000> : vector<8xf32>
    %337 = vector.multi_reduction <maximumf>, %336, %cst_147 [1] : vector<8x8xf32> to vector<8xf32>
    %338 = vector.shape_cast %337 : vector<8xf32> to vector<8x1xf32>
    %339 = vector.broadcast %338 : vector<8x1xf32> to vector<8x8xf32>
    %340 = arith.subf %336, %339 : vector<8x8xf32>
    %341 = math.exp %340 : vector<8x8xf32>
    %cst_148 = arith.constant dense<0.000000e+00> : vector<8xf32>
    %342 = vector.multi_reduction <add>, %341, %cst_148 [1] : vector<8x8xf32> to vector<8xf32>
    %343 = vector.shape_cast %342 : vector<8xf32> to vector<8x1xf32>
    %344 = vector.broadcast %343 : vector<8x1xf32> to vector<8x8xf32>
    %345 = arith.divf %341, %344 : vector<8x8xf32>
    %cst_149 = arith.constant dense<0.000000e+00> : vector<8x8xf32>
    %346 = tpu.matmul %345, %306, %cst_149 {dimension_numbers = #tpu.dot_dimension_numbers<[1], [0], [0], [1], [0, 0, 1, 1], [], []>} : vector<8x8xf32>, vector<8x8xf32>, vector<8x8xf32> -> vector<8x8xf32>
    %347 = vector.extract_strided_slice %264 {offsets = [0, 16], sizes = [8, 8], strides = [1, 1]} : vector<8x32xf32> to vector<8x8xf32>
    %c1_150 = arith.constant 1 : index
    %c2_151 = arith.constant 2 : index
    %c0_152 = arith.constant 0 : index
    %348 = vector.load %arg8[%c1_150, %c2_151, %c0_152] : memref<4x4x8xf32, #tpu.memory_space<vmem>>, vector<1x1x8xf32>
    %349 = vector.shape_cast %348 : vector<1x1x8xf32> to vector<8xf32>
    %350 = vector.shape_cast %349 : vector<8xf32> to vector<1x8xf32>
    %351 = vector.broadcast %350 : vector<1x8xf32> to vector<8x8xf32>
    %352 = arith.mulf %347, %351 : vector<8x8xf32>
    %cst_153 = arith.constant dense<0.000000e+00> : vector<8xf32>
    %353 = vector.multi_reduction <add>, %352, %cst_153 [1] : vector<8x8xf32> to vector<8xf32>
    %354 = vector.shape_cast %353 : vector<8xf32> to vector<8x1xf32>
    %c1_154 = arith.constant 1 : index
    %c2_155 = arith.constant 2 : index
    %c0_156 = arith.constant 0 : index
    %355 = vector.load %arg7[%c1_154, %c2_155, %c0_156] : memref<4x4x8xf32, #tpu.memory_space<vmem>>, vector<1x1x8xf32>
    %356 = vector.shape_cast %355 : vector<1x1x8xf32> to vector<8xf32>
    %357 = vector.shape_cast %356 : vector<8xf32> to vector<1x8xf32>
    %358 = vector.broadcast %357 : vector<1x8xf32> to vector<8x8xf32>
    %359 = arith.mulf %347, %358 : vector<8x8xf32>
    %cst_157 = arith.constant dense<0.000000e+00> : vector<8xf32>
    %360 = vector.multi_reduction <add>, %359, %cst_157 [1] : vector<8x8xf32> to vector<8xf32>
    %361 = vector.shape_cast %360 : vector<8xf32> to vector<8x1xf32>
    %362 = vector.broadcast %361 : vector<8x1xf32> to vector<8x8xf32>
    %363 = arith.mulf %362, %53 : vector<8x8xf32>
    %cst_158 = arith.constant dense<0.000000e+00> : vector<8xf32>
    %364 = vector.multi_reduction <add>, %363, %cst_158 [0] : vector<8x8xf32> to vector<8xf32>
    %365 = vector.shape_cast %364 : vector<8xf32> to vector<1x8xf32>
    %366 = vector.broadcast %354 : vector<8x1xf32> to vector<8x8xf32>
    %367 = vector.broadcast %365 : vector<1x8xf32> to vector<8x8xf32>
    %368 = arith.addf %366, %367 : vector<8x8xf32>
    %cst_159 = arith.constant 0.000000e+00 : f32
    %369 = vector.broadcast %cst_159 : f32 to vector<8x8xf32>
    %370 = arith.cmpf oge, %368, %369 : vector<8x8xf32>
    %cst_160 = arith.constant 2.000000e-01 : f32
    %371 = vector.broadcast %cst_160 : f32 to vector<8x8xf32>
    %372 = arith.mulf %371, %368 : vector<8x8xf32>
    %373 = arith.select %370, %368, %372 : vector<8x8xi1>, vector<8x8xf32>
    %cst_161 = arith.constant 0.000000e+00 : f32
    %374 = vector.broadcast %cst_161 : f32 to vector<8x8xf32>
    %375 = arith.cmpf ogt, %52, %374 : vector<8x8xf32>
    %cst_162 = arith.constant -1.000000e+30 : f32
    %376 = vector.broadcast %cst_162 : f32 to vector<8x8xf32>
    %377 = arith.select %375, %373, %376 : vector<8x8xi1>, vector<8x8xf32>
    %cst_163 = arith.constant dense<0xFF800000> : vector<8xf32>
    %378 = vector.multi_reduction <maximumf>, %377, %cst_163 [1] : vector<8x8xf32> to vector<8xf32>
    %379 = vector.shape_cast %378 : vector<8xf32> to vector<8x1xf32>
    %380 = vector.broadcast %379 : vector<8x1xf32> to vector<8x8xf32>
    %381 = arith.subf %377, %380 : vector<8x8xf32>
    %382 = math.exp %381 : vector<8x8xf32>
    %cst_164 = arith.constant dense<0.000000e+00> : vector<8xf32>
    %383 = vector.multi_reduction <add>, %382, %cst_164 [1] : vector<8x8xf32> to vector<8xf32>
    %384 = vector.shape_cast %383 : vector<8xf32> to vector<8x1xf32>
    %385 = vector.broadcast %384 : vector<8x1xf32> to vector<8x8xf32>
    %386 = arith.divf %382, %385 : vector<8x8xf32>
    %cst_165 = arith.constant dense<0.000000e+00> : vector<8x8xf32>
    %387 = tpu.matmul %386, %347, %cst_165 {dimension_numbers = #tpu.dot_dimension_numbers<[1], [0], [0], [1], [0, 0, 1, 1], [], []>} : vector<8x8xf32>, vector<8x8xf32>, vector<8x8xf32> -> vector<8x8xf32>
    %388 = vector.extract_strided_slice %264 {offsets = [0, 24], sizes = [8, 8], strides = [1, 1]} : vector<8x32xf32> to vector<8x8xf32>
    %c1_166 = arith.constant 1 : index
    %c3_167 = arith.constant 3 : index
    %c0_168 = arith.constant 0 : index
    %389 = vector.load %arg8[%c1_166, %c3_167, %c0_168] : memref<4x4x8xf32, #tpu.memory_space<vmem>>, vector<1x1x8xf32>
    %390 = vector.shape_cast %389 : vector<1x1x8xf32> to vector<8xf32>
    %391 = vector.shape_cast %390 : vector<8xf32> to vector<1x8xf32>
    %392 = vector.broadcast %391 : vector<1x8xf32> to vector<8x8xf32>
    %393 = arith.mulf %388, %392 : vector<8x8xf32>
    %cst_169 = arith.constant dense<0.000000e+00> : vector<8xf32>
    %394 = vector.multi_reduction <add>, %393, %cst_169 [1] : vector<8x8xf32> to vector<8xf32>
    %395 = vector.shape_cast %394 : vector<8xf32> to vector<8x1xf32>
    %c1_170 = arith.constant 1 : index
    %c3_171 = arith.constant 3 : index
    %c0_172 = arith.constant 0 : index
    %396 = vector.load %arg7[%c1_170, %c3_171, %c0_172] : memref<4x4x8xf32, #tpu.memory_space<vmem>>, vector<1x1x8xf32>
    %397 = vector.shape_cast %396 : vector<1x1x8xf32> to vector<8xf32>
    %398 = vector.shape_cast %397 : vector<8xf32> to vector<1x8xf32>
    %399 = vector.broadcast %398 : vector<1x8xf32> to vector<8x8xf32>
    %400 = arith.mulf %388, %399 : vector<8x8xf32>
    %cst_173 = arith.constant dense<0.000000e+00> : vector<8xf32>
    %401 = vector.multi_reduction <add>, %400, %cst_173 [1] : vector<8x8xf32> to vector<8xf32>
    %402 = vector.shape_cast %401 : vector<8xf32> to vector<8x1xf32>
    %403 = vector.broadcast %402 : vector<8x1xf32> to vector<8x8xf32>
    %404 = arith.mulf %403, %53 : vector<8x8xf32>
    %cst_174 = arith.constant dense<0.000000e+00> : vector<8xf32>
    %405 = vector.multi_reduction <add>, %404, %cst_174 [0] : vector<8x8xf32> to vector<8xf32>
    %406 = vector.shape_cast %405 : vector<8xf32> to vector<1x8xf32>
    %407 = vector.broadcast %395 : vector<8x1xf32> to vector<8x8xf32>
    %408 = vector.broadcast %406 : vector<1x8xf32> to vector<8x8xf32>
    %409 = arith.addf %407, %408 : vector<8x8xf32>
    %cst_175 = arith.constant 0.000000e+00 : f32
    %410 = vector.broadcast %cst_175 : f32 to vector<8x8xf32>
    %411 = arith.cmpf oge, %409, %410 : vector<8x8xf32>
    %cst_176 = arith.constant 2.000000e-01 : f32
    %412 = vector.broadcast %cst_176 : f32 to vector<8x8xf32>
    %413 = arith.mulf %412, %409 : vector<8x8xf32>
    %414 = arith.select %411, %409, %413 : vector<8x8xi1>, vector<8x8xf32>
    %cst_177 = arith.constant 0.000000e+00 : f32
    %415 = vector.broadcast %cst_177 : f32 to vector<8x8xf32>
    %416 = arith.cmpf ogt, %52, %415 : vector<8x8xf32>
    %cst_178 = arith.constant -1.000000e+30 : f32
    %417 = vector.broadcast %cst_178 : f32 to vector<8x8xf32>
    %418 = arith.select %416, %414, %417 : vector<8x8xi1>, vector<8x8xf32>
    %cst_179 = arith.constant dense<0xFF800000> : vector<8xf32>
    %419 = vector.multi_reduction <maximumf>, %418, %cst_179 [1] : vector<8x8xf32> to vector<8xf32>
    %420 = vector.shape_cast %419 : vector<8xf32> to vector<8x1xf32>
    %421 = vector.broadcast %420 : vector<8x1xf32> to vector<8x8xf32>
    %422 = arith.subf %418, %421 : vector<8x8xf32>
    %423 = math.exp %422 : vector<8x8xf32>
    %cst_180 = arith.constant dense<0.000000e+00> : vector<8xf32>
    %424 = vector.multi_reduction <add>, %423, %cst_180 [1] : vector<8x8xf32> to vector<8xf32>
    %425 = vector.shape_cast %424 : vector<8xf32> to vector<8x1xf32>
    %426 = vector.broadcast %425 : vector<8x1xf32> to vector<8x8xf32>
    %427 = arith.divf %423, %426 : vector<8x8xf32>
    %cst_181 = arith.constant dense<0.000000e+00> : vector<8x8xf32>
    %428 = tpu.matmul %427, %388, %cst_181 {dimension_numbers = #tpu.dot_dimension_numbers<[1], [0], [0], [1], [0, 0, 1, 1], [], []>} : vector<8x8xf32>, vector<8x8xf32>, vector<8x8xf32> -> vector<8x8xf32>
    %429 = tpu.concatenate %305, %346, %387, %428 in 1 : vector<8x8xf32>, vector<8x8xf32>, vector<8x8xf32>, vector<8x8xf32> -> vector<8x32xf32>
    %c1_182 = arith.constant 1 : index
    %c0_183 = arith.constant 0 : index
    %430 = vector.load %arg9[%c1_182, %c0_183] : memref<4x32xf32, #tpu.memory_space<vmem>>, vector<1x32xf32>
    %431 = vector.shape_cast %430 : vector<1x32xf32> to vector<32xf32>
    %432 = vector.shape_cast %431 : vector<32xf32> to vector<1x32xf32>
    %433 = vector.broadcast %432 : vector<1x32xf32> to vector<8x32xf32>
    %434 = arith.addf %429, %433 : vector<8x32xf32>
    %cst_184 = arith.constant dense<0.000000e+00> : vector<32xf32>
    %435 = vector.multi_reduction <add>, %434, %cst_184 [0] : vector<8x32xf32> to vector<32xf32>
    %436 = vector.shape_cast %435 : vector<32xf32> to vector<1x32xf32>
    %cst_185 = arith.constant 1.250000e-01 : f32
    %437 = vector.broadcast %cst_185 : f32 to vector<1x32xf32>
    %438 = arith.mulf %436, %437 : vector<1x32xf32>
    %c1_186 = arith.constant 1 : index
    %c0_187 = arith.constant 0 : index
    %439 = vector.load %arg12[%c1_186, %c0_187] : memref<4x32xf32, #tpu.memory_space<vmem>>, vector<1x32xf32>
    %440 = vector.shape_cast %439 : vector<1x32xf32> to vector<32xf32>
    %441 = vector.shape_cast %440 : vector<32xf32> to vector<1x32xf32>
    %442 = arith.mulf %438, %441 : vector<1x32xf32>
    %443 = vector.broadcast %442 : vector<1x32xf32> to vector<8x32xf32>
    %444 = arith.subf %434, %443 : vector<8x32xf32>
    %445 = arith.mulf %444, %444 : vector<8x32xf32>
    %cst_188 = arith.constant dense<0.000000e+00> : vector<32xf32>
    %446 = vector.multi_reduction <add>, %445, %cst_188 [0] : vector<8x32xf32> to vector<32xf32>
    %447 = vector.shape_cast %446 : vector<32xf32> to vector<1x32xf32>
    %cst_189 = arith.constant 1.250000e-01 : f32
    %448 = vector.broadcast %cst_189 : f32 to vector<1x32xf32>
    %449 = arith.mulf %447, %448 : vector<1x32xf32>
    %c1_190 = arith.constant 1 : index
    %c0_191 = arith.constant 0 : index
    %450 = vector.load %arg10[%c1_190, %c0_191] : memref<4x32xf32, #tpu.memory_space<vmem>>, vector<1x32xf32>
    %451 = vector.shape_cast %450 : vector<1x32xf32> to vector<32xf32>
    %452 = vector.shape_cast %451 : vector<32xf32> to vector<1x32xf32>
    %453 = vector.broadcast %452 : vector<1x32xf32> to vector<8x32xf32>
    %454 = arith.mulf %453, %444 : vector<8x32xf32>
    %cst_192 = arith.constant 9.99999974E-6 : f32
    %455 = vector.broadcast %cst_192 : f32 to vector<1x32xf32>
    %456 = arith.addf %449, %455 : vector<1x32xf32>
    %457 = math.rsqrt %456 : vector<1x32xf32>
    %458 = vector.broadcast %457 : vector<1x32xf32> to vector<8x32xf32>
    %459 = arith.mulf %454, %458 : vector<8x32xf32>
    %c1_193 = arith.constant 1 : index
    %c0_194 = arith.constant 0 : index
    %460 = vector.load %arg11[%c1_193, %c0_194] : memref<4x32xf32, #tpu.memory_space<vmem>>, vector<1x32xf32>
    %461 = vector.shape_cast %460 : vector<1x32xf32> to vector<32xf32>
    %462 = vector.shape_cast %461 : vector<32xf32> to vector<1x32xf32>
    %463 = vector.broadcast %462 : vector<1x32xf32> to vector<8x32xf32>
    %464 = arith.addf %459, %463 : vector<8x32xf32>
    %cst_195 = arith.constant 0.000000e+00 : f32
    %465 = vector.broadcast %cst_195 : f32 to vector<8x32xf32>
    %466 = arith.cmpf oge, %464, %465 : vector<8x32xf32>
    %c1_196 = arith.constant 1 : index
    %467 = memref.load %arg13[%c1_196] : memref<4xf32, #tpu.memory_space<smem>>
    %468 = vector.broadcast %467 : f32 to vector<8x32xf32>
    %469 = arith.mulf %468, %464 : vector<8x32xf32>
    %470 = arith.select %466, %464, %469 : vector<8x32xi1>, vector<8x32xf32>
    %c1_197 = arith.constant 1 : index
    %c0_198 = arith.constant 0 : index
    %c0_199 = arith.constant 0 : index
    %471 = vector.load %arg6[%c1_197, %c0_198, %c0_199] : memref<3x32x32xf32, #tpu.memory_space<vmem>>, vector<1x32x32xf32>
    %472 = vector.shape_cast %471 : vector<1x32x32xf32> to vector<32x32xf32>
    %cst_200 = arith.constant dense<0.000000e+00> : vector<8x32xf32>
    %473 = tpu.matmul %470, %472, %cst_200 {dimension_numbers = #tpu.dot_dimension_numbers<[1], [0], [0], [1], [0, 0, 1, 1], [], []>} : vector<8x32xf32>, vector<32x32xf32>, vector<8x32xf32> -> vector<8x32xf32>
    %474 = vector.extract_strided_slice %473 {offsets = [0, 0], sizes = [8, 8], strides = [1, 1]} : vector<8x32xf32> to vector<8x8xf32>
    %c2_201 = arith.constant 2 : index
    %c0_202 = arith.constant 0 : index
    %c0_203 = arith.constant 0 : index
    %475 = vector.load %arg8[%c2_201, %c0_202, %c0_203] : memref<4x4x8xf32, #tpu.memory_space<vmem>>, vector<1x1x8xf32>
    %476 = vector.shape_cast %475 : vector<1x1x8xf32> to vector<8xf32>
    %477 = vector.shape_cast %476 : vector<8xf32> to vector<1x8xf32>
    %478 = vector.broadcast %477 : vector<1x8xf32> to vector<8x8xf32>
    %479 = arith.mulf %474, %478 : vector<8x8xf32>
    %cst_204 = arith.constant dense<0.000000e+00> : vector<8xf32>
    %480 = vector.multi_reduction <add>, %479, %cst_204 [1] : vector<8x8xf32> to vector<8xf32>
    %481 = vector.shape_cast %480 : vector<8xf32> to vector<8x1xf32>
    %c2_205 = arith.constant 2 : index
    %c0_206 = arith.constant 0 : index
    %c0_207 = arith.constant 0 : index
    %482 = vector.load %arg7[%c2_205, %c0_206, %c0_207] : memref<4x4x8xf32, #tpu.memory_space<vmem>>, vector<1x1x8xf32>
    %483 = vector.shape_cast %482 : vector<1x1x8xf32> to vector<8xf32>
    %484 = vector.shape_cast %483 : vector<8xf32> to vector<1x8xf32>
    %485 = vector.broadcast %484 : vector<1x8xf32> to vector<8x8xf32>
    %486 = arith.mulf %474, %485 : vector<8x8xf32>
    %cst_208 = arith.constant dense<0.000000e+00> : vector<8xf32>
    %487 = vector.multi_reduction <add>, %486, %cst_208 [1] : vector<8x8xf32> to vector<8xf32>
    %488 = vector.shape_cast %487 : vector<8xf32> to vector<8x1xf32>
    %489 = vector.broadcast %488 : vector<8x1xf32> to vector<8x8xf32>
    %490 = arith.mulf %489, %53 : vector<8x8xf32>
    %cst_209 = arith.constant dense<0.000000e+00> : vector<8xf32>
    %491 = vector.multi_reduction <add>, %490, %cst_209 [0] : vector<8x8xf32> to vector<8xf32>
    %492 = vector.shape_cast %491 : vector<8xf32> to vector<1x8xf32>
    %493 = vector.broadcast %481 : vector<8x1xf32> to vector<8x8xf32>
    %494 = vector.broadcast %492 : vector<1x8xf32> to vector<8x8xf32>
    %495 = arith.addf %493, %494 : vector<8x8xf32>
    %cst_210 = arith.constant 0.000000e+00 : f32
    %496 = vector.broadcast %cst_210 : f32 to vector<8x8xf32>
    %497 = arith.cmpf oge, %495, %496 : vector<8x8xf32>
    %cst_211 = arith.constant 2.000000e-01 : f32
    %498 = vector.broadcast %cst_211 : f32 to vector<8x8xf32>
    %499 = arith.mulf %498, %495 : vector<8x8xf32>
    %500 = arith.select %497, %495, %499 : vector<8x8xi1>, vector<8x8xf32>
    %cst_212 = arith.constant 0.000000e+00 : f32
    %501 = vector.broadcast %cst_212 : f32 to vector<8x8xf32>
    %502 = arith.cmpf ogt, %52, %501 : vector<8x8xf32>
    %cst_213 = arith.constant -1.000000e+30 : f32
    %503 = vector.broadcast %cst_213 : f32 to vector<8x8xf32>
    %504 = arith.select %502, %500, %503 : vector<8x8xi1>, vector<8x8xf32>
    %cst_214 = arith.constant dense<0xFF800000> : vector<8xf32>
    %505 = vector.multi_reduction <maximumf>, %504, %cst_214 [1] : vector<8x8xf32> to vector<8xf32>
    %506 = vector.shape_cast %505 : vector<8xf32> to vector<8x1xf32>
    %507 = vector.broadcast %506 : vector<8x1xf32> to vector<8x8xf32>
    %508 = arith.subf %504, %507 : vector<8x8xf32>
    %509 = math.exp %508 : vector<8x8xf32>
    %cst_215 = arith.constant dense<0.000000e+00> : vector<8xf32>
    %510 = vector.multi_reduction <add>, %509, %cst_215 [1] : vector<8x8xf32> to vector<8xf32>
    %511 = vector.shape_cast %510 : vector<8xf32> to vector<8x1xf32>
    %512 = vector.broadcast %511 : vector<8x1xf32> to vector<8x8xf32>
    %513 = arith.divf %509, %512 : vector<8x8xf32>
    %cst_216 = arith.constant dense<0.000000e+00> : vector<8x8xf32>
    %514 = tpu.matmul %513, %474, %cst_216 {dimension_numbers = #tpu.dot_dimension_numbers<[1], [0], [0], [1], [0, 0, 1, 1], [], []>} : vector<8x8xf32>, vector<8x8xf32>, vector<8x8xf32> -> vector<8x8xf32>
    %515 = vector.extract_strided_slice %473 {offsets = [0, 8], sizes = [8, 8], strides = [1, 1]} : vector<8x32xf32> to vector<8x8xf32>
    %c2_217 = arith.constant 2 : index
    %c1_218 = arith.constant 1 : index
    %c0_219 = arith.constant 0 : index
    %516 = vector.load %arg8[%c2_217, %c1_218, %c0_219] : memref<4x4x8xf32, #tpu.memory_space<vmem>>, vector<1x1x8xf32>
    %517 = vector.shape_cast %516 : vector<1x1x8xf32> to vector<8xf32>
    %518 = vector.shape_cast %517 : vector<8xf32> to vector<1x8xf32>
    %519 = vector.broadcast %518 : vector<1x8xf32> to vector<8x8xf32>
    %520 = arith.mulf %515, %519 : vector<8x8xf32>
    %cst_220 = arith.constant dense<0.000000e+00> : vector<8xf32>
    %521 = vector.multi_reduction <add>, %520, %cst_220 [1] : vector<8x8xf32> to vector<8xf32>
    %522 = vector.shape_cast %521 : vector<8xf32> to vector<8x1xf32>
    %c2_221 = arith.constant 2 : index
    %c1_222 = arith.constant 1 : index
    %c0_223 = arith.constant 0 : index
    %523 = vector.load %arg7[%c2_221, %c1_222, %c0_223] : memref<4x4x8xf32, #tpu.memory_space<vmem>>, vector<1x1x8xf32>
    %524 = vector.shape_cast %523 : vector<1x1x8xf32> to vector<8xf32>
    %525 = vector.shape_cast %524 : vector<8xf32> to vector<1x8xf32>
    %526 = vector.broadcast %525 : vector<1x8xf32> to vector<8x8xf32>
    %527 = arith.mulf %515, %526 : vector<8x8xf32>
    %cst_224 = arith.constant dense<0.000000e+00> : vector<8xf32>
    %528 = vector.multi_reduction <add>, %527, %cst_224 [1] : vector<8x8xf32> to vector<8xf32>
    %529 = vector.shape_cast %528 : vector<8xf32> to vector<8x1xf32>
    %530 = vector.broadcast %529 : vector<8x1xf32> to vector<8x8xf32>
    %531 = arith.mulf %530, %53 : vector<8x8xf32>
    %cst_225 = arith.constant dense<0.000000e+00> : vector<8xf32>
    %532 = vector.multi_reduction <add>, %531, %cst_225 [0] : vector<8x8xf32> to vector<8xf32>
    %533 = vector.shape_cast %532 : vector<8xf32> to vector<1x8xf32>
    %534 = vector.broadcast %522 : vector<8x1xf32> to vector<8x8xf32>
    %535 = vector.broadcast %533 : vector<1x8xf32> to vector<8x8xf32>
    %536 = arith.addf %534, %535 : vector<8x8xf32>
    %cst_226 = arith.constant 0.000000e+00 : f32
    %537 = vector.broadcast %cst_226 : f32 to vector<8x8xf32>
    %538 = arith.cmpf oge, %536, %537 : vector<8x8xf32>
    %cst_227 = arith.constant 2.000000e-01 : f32
    %539 = vector.broadcast %cst_227 : f32 to vector<8x8xf32>
    %540 = arith.mulf %539, %536 : vector<8x8xf32>
    %541 = arith.select %538, %536, %540 : vector<8x8xi1>, vector<8x8xf32>
    %cst_228 = arith.constant 0.000000e+00 : f32
    %542 = vector.broadcast %cst_228 : f32 to vector<8x8xf32>
    %543 = arith.cmpf ogt, %52, %542 : vector<8x8xf32>
    %cst_229 = arith.constant -1.000000e+30 : f32
    %544 = vector.broadcast %cst_229 : f32 to vector<8x8xf32>
    %545 = arith.select %543, %541, %544 : vector<8x8xi1>, vector<8x8xf32>
    %cst_230 = arith.constant dense<0xFF800000> : vector<8xf32>
    %546 = vector.multi_reduction <maximumf>, %545, %cst_230 [1] : vector<8x8xf32> to vector<8xf32>
    %547 = vector.shape_cast %546 : vector<8xf32> to vector<8x1xf32>
    %548 = vector.broadcast %547 : vector<8x1xf32> to vector<8x8xf32>
    %549 = arith.subf %545, %548 : vector<8x8xf32>
    %550 = math.exp %549 : vector<8x8xf32>
    %cst_231 = arith.constant dense<0.000000e+00> : vector<8xf32>
    %551 = vector.multi_reduction <add>, %550, %cst_231 [1] : vector<8x8xf32> to vector<8xf32>
    %552 = vector.shape_cast %551 : vector<8xf32> to vector<8x1xf32>
    %553 = vector.broadcast %552 : vector<8x1xf32> to vector<8x8xf32>
    %554 = arith.divf %550, %553 : vector<8x8xf32>
    %cst_232 = arith.constant dense<0.000000e+00> : vector<8x8xf32>
    %555 = tpu.matmul %554, %515, %cst_232 {dimension_numbers = #tpu.dot_dimension_numbers<[1], [0], [0], [1], [0, 0, 1, 1], [], []>} : vector<8x8xf32>, vector<8x8xf32>, vector<8x8xf32> -> vector<8x8xf32>
    %556 = vector.extract_strided_slice %473 {offsets = [0, 16], sizes = [8, 8], strides = [1, 1]} : vector<8x32xf32> to vector<8x8xf32>
    %c2_233 = arith.constant 2 : index
    %c2_234 = arith.constant 2 : index
    %c0_235 = arith.constant 0 : index
    %557 = vector.load %arg8[%c2_233, %c2_234, %c0_235] : memref<4x4x8xf32, #tpu.memory_space<vmem>>, vector<1x1x8xf32>
    %558 = vector.shape_cast %557 : vector<1x1x8xf32> to vector<8xf32>
    %559 = vector.shape_cast %558 : vector<8xf32> to vector<1x8xf32>
    %560 = vector.broadcast %559 : vector<1x8xf32> to vector<8x8xf32>
    %561 = arith.mulf %556, %560 : vector<8x8xf32>
    %cst_236 = arith.constant dense<0.000000e+00> : vector<8xf32>
    %562 = vector.multi_reduction <add>, %561, %cst_236 [1] : vector<8x8xf32> to vector<8xf32>
    %563 = vector.shape_cast %562 : vector<8xf32> to vector<8x1xf32>
    %c2_237 = arith.constant 2 : index
    %c2_238 = arith.constant 2 : index
    %c0_239 = arith.constant 0 : index
    %564 = vector.load %arg7[%c2_237, %c2_238, %c0_239] : memref<4x4x8xf32, #tpu.memory_space<vmem>>, vector<1x1x8xf32>
    %565 = vector.shape_cast %564 : vector<1x1x8xf32> to vector<8xf32>
    %566 = vector.shape_cast %565 : vector<8xf32> to vector<1x8xf32>
    %567 = vector.broadcast %566 : vector<1x8xf32> to vector<8x8xf32>
    %568 = arith.mulf %556, %567 : vector<8x8xf32>
    %cst_240 = arith.constant dense<0.000000e+00> : vector<8xf32>
    %569 = vector.multi_reduction <add>, %568, %cst_240 [1] : vector<8x8xf32> to vector<8xf32>
    %570 = vector.shape_cast %569 : vector<8xf32> to vector<8x1xf32>
    %571 = vector.broadcast %570 : vector<8x1xf32> to vector<8x8xf32>
    %572 = arith.mulf %571, %53 : vector<8x8xf32>
    %cst_241 = arith.constant dense<0.000000e+00> : vector<8xf32>
    %573 = vector.multi_reduction <add>, %572, %cst_241 [0] : vector<8x8xf32> to vector<8xf32>
    %574 = vector.shape_cast %573 : vector<8xf32> to vector<1x8xf32>
    %575 = vector.broadcast %563 : vector<8x1xf32> to vector<8x8xf32>
    %576 = vector.broadcast %574 : vector<1x8xf32> to vector<8x8xf32>
    %577 = arith.addf %575, %576 : vector<8x8xf32>
    %cst_242 = arith.constant 0.000000e+00 : f32
    %578 = vector.broadcast %cst_242 : f32 to vector<8x8xf32>
    %579 = arith.cmpf oge, %577, %578 : vector<8x8xf32>
    %cst_243 = arith.constant 2.000000e-01 : f32
    %580 = vector.broadcast %cst_243 : f32 to vector<8x8xf32>
    %581 = arith.mulf %580, %577 : vector<8x8xf32>
    %582 = arith.select %579, %577, %581 : vector<8x8xi1>, vector<8x8xf32>
    %cst_244 = arith.constant 0.000000e+00 : f32
    %583 = vector.broadcast %cst_244 : f32 to vector<8x8xf32>
    %584 = arith.cmpf ogt, %52, %583 : vector<8x8xf32>
    %cst_245 = arith.constant -1.000000e+30 : f32
    %585 = vector.broadcast %cst_245 : f32 to vector<8x8xf32>
    %586 = arith.select %584, %582, %585 : vector<8x8xi1>, vector<8x8xf32>
    %cst_246 = arith.constant dense<0xFF800000> : vector<8xf32>
    %587 = vector.multi_reduction <maximumf>, %586, %cst_246 [1] : vector<8x8xf32> to vector<8xf32>
    %588 = vector.shape_cast %587 : vector<8xf32> to vector<8x1xf32>
    %589 = vector.broadcast %588 : vector<8x1xf32> to vector<8x8xf32>
    %590 = arith.subf %586, %589 : vector<8x8xf32>
    %591 = math.exp %590 : vector<8x8xf32>
    %cst_247 = arith.constant dense<0.000000e+00> : vector<8xf32>
    %592 = vector.multi_reduction <add>, %591, %cst_247 [1] : vector<8x8xf32> to vector<8xf32>
    %593 = vector.shape_cast %592 : vector<8xf32> to vector<8x1xf32>
    %594 = vector.broadcast %593 : vector<8x1xf32> to vector<8x8xf32>
    %595 = arith.divf %591, %594 : vector<8x8xf32>
    %cst_248 = arith.constant dense<0.000000e+00> : vector<8x8xf32>
    %596 = tpu.matmul %595, %556, %cst_248 {dimension_numbers = #tpu.dot_dimension_numbers<[1], [0], [0], [1], [0, 0, 1, 1], [], []>} : vector<8x8xf32>, vector<8x8xf32>, vector<8x8xf32> -> vector<8x8xf32>
    %597 = vector.extract_strided_slice %473 {offsets = [0, 24], sizes = [8, 8], strides = [1, 1]} : vector<8x32xf32> to vector<8x8xf32>
    %c2_249 = arith.constant 2 : index
    %c3_250 = arith.constant 3 : index
    %c0_251 = arith.constant 0 : index
    %598 = vector.load %arg8[%c2_249, %c3_250, %c0_251] : memref<4x4x8xf32, #tpu.memory_space<vmem>>, vector<1x1x8xf32>
    %599 = vector.shape_cast %598 : vector<1x1x8xf32> to vector<8xf32>
    %600 = vector.shape_cast %599 : vector<8xf32> to vector<1x8xf32>
    %601 = vector.broadcast %600 : vector<1x8xf32> to vector<8x8xf32>
    %602 = arith.mulf %597, %601 : vector<8x8xf32>
    %cst_252 = arith.constant dense<0.000000e+00> : vector<8xf32>
    %603 = vector.multi_reduction <add>, %602, %cst_252 [1] : vector<8x8xf32> to vector<8xf32>
    %604 = vector.shape_cast %603 : vector<8xf32> to vector<8x1xf32>
    %c2_253 = arith.constant 2 : index
    %c3_254 = arith.constant 3 : index
    %c0_255 = arith.constant 0 : index
    %605 = vector.load %arg7[%c2_253, %c3_254, %c0_255] : memref<4x4x8xf32, #tpu.memory_space<vmem>>, vector<1x1x8xf32>
    %606 = vector.shape_cast %605 : vector<1x1x8xf32> to vector<8xf32>
    %607 = vector.shape_cast %606 : vector<8xf32> to vector<1x8xf32>
    %608 = vector.broadcast %607 : vector<1x8xf32> to vector<8x8xf32>
    %609 = arith.mulf %597, %608 : vector<8x8xf32>
    %cst_256 = arith.constant dense<0.000000e+00> : vector<8xf32>
    %610 = vector.multi_reduction <add>, %609, %cst_256 [1] : vector<8x8xf32> to vector<8xf32>
    %611 = vector.shape_cast %610 : vector<8xf32> to vector<8x1xf32>
    %612 = vector.broadcast %611 : vector<8x1xf32> to vector<8x8xf32>
    %613 = arith.mulf %612, %53 : vector<8x8xf32>
    %cst_257 = arith.constant dense<0.000000e+00> : vector<8xf32>
    %614 = vector.multi_reduction <add>, %613, %cst_257 [0] : vector<8x8xf32> to vector<8xf32>
    %615 = vector.shape_cast %614 : vector<8xf32> to vector<1x8xf32>
    %616 = vector.broadcast %604 : vector<8x1xf32> to vector<8x8xf32>
    %617 = vector.broadcast %615 : vector<1x8xf32> to vector<8x8xf32>
    %618 = arith.addf %616, %617 : vector<8x8xf32>
    %cst_258 = arith.constant 0.000000e+00 : f32
    %619 = vector.broadcast %cst_258 : f32 to vector<8x8xf32>
    %620 = arith.cmpf oge, %618, %619 : vector<8x8xf32>
    %cst_259 = arith.constant 2.000000e-01 : f32
    %621 = vector.broadcast %cst_259 : f32 to vector<8x8xf32>
    %622 = arith.mulf %621, %618 : vector<8x8xf32>
    %623 = arith.select %620, %618, %622 : vector<8x8xi1>, vector<8x8xf32>
    %cst_260 = arith.constant 0.000000e+00 : f32
    %624 = vector.broadcast %cst_260 : f32 to vector<8x8xf32>
    %625 = arith.cmpf ogt, %52, %624 : vector<8x8xf32>
    %cst_261 = arith.constant -1.000000e+30 : f32
    %626 = vector.broadcast %cst_261 : f32 to vector<8x8xf32>
    %627 = arith.select %625, %623, %626 : vector<8x8xi1>, vector<8x8xf32>
    %cst_262 = arith.constant dense<0xFF800000> : vector<8xf32>
    %628 = vector.multi_reduction <maximumf>, %627, %cst_262 [1] : vector<8x8xf32> to vector<8xf32>
    %629 = vector.shape_cast %628 : vector<8xf32> to vector<8x1xf32>
    %630 = vector.broadcast %629 : vector<8x1xf32> to vector<8x8xf32>
    %631 = arith.subf %627, %630 : vector<8x8xf32>
    %632 = math.exp %631 : vector<8x8xf32>
    %cst_263 = arith.constant dense<0.000000e+00> : vector<8xf32>
    %633 = vector.multi_reduction <add>, %632, %cst_263 [1] : vector<8x8xf32> to vector<8xf32>
    %634 = vector.shape_cast %633 : vector<8xf32> to vector<8x1xf32>
    %635 = vector.broadcast %634 : vector<8x1xf32> to vector<8x8xf32>
    %636 = arith.divf %632, %635 : vector<8x8xf32>
    %cst_264 = arith.constant dense<0.000000e+00> : vector<8x8xf32>
    %637 = tpu.matmul %636, %597, %cst_264 {dimension_numbers = #tpu.dot_dimension_numbers<[1], [0], [0], [1], [0, 0, 1, 1], [], []>} : vector<8x8xf32>, vector<8x8xf32>, vector<8x8xf32> -> vector<8x8xf32>
    %638 = tpu.concatenate %514, %555, %596, %637 in 1 : vector<8x8xf32>, vector<8x8xf32>, vector<8x8xf32>, vector<8x8xf32> -> vector<8x32xf32>
    %c2_265 = arith.constant 2 : index
    %c0_266 = arith.constant 0 : index
    %639 = vector.load %arg9[%c2_265, %c0_266] : memref<4x32xf32, #tpu.memory_space<vmem>>, vector<1x32xf32>
    %640 = vector.shape_cast %639 : vector<1x32xf32> to vector<32xf32>
    %641 = vector.shape_cast %640 : vector<32xf32> to vector<1x32xf32>
    %642 = vector.broadcast %641 : vector<1x32xf32> to vector<8x32xf32>
    %643 = arith.addf %638, %642 : vector<8x32xf32>
    %cst_267 = arith.constant dense<0.000000e+00> : vector<32xf32>
    %644 = vector.multi_reduction <add>, %643, %cst_267 [0] : vector<8x32xf32> to vector<32xf32>
    %645 = vector.shape_cast %644 : vector<32xf32> to vector<1x32xf32>
    %cst_268 = arith.constant 1.250000e-01 : f32
    %646 = vector.broadcast %cst_268 : f32 to vector<1x32xf32>
    %647 = arith.mulf %645, %646 : vector<1x32xf32>
    %c2_269 = arith.constant 2 : index
    %c0_270 = arith.constant 0 : index
    %648 = vector.load %arg12[%c2_269, %c0_270] : memref<4x32xf32, #tpu.memory_space<vmem>>, vector<1x32xf32>
    %649 = vector.shape_cast %648 : vector<1x32xf32> to vector<32xf32>
    %650 = vector.shape_cast %649 : vector<32xf32> to vector<1x32xf32>
    %651 = arith.mulf %647, %650 : vector<1x32xf32>
    %652 = vector.broadcast %651 : vector<1x32xf32> to vector<8x32xf32>
    %653 = arith.subf %643, %652 : vector<8x32xf32>
    %654 = arith.mulf %653, %653 : vector<8x32xf32>
    %cst_271 = arith.constant dense<0.000000e+00> : vector<32xf32>
    %655 = vector.multi_reduction <add>, %654, %cst_271 [0] : vector<8x32xf32> to vector<32xf32>
    %656 = vector.shape_cast %655 : vector<32xf32> to vector<1x32xf32>
    %cst_272 = arith.constant 1.250000e-01 : f32
    %657 = vector.broadcast %cst_272 : f32 to vector<1x32xf32>
    %658 = arith.mulf %656, %657 : vector<1x32xf32>
    %c2_273 = arith.constant 2 : index
    %c0_274 = arith.constant 0 : index
    %659 = vector.load %arg10[%c2_273, %c0_274] : memref<4x32xf32, #tpu.memory_space<vmem>>, vector<1x32xf32>
    %660 = vector.shape_cast %659 : vector<1x32xf32> to vector<32xf32>
    %661 = vector.shape_cast %660 : vector<32xf32> to vector<1x32xf32>
    %662 = vector.broadcast %661 : vector<1x32xf32> to vector<8x32xf32>
    %663 = arith.mulf %662, %653 : vector<8x32xf32>
    %cst_275 = arith.constant 9.99999974E-6 : f32
    %664 = vector.broadcast %cst_275 : f32 to vector<1x32xf32>
    %665 = arith.addf %658, %664 : vector<1x32xf32>
    %666 = math.rsqrt %665 : vector<1x32xf32>
    %667 = vector.broadcast %666 : vector<1x32xf32> to vector<8x32xf32>
    %668 = arith.mulf %663, %667 : vector<8x32xf32>
    %c2_276 = arith.constant 2 : index
    %c0_277 = arith.constant 0 : index
    %669 = vector.load %arg11[%c2_276, %c0_277] : memref<4x32xf32, #tpu.memory_space<vmem>>, vector<1x32xf32>
    %670 = vector.shape_cast %669 : vector<1x32xf32> to vector<32xf32>
    %671 = vector.shape_cast %670 : vector<32xf32> to vector<1x32xf32>
    %672 = vector.broadcast %671 : vector<1x32xf32> to vector<8x32xf32>
    %673 = arith.addf %668, %672 : vector<8x32xf32>
    %cst_278 = arith.constant 0.000000e+00 : f32
    %674 = vector.broadcast %cst_278 : f32 to vector<8x32xf32>
    %675 = arith.cmpf oge, %673, %674 : vector<8x32xf32>
    %c2_279 = arith.constant 2 : index
    %676 = memref.load %arg13[%c2_279] : memref<4xf32, #tpu.memory_space<smem>>
    %677 = vector.broadcast %676 : f32 to vector<8x32xf32>
    %678 = arith.mulf %677, %673 : vector<8x32xf32>
    %679 = arith.select %675, %673, %678 : vector<8x32xi1>, vector<8x32xf32>
    %c2_280 = arith.constant 2 : index
    %c0_281 = arith.constant 0 : index
    %c0_282 = arith.constant 0 : index
    %680 = vector.load %arg6[%c2_280, %c0_281, %c0_282] : memref<3x32x32xf32, #tpu.memory_space<vmem>>, vector<1x32x32xf32>
    %681 = vector.shape_cast %680 : vector<1x32x32xf32> to vector<32x32xf32>
    %cst_283 = arith.constant dense<0.000000e+00> : vector<8x32xf32>
    %682 = tpu.matmul %679, %681, %cst_283 {dimension_numbers = #tpu.dot_dimension_numbers<[1], [0], [0], [1], [0, 0, 1, 1], [], []>} : vector<8x32xf32>, vector<32x32xf32>, vector<8x32xf32> -> vector<8x32xf32>
    %683 = vector.extract_strided_slice %682 {offsets = [0, 0], sizes = [8, 8], strides = [1, 1]} : vector<8x32xf32> to vector<8x8xf32>
    %c3_284 = arith.constant 3 : index
    %c0_285 = arith.constant 0 : index
    %c0_286 = arith.constant 0 : index
    %684 = vector.load %arg8[%c3_284, %c0_285, %c0_286] : memref<4x4x8xf32, #tpu.memory_space<vmem>>, vector<1x1x8xf32>
    %685 = vector.shape_cast %684 : vector<1x1x8xf32> to vector<8xf32>
    %686 = vector.shape_cast %685 : vector<8xf32> to vector<1x8xf32>
    %687 = vector.broadcast %686 : vector<1x8xf32> to vector<8x8xf32>
    %688 = arith.mulf %683, %687 : vector<8x8xf32>
    %cst_287 = arith.constant dense<0.000000e+00> : vector<8xf32>
    %689 = vector.multi_reduction <add>, %688, %cst_287 [1] : vector<8x8xf32> to vector<8xf32>
    %690 = vector.shape_cast %689 : vector<8xf32> to vector<8x1xf32>
    %c3_288 = arith.constant 3 : index
    %c0_289 = arith.constant 0 : index
    %c0_290 = arith.constant 0 : index
    %691 = vector.load %arg7[%c3_288, %c0_289, %c0_290] : memref<4x4x8xf32, #tpu.memory_space<vmem>>, vector<1x1x8xf32>
    %692 = vector.shape_cast %691 : vector<1x1x8xf32> to vector<8xf32>
    %693 = vector.shape_cast %692 : vector<8xf32> to vector<1x8xf32>
    %694 = vector.broadcast %693 : vector<1x8xf32> to vector<8x8xf32>
    %695 = arith.mulf %683, %694 : vector<8x8xf32>
    %cst_291 = arith.constant dense<0.000000e+00> : vector<8xf32>
    %696 = vector.multi_reduction <add>, %695, %cst_291 [1] : vector<8x8xf32> to vector<8xf32>
    %697 = vector.shape_cast %696 : vector<8xf32> to vector<8x1xf32>
    %698 = vector.broadcast %697 : vector<8x1xf32> to vector<8x8xf32>
    %699 = arith.mulf %698, %53 : vector<8x8xf32>
    %cst_292 = arith.constant dense<0.000000e+00> : vector<8xf32>
    %700 = vector.multi_reduction <add>, %699, %cst_292 [0] : vector<8x8xf32> to vector<8xf32>
    %701 = vector.shape_cast %700 : vector<8xf32> to vector<1x8xf32>
    %702 = vector.broadcast %690 : vector<8x1xf32> to vector<8x8xf32>
    %703 = vector.broadcast %701 : vector<1x8xf32> to vector<8x8xf32>
    %704 = arith.addf %702, %703 : vector<8x8xf32>
    %cst_293 = arith.constant 0.000000e+00 : f32
    %705 = vector.broadcast %cst_293 : f32 to vector<8x8xf32>
    %706 = arith.cmpf oge, %704, %705 : vector<8x8xf32>
    %cst_294 = arith.constant 2.000000e-01 : f32
    %707 = vector.broadcast %cst_294 : f32 to vector<8x8xf32>
    %708 = arith.mulf %707, %704 : vector<8x8xf32>
    %709 = arith.select %706, %704, %708 : vector<8x8xi1>, vector<8x8xf32>
    %cst_295 = arith.constant 0.000000e+00 : f32
    %710 = vector.broadcast %cst_295 : f32 to vector<8x8xf32>
    %711 = arith.cmpf ogt, %52, %710 : vector<8x8xf32>
    %cst_296 = arith.constant -1.000000e+30 : f32
    %712 = vector.broadcast %cst_296 : f32 to vector<8x8xf32>
    %713 = arith.select %711, %709, %712 : vector<8x8xi1>, vector<8x8xf32>
    %cst_297 = arith.constant dense<0xFF800000> : vector<8xf32>
    %714 = vector.multi_reduction <maximumf>, %713, %cst_297 [1] : vector<8x8xf32> to vector<8xf32>
    %715 = vector.shape_cast %714 : vector<8xf32> to vector<8x1xf32>
    %716 = vector.broadcast %715 : vector<8x1xf32> to vector<8x8xf32>
    %717 = arith.subf %713, %716 : vector<8x8xf32>
    %718 = math.exp %717 : vector<8x8xf32>
    %cst_298 = arith.constant dense<0.000000e+00> : vector<8xf32>
    %719 = vector.multi_reduction <add>, %718, %cst_298 [1] : vector<8x8xf32> to vector<8xf32>
    %720 = vector.shape_cast %719 : vector<8xf32> to vector<8x1xf32>
    %721 = vector.broadcast %720 : vector<8x1xf32> to vector<8x8xf32>
    %722 = arith.divf %718, %721 : vector<8x8xf32>
    %cst_299 = arith.constant dense<0.000000e+00> : vector<8x8xf32>
    %723 = tpu.matmul %722, %683, %cst_299 {dimension_numbers = #tpu.dot_dimension_numbers<[1], [0], [0], [1], [0, 0, 1, 1], [], []>} : vector<8x8xf32>, vector<8x8xf32>, vector<8x8xf32> -> vector<8x8xf32>
    %724 = vector.extract_strided_slice %682 {offsets = [0, 8], sizes = [8, 8], strides = [1, 1]} : vector<8x32xf32> to vector<8x8xf32>
    %c3_300 = arith.constant 3 : index
    %c1_301 = arith.constant 1 : index
    %c0_302 = arith.constant 0 : index
    %725 = vector.load %arg8[%c3_300, %c1_301, %c0_302] : memref<4x4x8xf32, #tpu.memory_space<vmem>>, vector<1x1x8xf32>
    %726 = vector.shape_cast %725 : vector<1x1x8xf32> to vector<8xf32>
    %727 = vector.shape_cast %726 : vector<8xf32> to vector<1x8xf32>
    %728 = vector.broadcast %727 : vector<1x8xf32> to vector<8x8xf32>
    %729 = arith.mulf %724, %728 : vector<8x8xf32>
    %cst_303 = arith.constant dense<0.000000e+00> : vector<8xf32>
    %730 = vector.multi_reduction <add>, %729, %cst_303 [1] : vector<8x8xf32> to vector<8xf32>
    %731 = vector.shape_cast %730 : vector<8xf32> to vector<8x1xf32>
    %c3_304 = arith.constant 3 : index
    %c1_305 = arith.constant 1 : index
    %c0_306 = arith.constant 0 : index
    %732 = vector.load %arg7[%c3_304, %c1_305, %c0_306] : memref<4x4x8xf32, #tpu.memory_space<vmem>>, vector<1x1x8xf32>
    %733 = vector.shape_cast %732 : vector<1x1x8xf32> to vector<8xf32>
    %734 = vector.shape_cast %733 : vector<8xf32> to vector<1x8xf32>
    %735 = vector.broadcast %734 : vector<1x8xf32> to vector<8x8xf32>
    %736 = arith.mulf %724, %735 : vector<8x8xf32>
    %cst_307 = arith.constant dense<0.000000e+00> : vector<8xf32>
    %737 = vector.multi_reduction <add>, %736, %cst_307 [1] : vector<8x8xf32> to vector<8xf32>
    %738 = vector.shape_cast %737 : vector<8xf32> to vector<8x1xf32>
    %739 = vector.broadcast %738 : vector<8x1xf32> to vector<8x8xf32>
    %740 = arith.mulf %739, %53 : vector<8x8xf32>
    %cst_308 = arith.constant dense<0.000000e+00> : vector<8xf32>
    %741 = vector.multi_reduction <add>, %740, %cst_308 [0] : vector<8x8xf32> to vector<8xf32>
    %742 = vector.shape_cast %741 : vector<8xf32> to vector<1x8xf32>
    %743 = vector.broadcast %731 : vector<8x1xf32> to vector<8x8xf32>
    %744 = vector.broadcast %742 : vector<1x8xf32> to vector<8x8xf32>
    %745 = arith.addf %743, %744 : vector<8x8xf32>
    %cst_309 = arith.constant 0.000000e+00 : f32
    %746 = vector.broadcast %cst_309 : f32 to vector<8x8xf32>
    %747 = arith.cmpf oge, %745, %746 : vector<8x8xf32>
    %cst_310 = arith.constant 2.000000e-01 : f32
    %748 = vector.broadcast %cst_310 : f32 to vector<8x8xf32>
    %749 = arith.mulf %748, %745 : vector<8x8xf32>
    %750 = arith.select %747, %745, %749 : vector<8x8xi1>, vector<8x8xf32>
    %cst_311 = arith.constant 0.000000e+00 : f32
    %751 = vector.broadcast %cst_311 : f32 to vector<8x8xf32>
    %752 = arith.cmpf ogt, %52, %751 : vector<8x8xf32>
    %cst_312 = arith.constant -1.000000e+30 : f32
    %753 = vector.broadcast %cst_312 : f32 to vector<8x8xf32>
    %754 = arith.select %752, %750, %753 : vector<8x8xi1>, vector<8x8xf32>
    %cst_313 = arith.constant dense<0xFF800000> : vector<8xf32>
    %755 = vector.multi_reduction <maximumf>, %754, %cst_313 [1] : vector<8x8xf32> to vector<8xf32>
    %756 = vector.shape_cast %755 : vector<8xf32> to vector<8x1xf32>
    %757 = vector.broadcast %756 : vector<8x1xf32> to vector<8x8xf32>
    %758 = arith.subf %754, %757 : vector<8x8xf32>
    %759 = math.exp %758 : vector<8x8xf32>
    %cst_314 = arith.constant dense<0.000000e+00> : vector<8xf32>
    %760 = vector.multi_reduction <add>, %759, %cst_314 [1] : vector<8x8xf32> to vector<8xf32>
    %761 = vector.shape_cast %760 : vector<8xf32> to vector<8x1xf32>
    %762 = vector.broadcast %761 : vector<8x1xf32> to vector<8x8xf32>
    %763 = arith.divf %759, %762 : vector<8x8xf32>
    %cst_315 = arith.constant dense<0.000000e+00> : vector<8x8xf32>
    %764 = tpu.matmul %763, %724, %cst_315 {dimension_numbers = #tpu.dot_dimension_numbers<[1], [0], [0], [1], [0, 0, 1, 1], [], []>} : vector<8x8xf32>, vector<8x8xf32>, vector<8x8xf32> -> vector<8x8xf32>
    %765 = vector.extract_strided_slice %682 {offsets = [0, 16], sizes = [8, 8], strides = [1, 1]} : vector<8x32xf32> to vector<8x8xf32>
    %c3_316 = arith.constant 3 : index
    %c2_317 = arith.constant 2 : index
    %c0_318 = arith.constant 0 : index
    %766 = vector.load %arg8[%c3_316, %c2_317, %c0_318] : memref<4x4x8xf32, #tpu.memory_space<vmem>>, vector<1x1x8xf32>
    %767 = vector.shape_cast %766 : vector<1x1x8xf32> to vector<8xf32>
    %768 = vector.shape_cast %767 : vector<8xf32> to vector<1x8xf32>
    %769 = vector.broadcast %768 : vector<1x8xf32> to vector<8x8xf32>
    %770 = arith.mulf %765, %769 : vector<8x8xf32>
    %cst_319 = arith.constant dense<0.000000e+00> : vector<8xf32>
    %771 = vector.multi_reduction <add>, %770, %cst_319 [1] : vector<8x8xf32> to vector<8xf32>
    %772 = vector.shape_cast %771 : vector<8xf32> to vector<8x1xf32>
    %c3_320 = arith.constant 3 : index
    %c2_321 = arith.constant 2 : index
    %c0_322 = arith.constant 0 : index
    %773 = vector.load %arg7[%c3_320, %c2_321, %c0_322] : memref<4x4x8xf32, #tpu.memory_space<vmem>>, vector<1x1x8xf32>
    %774 = vector.shape_cast %773 : vector<1x1x8xf32> to vector<8xf32>
    %775 = vector.shape_cast %774 : vector<8xf32> to vector<1x8xf32>
    %776 = vector.broadcast %775 : vector<1x8xf32> to vector<8x8xf32>
    %777 = arith.mulf %765, %776 : vector<8x8xf32>
    %cst_323 = arith.constant dense<0.000000e+00> : vector<8xf32>
    %778 = vector.multi_reduction <add>, %777, %cst_323 [1] : vector<8x8xf32> to vector<8xf32>
    %779 = vector.shape_cast %778 : vector<8xf32> to vector<8x1xf32>
    %780 = vector.broadcast %779 : vector<8x1xf32> to vector<8x8xf32>
    %781 = arith.mulf %780, %53 : vector<8x8xf32>
    %cst_324 = arith.constant dense<0.000000e+00> : vector<8xf32>
    %782 = vector.multi_reduction <add>, %781, %cst_324 [0] : vector<8x8xf32> to vector<8xf32>
    %783 = vector.shape_cast %782 : vector<8xf32> to vector<1x8xf32>
    %784 = vector.broadcast %772 : vector<8x1xf32> to vector<8x8xf32>
    %785 = vector.broadcast %783 : vector<1x8xf32> to vector<8x8xf32>
    %786 = arith.addf %784, %785 : vector<8x8xf32>
    %cst_325 = arith.constant 0.000000e+00 : f32
    %787 = vector.broadcast %cst_325 : f32 to vector<8x8xf32>
    %788 = arith.cmpf oge, %786, %787 : vector<8x8xf32>
    %cst_326 = arith.constant 2.000000e-01 : f32
    %789 = vector.broadcast %cst_326 : f32 to vector<8x8xf32>
    %790 = arith.mulf %789, %786 : vector<8x8xf32>
    %791 = arith.select %788, %786, %790 : vector<8x8xi1>, vector<8x8xf32>
    %cst_327 = arith.constant 0.000000e+00 : f32
    %792 = vector.broadcast %cst_327 : f32 to vector<8x8xf32>
    %793 = arith.cmpf ogt, %52, %792 : vector<8x8xf32>
    %cst_328 = arith.constant -1.000000e+30 : f32
    %794 = vector.broadcast %cst_328 : f32 to vector<8x8xf32>
    %795 = arith.select %793, %791, %794 : vector<8x8xi1>, vector<8x8xf32>
    %cst_329 = arith.constant dense<0xFF800000> : vector<8xf32>
    %796 = vector.multi_reduction <maximumf>, %795, %cst_329 [1] : vector<8x8xf32> to vector<8xf32>
    %797 = vector.shape_cast %796 : vector<8xf32> to vector<8x1xf32>
    %798 = vector.broadcast %797 : vector<8x1xf32> to vector<8x8xf32>
    %799 = arith.subf %795, %798 : vector<8x8xf32>
    %800 = math.exp %799 : vector<8x8xf32>
    %cst_330 = arith.constant dense<0.000000e+00> : vector<8xf32>
    %801 = vector.multi_reduction <add>, %800, %cst_330 [1] : vector<8x8xf32> to vector<8xf32>
    %802 = vector.shape_cast %801 : vector<8xf32> to vector<8x1xf32>
    %803 = vector.broadcast %802 : vector<8x1xf32> to vector<8x8xf32>
    %804 = arith.divf %800, %803 : vector<8x8xf32>
    %cst_331 = arith.constant dense<0.000000e+00> : vector<8x8xf32>
    %805 = tpu.matmul %804, %765, %cst_331 {dimension_numbers = #tpu.dot_dimension_numbers<[1], [0], [0], [1], [0, 0, 1, 1], [], []>} : vector<8x8xf32>, vector<8x8xf32>, vector<8x8xf32> -> vector<8x8xf32>
    %806 = vector.extract_strided_slice %682 {offsets = [0, 24], sizes = [8, 8], strides = [1, 1]} : vector<8x32xf32> to vector<8x8xf32>
    %c3_332 = arith.constant 3 : index
    %c3_333 = arith.constant 3 : index
    %c0_334 = arith.constant 0 : index
    %807 = vector.load %arg8[%c3_332, %c3_333, %c0_334] : memref<4x4x8xf32, #tpu.memory_space<vmem>>, vector<1x1x8xf32>
    %808 = vector.shape_cast %807 : vector<1x1x8xf32> to vector<8xf32>
    %809 = vector.shape_cast %808 : vector<8xf32> to vector<1x8xf32>
    %810 = vector.broadcast %809 : vector<1x8xf32> to vector<8x8xf32>
    %811 = arith.mulf %806, %810 : vector<8x8xf32>
    %cst_335 = arith.constant dense<0.000000e+00> : vector<8xf32>
    %812 = vector.multi_reduction <add>, %811, %cst_335 [1] : vector<8x8xf32> to vector<8xf32>
    %813 = vector.shape_cast %812 : vector<8xf32> to vector<8x1xf32>
    %c3_336 = arith.constant 3 : index
    %c3_337 = arith.constant 3 : index
    %c0_338 = arith.constant 0 : index
    %814 = vector.load %arg7[%c3_336, %c3_337, %c0_338] : memref<4x4x8xf32, #tpu.memory_space<vmem>>, vector<1x1x8xf32>
    %815 = vector.shape_cast %814 : vector<1x1x8xf32> to vector<8xf32>
    %816 = vector.shape_cast %815 : vector<8xf32> to vector<1x8xf32>
    %817 = vector.broadcast %816 : vector<1x8xf32> to vector<8x8xf32>
    %818 = arith.mulf %806, %817 : vector<8x8xf32>
    %cst_339 = arith.constant dense<0.000000e+00> : vector<8xf32>
    %819 = vector.multi_reduction <add>, %818, %cst_339 [1] : vector<8x8xf32> to vector<8xf32>
    %820 = vector.shape_cast %819 : vector<8xf32> to vector<8x1xf32>
    %821 = vector.broadcast %820 : vector<8x1xf32> to vector<8x8xf32>
    %822 = arith.mulf %821, %53 : vector<8x8xf32>
    %cst_340 = arith.constant dense<0.000000e+00> : vector<8xf32>
    %823 = vector.multi_reduction <add>, %822, %cst_340 [0] : vector<8x8xf32> to vector<8xf32>
    %824 = vector.shape_cast %823 : vector<8xf32> to vector<1x8xf32>
    %825 = vector.broadcast %813 : vector<8x1xf32> to vector<8x8xf32>
    %826 = vector.broadcast %824 : vector<1x8xf32> to vector<8x8xf32>
    %827 = arith.addf %825, %826 : vector<8x8xf32>
    %cst_341 = arith.constant 0.000000e+00 : f32
    %828 = vector.broadcast %cst_341 : f32 to vector<8x8xf32>
    %829 = arith.cmpf oge, %827, %828 : vector<8x8xf32>
    %cst_342 = arith.constant 2.000000e-01 : f32
    %830 = vector.broadcast %cst_342 : f32 to vector<8x8xf32>
    %831 = arith.mulf %830, %827 : vector<8x8xf32>
    %832 = arith.select %829, %827, %831 : vector<8x8xi1>, vector<8x8xf32>
    %cst_343 = arith.constant 0.000000e+00 : f32
    %833 = vector.broadcast %cst_343 : f32 to vector<8x8xf32>
    %834 = arith.cmpf ogt, %52, %833 : vector<8x8xf32>
    %cst_344 = arith.constant -1.000000e+30 : f32
    %835 = vector.broadcast %cst_344 : f32 to vector<8x8xf32>
    %836 = arith.select %834, %832, %835 : vector<8x8xi1>, vector<8x8xf32>
    %cst_345 = arith.constant dense<0xFF800000> : vector<8xf32>
    %837 = vector.multi_reduction <maximumf>, %836, %cst_345 [1] : vector<8x8xf32> to vector<8xf32>
    %838 = vector.shape_cast %837 : vector<8xf32> to vector<8x1xf32>
    %839 = vector.broadcast %838 : vector<8x1xf32> to vector<8x8xf32>
    %840 = arith.subf %836, %839 : vector<8x8xf32>
    %841 = math.exp %840 : vector<8x8xf32>
    %cst_346 = arith.constant dense<0.000000e+00> : vector<8xf32>
    %842 = vector.multi_reduction <add>, %841, %cst_346 [1] : vector<8x8xf32> to vector<8xf32>
    %843 = vector.shape_cast %842 : vector<8xf32> to vector<8x1xf32>
    %844 = vector.broadcast %843 : vector<8x1xf32> to vector<8x8xf32>
    %845 = arith.divf %841, %844 : vector<8x8xf32>
    %cst_347 = arith.constant dense<0.000000e+00> : vector<8x8xf32>
    %846 = tpu.matmul %845, %806, %cst_347 {dimension_numbers = #tpu.dot_dimension_numbers<[1], [0], [0], [1], [0, 0, 1, 1], [], []>} : vector<8x8xf32>, vector<8x8xf32>, vector<8x8xf32> -> vector<8x8xf32>
    %847 = tpu.concatenate %723, %764, %805, %846 in 1 : vector<8x8xf32>, vector<8x8xf32>, vector<8x8xf32>, vector<8x8xf32> -> vector<8x32xf32>
    %c3_348 = arith.constant 3 : index
    %c0_349 = arith.constant 0 : index
    %848 = vector.load %arg9[%c3_348, %c0_349] : memref<4x32xf32, #tpu.memory_space<vmem>>, vector<1x32xf32>
    %849 = vector.shape_cast %848 : vector<1x32xf32> to vector<32xf32>
    %850 = vector.shape_cast %849 : vector<32xf32> to vector<1x32xf32>
    %851 = vector.broadcast %850 : vector<1x32xf32> to vector<8x32xf32>
    %852 = arith.addf %847, %851 : vector<8x32xf32>
    %cst_350 = arith.constant dense<0.000000e+00> : vector<32xf32>
    %853 = vector.multi_reduction <add>, %852, %cst_350 [0] : vector<8x32xf32> to vector<32xf32>
    %854 = vector.shape_cast %853 : vector<32xf32> to vector<1x32xf32>
    %cst_351 = arith.constant 1.250000e-01 : f32
    %855 = vector.broadcast %cst_351 : f32 to vector<1x32xf32>
    %856 = arith.mulf %854, %855 : vector<1x32xf32>
    %c3_352 = arith.constant 3 : index
    %c0_353 = arith.constant 0 : index
    %857 = vector.load %arg12[%c3_352, %c0_353] : memref<4x32xf32, #tpu.memory_space<vmem>>, vector<1x32xf32>
    %858 = vector.shape_cast %857 : vector<1x32xf32> to vector<32xf32>
    %859 = vector.shape_cast %858 : vector<32xf32> to vector<1x32xf32>
    %860 = arith.mulf %856, %859 : vector<1x32xf32>
    %861 = vector.broadcast %860 : vector<1x32xf32> to vector<8x32xf32>
    %862 = arith.subf %852, %861 : vector<8x32xf32>
    %863 = arith.mulf %862, %862 : vector<8x32xf32>
    %cst_354 = arith.constant dense<0.000000e+00> : vector<32xf32>
    %864 = vector.multi_reduction <add>, %863, %cst_354 [0] : vector<8x32xf32> to vector<32xf32>
    %865 = vector.shape_cast %864 : vector<32xf32> to vector<1x32xf32>
    %cst_355 = arith.constant 1.250000e-01 : f32
    %866 = vector.broadcast %cst_355 : f32 to vector<1x32xf32>
    %867 = arith.mulf %865, %866 : vector<1x32xf32>
    %c3_356 = arith.constant 3 : index
    %c0_357 = arith.constant 0 : index
    %868 = vector.load %arg10[%c3_356, %c0_357] : memref<4x32xf32, #tpu.memory_space<vmem>>, vector<1x32xf32>
    %869 = vector.shape_cast %868 : vector<1x32xf32> to vector<32xf32>
    %870 = vector.shape_cast %869 : vector<32xf32> to vector<1x32xf32>
    %871 = vector.broadcast %870 : vector<1x32xf32> to vector<8x32xf32>
    %872 = arith.mulf %871, %862 : vector<8x32xf32>
    %cst_358 = arith.constant 9.99999974E-6 : f32
    %873 = vector.broadcast %cst_358 : f32 to vector<1x32xf32>
    %874 = arith.addf %867, %873 : vector<1x32xf32>
    %875 = math.rsqrt %874 : vector<1x32xf32>
    %876 = vector.broadcast %875 : vector<1x32xf32> to vector<8x32xf32>
    %877 = arith.mulf %872, %876 : vector<8x32xf32>
    %c3_359 = arith.constant 3 : index
    %c0_360 = arith.constant 0 : index
    %878 = vector.load %arg11[%c3_359, %c0_360] : memref<4x32xf32, #tpu.memory_space<vmem>>, vector<1x32xf32>
    %879 = vector.shape_cast %878 : vector<1x32xf32> to vector<32xf32>
    %880 = vector.shape_cast %879 : vector<32xf32> to vector<1x32xf32>
    %881 = vector.broadcast %880 : vector<1x32xf32> to vector<8x32xf32>
    %882 = arith.addf %877, %881 : vector<8x32xf32>
    %cst_361 = arith.constant 0.000000e+00 : f32
    %883 = vector.broadcast %cst_361 : f32 to vector<8x32xf32>
    %884 = arith.cmpf oge, %882, %883 : vector<8x32xf32>
    %c3_362 = arith.constant 3 : index
    %885 = memref.load %arg13[%c3_362] : memref<4xf32, #tpu.memory_space<smem>>
    %886 = vector.broadcast %885 : f32 to vector<8x32xf32>
    %887 = arith.mulf %886, %882 : vector<8x32xf32>
    %888 = arith.select %884, %882, %887 : vector<8x32xi1>, vector<8x32xf32>
    %c0_363 = arith.constant 0 : index
    %c0_364 = arith.constant 0 : index
    %889 = vector.load %arg14[%c0_363, %c0_364] : memref<2x8xf32, #tpu.memory_space<vmem>>, vector<2x8xf32>
    %cst_365 = arith.constant dense<0.000000e+00> : vector<2x32xf32>
    %890 = tpu.matmul %889, %888, %cst_365 {dimension_numbers = #tpu.dot_dimension_numbers<[1], [0], [0], [1], [0, 0, 1, 1], [], []>} : vector<2x8xf32>, vector<8x32xf32>, vector<2x32xf32> -> vector<2x32xf32>
    %c0_366 = arith.constant 0 : index
    %c0_367 = arith.constant 0 : index
    %891 = vector.load %arg15[%c0_366, %c0_367] : memref<2x1xf32, #tpu.memory_space<vmem>>, vector<2x1xf32>
    %892 = vector.broadcast %891 : vector<2x1xf32> to vector<2x32xf32>
    %893 = arith.mulf %890, %892 : vector<2x32xf32>
    %c0_368 = arith.constant 0 : index
    %c0_369 = arith.constant 0 : index
    %894 = vector.load %arg16[%c0_368, %c0_369] : memref<32x16xf32, #tpu.memory_space<vmem>>, vector<32x16xf32>
    %cst_370 = arith.constant dense<0.000000e+00> : vector<2x16xf32>
    %895 = tpu.matmul %893, %894, %cst_370 {dimension_numbers = #tpu.dot_dimension_numbers<[1], [0], [0], [1], [0, 0, 1, 1], [], []>} : vector<2x32xf32>, vector<32x16xf32>, vector<2x16xf32> -> vector<2x16xf32>
    %c0_371 = arith.constant 0 : index
    %c0_372 = arith.constant 0 : index
    %896 = vector.load %arg17[%c0_371, %c0_372] : memref<1x16xf32, #tpu.memory_space<vmem>>, vector<1x16xf32>
    %897 = vector.broadcast %896 : vector<1x16xf32> to vector<2x16xf32>
    %898 = arith.addf %895, %897 : vector<2x16xf32>
    %cst_373 = arith.constant 0.000000e+00 : f32
    %899 = vector.broadcast %cst_373 : f32 to vector<2x16xf32>
    %900 = arith.cmpf ogt, %898, %899 : vector<2x16xf32>
    %901 = math.exp %898 : vector<2x16xf32>
    %cst_374 = arith.constant 1.000000e+00 : f32
    %902 = vector.broadcast %cst_374 : f32 to vector<2x16xf32>
    %903 = arith.subf %901, %902 : vector<2x16xf32>
    %904 = arith.select %900, %898, %903 : vector<2x16xi1>, vector<2x16xf32>
    %c0_375 = arith.constant 0 : index
    %c0_376 = arith.constant 0 : index
    %905 = vector.load %arg18[%c0_375, %c0_376] : memref<16x8xf32, #tpu.memory_space<vmem>>, vector<16x8xf32>
    %cst_377 = arith.constant dense<0.000000e+00> : vector<2x8xf32>
    %906 = tpu.matmul %904, %905, %cst_377 {dimension_numbers = #tpu.dot_dimension_numbers<[1], [0], [0], [1], [0, 0, 1, 1], [], []>} : vector<2x16xf32>, vector<16x8xf32>, vector<2x8xf32> -> vector<2x8xf32>
    %c0_378 = arith.constant 0 : index
    %c0_379 = arith.constant 0 : index
    %907 = vector.load %arg19[%c0_378, %c0_379] : memref<1x8xf32, #tpu.memory_space<vmem>>, vector<1x8xf32>
    %908 = vector.broadcast %907 : vector<1x8xf32> to vector<2x8xf32>
    %909 = arith.addf %906, %908 : vector<2x8xf32>
    %cst_380 = arith.constant 0.000000e+00 : f32
    %910 = vector.broadcast %cst_380 : f32 to vector<2x8xf32>
    %911 = arith.cmpf ogt, %909, %910 : vector<2x8xf32>
    %912 = math.exp %909 : vector<2x8xf32>
    %cst_381 = arith.constant 1.000000e+00 : f32
    %913 = vector.broadcast %cst_381 : f32 to vector<2x8xf32>
    %914 = arith.subf %912, %913 : vector<2x8xf32>
    %915 = arith.select %911, %909, %914 : vector<2x8xi1>, vector<2x8xf32>
    %c0_382 = arith.constant 0 : index
    %c0_383 = arith.constant 0 : index
    %916 = vector.load %arg20[%c0_382, %c0_383] : memref<8x3xf32, #tpu.memory_space<vmem>>, vector<8x3xf32>
    %cst_384 = arith.constant dense<0.000000e+00> : vector<2x3xf32>
    %917 = tpu.matmul %915, %916, %cst_384 {dimension_numbers = #tpu.dot_dimension_numbers<[1], [0], [0], [1], [0, 0, 1, 1], [], []>} : vector<2x8xf32>, vector<8x3xf32>, vector<2x3xf32> -> vector<2x3xf32>
    %c0_385 = arith.constant 0 : index
    %c0_386 = arith.constant 0 : index
    %918 = vector.load %arg21[%c0_385, %c0_386] : memref<1x3xf32, #tpu.memory_space<vmem>>, vector<1x3xf32>
    %919 = vector.broadcast %918 : vector<1x3xf32> to vector<2x3xf32>
    %920 = arith.addf %917, %919 : vector<2x3xf32>
    %cst_387 = arith.constant 0.000000e+00 : f32
    %921 = vector.broadcast %cst_387 : f32 to vector<2x3xf32>
    %922 = arith.cmpf ogt, %920, %921 : vector<2x3xf32>
    %923 = math.exp %920 : vector<2x3xf32>
    %cst_388 = arith.constant 1.000000e+00 : f32
    %924 = vector.broadcast %cst_388 : f32 to vector<2x3xf32>
    %925 = arith.subf %923, %924 : vector<2x3xf32>
    %926 = arith.select %922, %920, %925 : vector<2x3xi1>, vector<2x3xf32>
    %cst_389 = arith.constant dense<0xFF800000> : vector<2xf32>
    %927 = vector.multi_reduction <maximumf>, %926, %cst_389 [1] : vector<2x3xf32> to vector<2xf32>
    %928 = vector.shape_cast %927 : vector<2xf32> to vector<2x1xf32>
    %929 = vector.broadcast %928 : vector<2x1xf32> to vector<2x3xf32>
    %930 = arith.subf %926, %929 : vector<2x3xf32>
    %931 = math.exp %930 : vector<2x3xf32>
    %cst_390 = arith.constant dense<0.000000e+00> : vector<2xf32>
    %932 = vector.multi_reduction <add>, %931, %cst_390 [1] : vector<2x3xf32> to vector<2xf32>
    %933 = vector.shape_cast %932 : vector<2xf32> to vector<2x1xf32>
    %934 = vector.broadcast %933 : vector<2x1xf32> to vector<2x3xf32>
    %935 = arith.divf %931, %934 : vector<2x3xf32>
    %c0_391 = arith.constant 0 : index
    %c0_392 = arith.constant 0 : index
    %936 = vector.load %arg22[%c0_391, %c0_392] : memref<2x3xf32, #tpu.memory_space<vmem>>, vector<2x3xf32>
    tpu.vector_store %arg22[%c0_391, %c0_392], %935 {strides = array<i32>} : memref<2x3xf32, #tpu.memory_space<vmem>>, vector<2x3xf32>,
    return
  }
}

</mosaic_0001>

<bundles_post_ra>
// kernel: eeg_gat_forward.2
= control target key start
LH: loop header
LB: loop body
LE: loop exit
PB: predicated region body
PF: predicated region fallthrough
CT: control target
= control target key end

     0   :  { %s1326_s27 = smov 0   ;;  %s1545_s0 = inlined_call_operand.vmem [shape: f32[8,40], index: 0, kind: input, shape index: {}]   ;;  %s1546_s1 = inlined_call_operand.vmem [shape: f32[3,40,120], index: 1, kind: input, shape index: {}]   ;;  %s1547_s2 = inlined_call_operand.vmem [shape: f32[3,120,120], index: 2, kind: input, shape index: {}]   ;;  %s1548_s3 = inlined_call_operand.vmem [shape: f32[3,120,120], index: 3, kind: input, shape index: {}]   ;;  %s1549_s4 = inlined_call_operand.vmem [shape: f32[3,3,120], index: 4, kind: input, shape index: {}]   ;;  %s1550_s5 = inlined_call_operand.vmem [shape: f32[3,3,120], index: 5, kind: input, shape index: {}]   ;;  %s1551_s6 = inlined_call_operand.vmem [shape: f32[3,3,120], index: 6, kind: input, shape index: {}]   ;;  %s1552_s7 = inlined_call_operand.vmem [shape: f32[3,3,120], index: 7, kind: input, shape index: {}]   ;;  %s1553_s8 = inlined_call_operand.vmem [shape: f32[3,8,120], index: 8, kind: output, shape index: {}]  }
   0x1 LB: > { %s1090_s28 = sadd.s32 4294967295, %s1275_s27   ;;  %p1094_p0 = scmp.ge.s32.totalorder %s1275_s27, 1  ;;  %s1275_s27 = sphi %s1326_s27, %s18_s27  }
   0x2   : > { %p318_p1 = scmp.lt.s32.totalorder %s1275_s27, 4 }
   0x4   : > { %p319_p2 = pnand %p1094_p0, %p318_p1 }
   0x5   : > { %p377_p3 = scmp.lt.s32.totalorder (!%p319_p2), %s1090_s28, 2  ;;  %s1279_s17 = smov (!%p319_p2), 88  }
   0x6   : > { %322 = sbr.rel (%p319_p2) target bundleno = 2484 (0x9b4), region = 52  ;;  %s1280_s18 = smov (!%p319_p2), 48  }
   0xb   : > { %v1277_v0 = vmov 0.0   ;;  %vm1278_vm0 = vmmov 0   ;;  %s1555_s28 = smov (!%p377_p3, %s1090_s28), 2  ;;  %v412_v6 = vld [vmem:[%s1545_s0] sm:$0xff]  ;;  %vm423_vm1 = vcmask 326656   ;;  %vm497_vm2 = vcmask 982016  }
   0xc   : > { %1158 = vmatprep.subr.mxu0 %v1277_v0  ;;  %1168 = vmatprep.mubr.msk.f32.mxu0 %vm1278_vm0, %v1277_v0  ;;  %s1237_s29 = smul.u32 40, %s1555_s28  ;;  %s1358_s13 = sshll.u32 %s1555_s28, 2  ;;  %v527_v24 = vlaneseq  ;;  %vm525_vm3 = vcmask 654336  }
   0xd   : > { %1171 = vmatprep.subr.mxu1 %v1277_v0  ;;  %1201 = vmatprep.mubr.msk.f32.mxu1 %vm1278_vm0, %v1277_v0  ;;  %s1364_s16 = scalar_lea.vmem %s1549_s4, %s1358_s13  ;;  %s1238_s19 = smul.u32 120, %s1555_s28 }
   0xe   : > { %s381_s10 = scalar_lea.vmem %s1546_s1, %s1237_s29  ;;  %v1103_v7 = vld [vmem:[%s1364_s16] ss:$0 sm:$0xff]  ;;  %v528_v26 = vshrl.u32 %v527_v24, 7  ;;  %s1429_s25 = scalar_lea.vmem %s1550_s5, %s1358_s13  ;;  %v1108_v24 = vld [vmem:[%s1364_s16 + $0x1] ss:$0 sm:$0xff] }
   0xf   : > { %v417_v1 = vld [vmem:[%s381_s10 + $0x20] sm:$0xff]  ;;  %v416_v2 = vld [vmem:[%s381_s10 + $0x18] sm:$0xff]  ;;  %v415_v3 = vld [vmem:[%s381_s10 + $0x10] sm:$0xff]  ;;  %s1394_s22 = scalar_lea.vmem %s1547_s2, %s1238_s19  ;;  %s1437_s30 = scalar_lea.vmem %s1551_s6, %s1358_s13 }
  0x10   : > { %1159 = vmatpush3.msra.mxu0 %v417_v1  ;;  %v414_v4 = vld [vmem:[%s381_s10 + $0x8] sm:$0xff]  ;;  %v413_v5 = vld [vmem:[%s381_s10] sm:$0xff]  ;;  %v1373_v29 = vsub.s32 0, %v528_v26  ;;  %v606_v49 = vld [vmem:[%s1394_s22 + $0x70] sm:$0xff]  ;;  %s1445_s11 = scalar_lea.vmem %s1552_s7, %s1358_s13  ;;  %s1476_s14 = scalar_lea.vmem %s1548_s3, %s1238_s19 }
  0x11   : > { %1160 = vmatprep.subr.mxu0 %v1277_v0  ;;  %1172 = vmatpush3.msra.mxu1 %v606_v49  ;;  %v605_v50 = vld [vmem:[%s1394_s22 + $0x68] sm:$0xff]  ;;  %v604_v51 = vld [vmem:[%s1394_s22 + $0x60] sm:$0xff]  ;;  %v603_v52 = vld [vmem:[%s1394_s22 + $0x58] sm:$0xff]  ;;  %s1102_s15 = sshll.u32 %s1555_s28, 3 }
  0x12   : > { %1161 = vmatpush3.msra.mxu0 %v416_v2  ;;  %1173 = vmatprep.subr.mxu1 %v1277_v0  ;;  %v602_v53 = vld [vmem:[%s1394_s22 + $0x50] sm:$0xff]  ;;  %v601_v54 = vld [vmem:[%s1394_s22 + $0x48] sm:$0xff]  ;;  %v600_v55 = vld [vmem:[%s1394_s22 + $0x40] sm:$0xff] }
  0x13   : > { %1162 = vmatprep.subr.mxu0 %v1277_v0  ;;  %1174 = vmatpush3.msra.mxu1 %v605_v50  ;;  %v599_v56 = vld [vmem:[%s1394_s22 + $0x38] sm:$0xff]  ;;  %v598_v57 = vld [vmem:[%s1394_s22 + $0x30] sm:$0xff]  ;;  %v597_v58 = vld [vmem:[%s1394_s22 + $0x28] sm:$0xff] }
  0x14   : > { %1163 = vmatpush3.msra.mxu0 %v415_v3  ;;  %1175 = vmatprep.subr.mxu1 %v1277_v0  ;;  %v596_v59 = vld [vmem:[%s1394_s22 + $0x20] sm:$0xff]  ;;  %v595_v60 = vld [vmem:[%s1394_s22 + $0x18] sm:$0xff]  ;;  %v594_v61 = vld [vmem:[%s1394_s22 + $0x10] sm:$0xff] }
  0x15   : > { %1164 = vmatprep.subr.mxu0 %v1277_v0  ;;  %1176 = vmatpush3.msra.mxu1 %v604_v51  ;;  %v593_v62 = vld [vmem:[%s1394_s22 + $0x8] sm:$0xff]  ;;  %v592_v63 = vld [vmem:[%s1394_s22] sm:$0xff] }
  0x16   : > { %1165 = vmatpush3.msra.mxu0 %v414_v4  ;;  %1177 = vmatprep.subr.mxu1 %v1277_v0 }
  0x17   : > { %1166 = vmatprep.subr.mxu0 %v1277_v0  ;;  %1178 = vmatpush3.msra.mxu1 %v603_v52 }
  0x18   : > { %1167 = vmatpush3.msra.mxu0 %v413_v5  ;;  %1179 = vmatprep.subr.mxu1 %v1277_v0 }
  0x19   : > { %1169 = vmatmul.mubr.msk.f32.vlgmr.msra.gmra.mxu0 %vm423_vm1, %v412_v6  ;;  %1204 = vmatprep.subr.mxu0 %v1277_v0 }
  0x1a   : > { %1234 = vmatprep.mubr.msk.f32.mxu0 %vm1278_vm0, %v1277_v0  ;;  %1180 = vmatpush3.msra.mxu1 %v602_v53 }
  0x1b   : > { %1181 = vmatprep.subr.mxu1 %v1277_v0 }
  0x1c   : > { %1182 = vmatpush3.msra.mxu1 %v601_v54 }
  0x1d   : > { %1183 = vmatprep.subr.mxu1 %v1277_v0 }
  0x1e   : > { %1184 = vmatpush3.msra.mxu1 %v600_v55 }
  0x1f   : > { %1185 = vmatprep.subr.mxu1 %v1277_v0 }
  0x20   : > { %1186 = vmatpush3.msra.mxu1 %v599_v56 }
  0x21   : > { %1187 = vmatprep.subr.mxu1 %v1277_v0 }
  0x22   : > { %1188 = vmatpush3.msra.mxu1 %v598_v57 }
  0x23   : > { %1189 = vmatprep.subr.mxu1 %v1277_v0 }
  0x24   : > { %1190 = vmatpush3.msra.mxu1 %v597_v58 }
  0x25   : > { %1191 = vmatprep.subr.mxu1 %v1277_v0 }
  0x26   : > { %1192 = vmatpush3.msra.mxu1 %v596_v59 }
  0x27   : > { %1193 = vmatprep.subr.mxu1 %v1277_v0 }
  0x28   : > { %1194 = vmatpush3.msra.mxu1 %v595_v60 }
  0x29   : > { %1195 = vmatprep.subr.mxu1 %v1277_v0 }
  0x2a   : > { %1196 = vmatpush3.msra.mxu1 %v594_v61 }
  0x2b   : > { %1197 = vmatprep.subr.mxu1 %v1277_v0 }
  0x2c   : > { %1198 = vmatpush3.msra.mxu1 %v593_v62 }
  0x2d   : > { %1199 = vmatprep.subr.mxu1 %v1277_v0 }
  0x2e   : > { %1200 = vmatpush3.msra.mxu1 %v592_v63 }
  0xd9   : > { %v493_v8 = vpop.f32.mrf.mxu0 }
  0xda   : > { %v494_v9 = vadd.f32 %v1103_v7, %v493_v8 }
  0xdb   : > { %v1170_v10 = vpop.f32.mrf.mxu0 }
  0xdc   : > { %v498_v11 = vsel %vm497_vm2, %v494_v9, 0.0 }
  0xdd   : > { %v499_v12 = vrot.slane %v498_v11, 4 }
  0xdf   : > { %v500_v13 = vadd.f32 %v499_v12, %v498_v11 }
  0xe1   : > { %v501_v14 = vrot.slane %v500_v13, 2 }
  0xe3   : > { %v502_v15 = vadd.f32 %v501_v14, %v500_v13 }
  0xe5   : > { %v503_v16 = vrot.slane %v502_v15, 1 }
  0xe7   : > { %v504_v17 = vadd.f32 %v503_v16, %v502_v15  ;;  %v1105_v16 = vld [vmem:[%s1429_s25] ss:$0 sm:$0xff] }
  0xe9   : > { %510 = vrot.lane.b32.xlu0 %v504_v17, %s1279_s17  ;;  %v505_v18 = vsel %vm423_vm1, %v504_v17, 0.0 }
  0xea   : > { %506 = vadd.xlane.f32.xlu1 %v505_v18  ;;  %v1106_v18 = vld [vmem:[%s1437_s30] ss:$0 sm:$0xff] }
  0xed   : > { %517 = vrot.lane.b32.xlu0 %v504_v17, %s1280_s18 }
 0x15b   : > { %v511_v19 = vpop.permute.xlu0 %510 }
 0x15c   : > { %v513_v20 = vsel %vm423_vm1, %v511_v19, 0.0 }
 0x15d   : > { %514 = vadd.xlane.f32.xlu1 %v513_v20  ;;  %v1107_v20 = vld [vmem:[%s1445_s11] ss:$0 sm:$0xff] }
 0x15f   : > { %v518_v21 = vpop.permute.xlu0 %517 }
 0x160   : > { %v520_v22 = vsel %vm423_vm1, %v518_v21, 0.0 }
 0x161   : > { %521 = vadd.xlane.f32.xlu0 %v520_v22 }
 0x173   : > { %v507_v23 = vpop.xlane.xlu1 %506 }
 0x174   : > { %v508_v28 = vmul.f32 0.003125, %v507_v23 }
 0x1e6   : > { %v515_v25 = vpop.xlane.xlu1 %514 }
 0x1e7   : > { %v516_v27 = vmul.f32 0.003125, %v515_v25 }
 0x1e9   : > { %v524_v32 = vsel %vm423_vm1, %v508_v28, %v516_v27 }
 0x1ea   : > { %v522_v30 = vpop.xlane.xlu0 %521 }
 0x1eb   : > { %v523_v31 = vmul.f32 0.003125, %v522_v30 }
 0x1ed   : > { %v526_v33 = vsel %vm525_vm3, %v524_v32, %v523_v31 }
 0x1ee   : > { %v530_v34 = vrot.slane %v526_v33, %v1373_v29 }
 0x1f0   : > { %v1378_v35 = vsub.f32 %v494_v9, %v530_v34 }
 0x1f2   : > { %v532_v36 = vmul.f32 %v1378_v35, %v1378_v35 }
 0x1f4   : > { %v533_v37 = vsel %vm497_vm2, %v532_v36, 0.0 }
 0x1f5   : > { %v534_v38 = vrot.slane %v533_v37, 4 }
 0x1f7   : > { %v535_v39 = vadd.f32 %v534_v38, %v533_v37 }
 0x1f9   : > { %v536_v40 = vrot.slane %v535_v39, 2 }
 0x1fb   : > { %v537_v41 = vadd.f32 %v536_v40, %v535_v39 }
 0x1fd   : > { %v538_v42 = vrot.slane %v537_v41, 1 }
 0x1ff   : > { %v539_v43 = vadd.f32 %v538_v42, %v537_v41 }
 0x201   : > { %547 = vrot.lane.b32.xlu1 %v539_v43, %s1279_s17  ;;  %v540_v44 = vsel %vm423_vm1, %v539_v43, 0.0 }
 0x205   : > { %556 = vrot.lane.b32.xlu1 %v539_v43, %s1280_s18 }
 0x229   : > { %541 = vadd.xlane.f32.xlu1 %v540_v44 }
 0x273   : > { %v548_v45 = vpop.permute.xlu1 %547 }
 0x274   : > { %v550_v46 = vsel %vm423_vm1, %v548_v45, 0.0 }
 0x275   : > { %551 = vadd.xlane.f32.xlu0 %v550_v46 }
 0x277   : > { %v557_v47 = vpop.permute.xlu1 %556 }
 0x278   : > { %v559_v48 = vsel %vm423_vm1, %v557_v47, 0.0 }
 0x279   : > { %560 = vadd.xlane.f32.xlu0 %v559_v48 }
 0x2b2   : > { %v542_v1 = vpop.xlane.xlu1 %541 }
 0x2b3   : > { %v543_v2 = vmul.f32 0.003125, %v542_v1  ;;  %v792_v1 = vld [vmem:[%s1476_s14 + $0x70] sm:$0xff] }
 0x2b4   : > { %1205 = vmatpush3.msra.mxu0 %v792_v1 }
 0x2b5   : > { %v544_v6 = vadd.f32 1e-05, %v543_v2  ;;  %1206 = vmatprep.subr.mxu0 %v1277_v0  ;;  %v791_v2 = vld [vmem:[%s1476_s14 + $0x68] sm:$0xff] }
 0x2b6   : > { %1207 = vmatpush3.msra.mxu0 %v791_v2 }
 0x2b7   : > { %1208 = vmatprep.subr.mxu0 %v1277_v0 }
 0x2fe   : > { %v552_v3 = vpop.xlane.xlu0 %551 }
 0x2ff   : > { %v553_v4 = vmul.f32 0.003125, %v552_v3  ;;  %v790_v3 = vld [vmem:[%s1476_s14 + $0x60] sm:$0xff] }
 0x300   : > { %1209 = vmatpush3.msra.mxu0 %v790_v3 }
 0x301   : > { %v554_v5 = vadd.f32 1e-05, %v553_v4  ;;  %v789_v4 = vld [vmem:[%s1476_s14 + $0x58] sm:$0xff]  ;;  %1210 = vmatprep.subr.mxu0 %v1277_v0 }
 0x302   : > { %v561_v7 = vpop.xlane.xlu0 %560  ;;  %1211 = vmatpush3.msra.mxu0 %v789_v4 }
 0x303   : > { %v562_v8 = vmul.f32 0.003125, %v561_v7  ;;  %1251 = vrsqrt.f32 %v554_v5  ;;  %v788_v5 = vld [vmem:[%s1476_s14 + $0x50] sm:$0xff]  ;;  %1212 = vmatprep.subr.mxu0 %v1277_v0  ;;  %v786_v7 = vld [vmem:[%s1476_s14 + $0x40] sm:$0xff] }
 0x304   : > { %1253 = vrsqrt.f32 %v544_v6  ;;  %v787_v6 = vld [vmem:[%s1476_s14 + $0x48] sm:$0xff]  ;;  %1213 = vmatpush3.msra.mxu0 %v788_v5 }
 0x305   : > { %v563_v9 = vadd.f32 1e-05, %v562_v8  ;;  %1214 = vmatprep.subr.mxu0 %v1277_v0  ;;  %v785_v8 = vld [vmem:[%s1476_s14 + $0x38] sm:$0xff] }
 0x306   : > { %1215 = vmatpush3.msra.mxu0 %v787_v6 }
 0x307   : > { %1255 = vrsqrt.f32 %v563_v9  ;;  %1216 = vmatprep.subr.mxu0 %v1277_v0  ;;  %v784_v9 = vld [vmem:[%s1476_s14 + $0x30] sm:$0xff] }
 0x308   : > { %1217 = vmatpush3.msra.mxu0 %v786_v7 }
 0x309   : > { %1218 = vmatprep.subr.mxu0 %v1277_v0 }
 0x30a   : > { %1219 = vmatpush3.msra.mxu0 %v785_v8 }
 0x30b   : > { %1220 = vmatprep.subr.mxu0 %v1277_v0 }
 0x30c   : > { %1221 = vmatpush3.msra.mxu0 %v784_v9 }
 0x30d   : > { %1222 = vmatprep.subr.mxu0 %v1277_v0 }
 0x310   : > { %v1252_v10 = vpop.eup %1251 }
 0x311   : > { %v1254_v11 = vpop.eup %1253 }
 0x312   : > { %v565_v13 = vsel %vm423_vm1, %v1254_v11, %v1252_v10  ;;  %v783_v10 = vld [vmem:[%s1476_s14 + $0x28] sm:$0xff]  ;;  %v782_v11 = vld [vmem:[%s1476_s14 + $0x20] sm:$0xff] }
 0x313   : > { %1223 = vmatpush3.msra.mxu0 %v783_v10 }
 0x314   : > { %v1256_v12 = vpop.eup %1255  ;;  %1224 = vmatprep.subr.mxu0 %v1277_v0 }
 0x315   : > { %v566_v14 = vsel %vm525_vm3, %v565_v13, %v1256_v12  ;;  %v781_v12 = vld [vmem:[%s1476_s14 + $0x18] sm:$0xff]  ;;  %1225 = vmatpush3.msra.mxu0 %v782_v11  ;;  %v780_v13 = vld [vmem:[%s1476_s14 + $0x10] sm:$0xff] }
 0x316   : > { %v570_v15 = vrot.slane %v566_v14, %v1373_v29  ;;  %1226 = vmatprep.subr.mxu0 %v1277_v0  ;;  %v779_v14 = vld [vmem:[%s1476_s14 + $0x8] sm:$0xff] }
 0x317   : > { %1227 = vmatpush3.msra.mxu0 %v781_v12 }
 0x318   : > { %v571_v17 = vmul.f32 %v570_v15, %v1378_v35  ;;  %1228 = vmatprep.subr.mxu0 %v1277_v0  ;;  %v778_v15 = vld [vmem:[%s1476_s14] sm:$0xff] }
 0x319   : > { %1229 = vmatpush3.msra.mxu0 %v780_v13 }
 0x31a   : > { %v577_v19 = vmul.f32 %v1105_v16, %v571_v17  ;;  %1230 = vmatprep.subr.mxu0 %v1277_v0 }
 0x31b   : > { %1231 = vmatpush3.msra.mxu0 %v779_v14 }
 0x31c   : > { %v583_v21 = vadd.f32 %v1106_v18, %v577_v19  ;;  %1232 = vmatprep.subr.mxu0 %v1277_v0 }
 0x31d   : > { %1233 = vmatpush3.msra.mxu0 %v778_v15 }
 0x31e   : > { %vm584_vm4 = vcmp.ge.f32.partialorder %v583_v21, 0.0  ;;  %v590_v22 = vmul.f32 %v1107_v20, %v583_v21 }
 0x320   : > { %v591_v23 = vsel %vm584_vm4, %v583_v21, %v590_v22 }
 0x321   : > { %1202 = vmatmul.mubr.msk.f32.vlgmr.msra.gmra.mxu1 %vm497_vm2, %v591_v23 }
 0x3e1   : > { %v681_v25 = vpop.f32.mrf.mxu1 }
 0x3e2   : > { %v682_v26 = vadd.f32 %v1108_v24, %v681_v25 }
 0x3e3   : > { %v1203_v27 = vpop.f32.mrf.mxu1 }
 0x3e4   : > { %v685_v28 = vsel %vm497_vm2, %v682_v26, 0.0 }
 0x3e5   : > { %v686_v30 = vrot.slane %v685_v28, 4 }
 0x3e7   : > { %v687_v31 = vadd.f32 %v686_v30, %v685_v28 }
 0x3e9   : > { %v688_v32 = vrot.slane %v687_v31, 2 }
 0x3eb   : > { %v689_v33 = vadd.f32 %v688_v32, %v687_v31  ;;  %v1110_v31 = vld [vmem:[%s1429_s25 + $0x1] ss:$0 sm:$0xff] }
 0x3ed   : > { %v690_v34 = vrot.slane %v689_v33, 1 }
 0x3ef   : > { %v691_v35 = vadd.f32 %v690_v34, %v689_v33  ;;  %v1111_v33 = vld [vmem:[%s1437_s30 + $0x1] ss:$0 sm:$0xff] }
 0x3f1   : > { %704 = vrot.lane.b32.xlu1 %v691_v35, %s1280_s18  ;;  %697 = vrot.lane.b32.xlu0 %v691_v35, %s1279_s17  ;;  %v692_v36 = vsel %vm423_vm1, %v691_v35, 0.0  ;;  %v1112_v35 = vld [vmem:[%s1445_s11 + $0x1] ss:$0 sm:$0xff] }
 0x410   : > { %693 = vadd.xlane.f32.xlu0 %v692_v36 }
 0x463   : > { %v705_v37 = vpop.permute.xlu1 %704  ;;  %v698_v38 = vpop.permute.xlu0 %697 }
 0x464   : > { %v700_v39 = vsel %vm423_vm1, %v698_v38, 0.0  ;;  %v707_v40 = vsel %vm423_vm1, %v705_v37, 0.0 }
 0x465   : > { %701 = vadd.xlane.f32.xlu1 %v700_v39  ;;  %708 = vadd.xlane.f32.xlu0 %v707_v40  ;;  %v1113_v39 = vld [vmem:[%s1364_s16 + $0x2] ss:$0 sm:$0xff] }
 0x499   : > { %v694_v41 = vpop.xlane.xlu0 %693 }
 0x49a   : > { %v695_v44 = vmul.f32 0.003125, %v694_v41 }
 0x4ee   : > { %v702_v42 = vpop.xlane.xlu1 %701  ;;  %v709_v43 = vpop.xlane.xlu0 %708 }
 0x4ef   : > { %v703_v45 = vmul.f32 0.003125, %v702_v42  ;;  %v710_v46 = vmul.f32 0.003125, %v709_v43 }
 0x4f1   : > { %v711_v47 = vsel %vm423_vm1, %v695_v44, %v703_v45 }
 0x4f2   : > { %v712_v48 = vsel %vm525_vm3, %v711_v47, %v710_v46 }
 0x4f3   : > { %v716_v49 = vrot.slane %v712_v48, %v1373_v29 }
 0x4f5   : > { %v1461_v50 = vsub.f32 %v682_v26, %v716_v49 }
 0x4f7   : > { %v718_v51 = vmul.f32 %v1461_v50, %v1461_v50 }
 0x4f9   : > { %v719_v52 = vsel %vm497_vm2, %v718_v51, 0.0 }
 0x4fa   : > { %v720_v53 = vrot.slane %v719_v52, 4 }
 0x4fc   : > { %v721_v54 = vadd.f32 %v720_v53, %v719_v52 }
 0x4fe   : > { %v722_v55 = vrot.slane %v721_v54, 2 }
 0x500   : > { %v723_v56 = vadd.f32 %v722_v55, %v721_v54 }
 0x502   : > { %v724_v57 = vrot.slane %v723_v56, 1 }
 0x504   : > { %v725_v58 = vadd.f32 %v724_v57, %v723_v56 }
 0x506   : > { %742 = vrot.lane.b32.xlu1 %v725_v58, %s1280_s18  ;;  %733 = vrot.lane.b32.xlu0 %v725_v58, %s1279_s17  ;;  %v726_v59 = vsel %vm423_vm1, %v725_v58, 0.0 }
 0x525   : > { %727 = vadd.xlane.f32.xlu0 %v726_v59 }
 0x578   : > { %v743_v60 = vpop.permute.xlu1 %742  ;;  %v734_v61 = vpop.permute.xlu0 %733 }
 0x579   : > { %v736_v62 = vsel %vm423_vm1, %v734_v61, 0.0  ;;  %v745_v63 = vsel %vm423_vm1, %v743_v60, 0.0 }
 0x57a   : > { %737 = vadd.xlane.f32.xlu1 %v736_v62  ;;  %746 = vadd.xlane.f32.xlu0 %v745_v63 }
 0x5ae   : > { %v728_v16 = vpop.xlane.xlu0 %727 }
 0x5af   : > { %v729_v17 = vmul.f32 0.003125, %v728_v16 }
 0x5b1   : > { %v730_v18 = vadd.f32 1e-05, %v729_v17 }
 0x5b3   : > { %1257 = vrsqrt.f32 %v730_v18 }
 0x5c0   : > { %v1258_v25 = vpop.eup %1257 }
 0x603   : > { %v738_v19 = vpop.xlane.xlu1 %737  ;;  %v747_v20 = vpop.xlane.xlu0 %746 }
 0x604   : > { %v739_v21 = vmul.f32 0.003125, %v738_v19  ;;  %v748_v22 = vmul.f32 0.003125, %v747_v20 }
 0x606   : > { %v740_v23 = vadd.f32 1e-05, %v739_v21  ;;  %v749_v24 = vadd.f32 1e-05, %v748_v22 }
 0x608   : > { %1259 = vrsqrt.f32 %v740_v23 }
 0x609   : > { %1261 = vrsqrt.f32 %v749_v24 }
 0x615   : > { %v1260_v26 = vpop.eup %1259 }
 0x616   : > { %v1262_v0 = vpop.eup %1261  ;;  %v751_v27 = vsel %vm423_vm1, %v1258_v25, %v1260_v26 }
 0x617   : > { %v752_v28 = vsel %vm525_vm3, %v751_v27, %v1262_v0 }
 0x618   : > { %v756_v30 = vrot.slane %v752_v28, %v1373_v29 }
 0x61a   : > { %v757_v32 = vmul.f32 %v756_v30, %v1461_v50  ;;  %v1115_v30 = vld [vmem:[%s1429_s25 + $0x2] ss:$0 sm:$0xff] }
 0x61c   : > { %v763_v34 = vmul.f32 %v1110_v31, %v757_v32  ;;  %v1116_v32 = vld [vmem:[%s1437_s30 + $0x2] ss:$0 sm:$0xff] }
 0x61e   : > { %v769_v36 = vadd.f32 %v1111_v33, %v763_v34  ;;  %v1117_v34 = vld [vmem:[%s1445_s11 + $0x2] ss:$0 sm:$0xff] }
 0x620   : > { %vm770_vm5 = vcmp.ge.f32.partialorder %v769_v36, 0.0  ;;  %v776_v37 = vmul.f32 %v1112_v35, %v769_v36 }
 0x622   : > { %v777_v38 = vsel %vm770_vm5, %v769_v36, %v776_v37 }
 0x623   : > { %1235 = vmatmul.mubr.msk.f32.vlgmr.msra.gmra.mxu0 %vm497_vm2, %v777_v38 }
 0x6e3   : > { %v867_v40 = vpop.f32.mrf.mxu0 }
 0x6e4   : > { %v868_v41 = vadd.f32 %v1113_v39, %v867_v40 }
 0x6e5   : > { %v1236_v42 = vpop.f32.mrf.mxu0 }
 0x6e6   : > { %v871_v43 = vsel %vm497_vm2, %v868_v41, 0.0 }
 0x6e7   : > { %v872_v44 = vrot.slane %v871_v43, 4 }
 0x6e9   : > { %v873_v45 = vadd.f32 %v872_v44, %v871_v43 }
 0x6eb   : > { %v874_v46 = vrot.slane %v873_v45, 2 }
 0x6ed   : > { %v875_v47 = vadd.f32 %v874_v46, %v873_v45 }
 0x6ef   : > { %v876_v48 = vrot.slane %v875_v47, 1 }
 0x6f1   : > { %v877_v49 = vadd.f32 %v876_v48, %v875_v47 }
 0x6f3   : > { %890 = vrot.lane.b32.xlu1 %v877_v49, %s1280_s18  ;;  %883 = vrot.lane.b32.xlu0 %v877_v49, %s1279_s17  ;;  %v878_v50 = vsel %vm423_vm1, %v877_v49, 0.0 }
 0x712   : > { %879 = vadd.xlane.f32.xlu0 %v878_v50 }
 0x765   : > { %v891_v51 = vpop.permute.xlu1 %890  ;;  %v884_v52 = vpop.permute.xlu0 %883 }
 0x766   : > { %v886_v53 = vsel %vm423_vm1, %v884_v52, 0.0  ;;  %v893_v54 = vsel %vm423_vm1, %v891_v51, 0.0 }
 0x767   : > { %887 = vadd.xlane.f32.xlu1 %v886_v53  ;;  %894 = vadd.xlane.f32.xlu0 %v893_v54 }
 0x79b   : > { %v880_v55 = vpop.xlane.xlu0 %879 }
 0x79c   : > { %v881_v58 = vmul.f32 0.003125, %v880_v55 }
 0x7f0   : > { %v888_v56 = vpop.xlane.xlu1 %887  ;;  %v895_v57 = vpop.xlane.xlu0 %894 }
 0x7f1   : > { %v889_v59 = vmul.f32 0.003125, %v888_v56  ;;  %v896_v60 = vmul.f32 0.003125, %v895_v57 }
 0x7f3   : > { %v897_v61 = vsel %vm423_vm1, %v881_v58, %v889_v59 }
 0x7f4   : > { %v898_v62 = vsel %vm525_vm3, %v897_v61, %v896_v60 }
 0x7f5   : > { %v902_v63 = vrot.slane %v898_v62, %v1373_v29 }
 0x7f7   : > { %v903_v1 = vsub.f32 %v868_v41, %v902_v63 }
 0x7f9   : > { %v904_v2 = vmul.f32 %v903_v1, %v903_v1 }
 0x7fb   : > { %v905_v3 = vsel %vm497_vm2, %v904_v2, 0.0 }
 0x7fc   : > { %v906_v4 = vrot.slane %v905_v3, 4 }
 0x7fe   : > { %v907_v5 = vadd.f32 %v906_v4, %v905_v3 }
 0x800   : > { %v908_v6 = vrot.slane %v907_v5, 2 }
 0x802   : > { %v909_v7 = vadd.f32 %v908_v6, %v907_v5 }
 0x804   : > { %v910_v8 = vrot.slane %v909_v7, 1 }
 0x806   : > { %v911_v9 = vadd.f32 %v910_v8, %v909_v7 }
 0x808   : > { %919 = vrot.lane.b32.xlu0 %v911_v9, %s1279_s17  ;;  %v912_v10 = vsel %vm423_vm1, %v911_v9, 0.0 }
 0x827   : > { %913 = vadd.xlane.f32.xlu0 %v912_v10 }
 0x87a   : > { %v920_v11 = vpop.permute.xlu0 %919 }
 0x87b   : > { %v922_v12 = vsel %vm423_vm1, %v920_v11, 0.0 }
 0x87c   : > { %923 = vadd.xlane.f32.xlu1 %v922_v12 }
 0x88d   : > { %928 = vrot.lane.b32.xlu1 %v911_v9, %s1280_s18  ;;  %s411_s18 = scalar_lea.vmem %s1553_s8, %s1102_s15 }
 0x8b0   : > { %v914_v16 = vpop.xlane.xlu0 %913 }
 0x8b1   : > { %v915_v18 = vmul.f32 0.003125, %v914_v16 }
 0x8b3   : > { %v916_v20 = vadd.f32 1e-05, %v915_v18 }
 0x905   : > { %v924_v13 = vpop.xlane.xlu1 %923 }
 0x906   : > { %v925_v17 = vmul.f32 0.003125, %v924_v13 }
 0x908   : > { %v926_v19 = vadd.f32 1e-05, %v925_v17 }
 0x909   : > { %v929_v14 = vpop.permute.xlu1 %928 }
 0x90a   : > { %v931_v15 = vsel %vm423_vm1, %v929_v14, 0.0  ;;  %1263 = vrsqrt.f32 %v926_v19 }
 0x90b   : > { %932 = vadd.xlane.f32.xlu0 %v931_v15  ;;  %1265 = vrsqrt.f32 %v916_v20 }
 0x917   : > { %v1264_v24 = vpop.eup %1263 }
 0x918   : > { %v1266_v25 = vpop.eup %1265 }
 0x919   : > { %v937_v0 = vsel %vm423_vm1, %v1266_v25, %v1264_v24 }
 0x994   : > { %v933_v21 = vpop.xlane.xlu0 %932 }
 0x995   : > { %v934_v22 = vmul.f32 0.003125, %v933_v21 }
 0x997   : > { %v935_v23 = vadd.f32 1e-05, %v934_v22 }
 0x999   : > { %1267 = vrsqrt.f32 %v935_v23 }
 0x9a6   : > { %v1268_v26 = vpop.eup %1267 }
 0x9a7   : > { %v938_v27 = vsel %vm525_vm3, %v937_v0, %v1268_v26 }
 0x9a8   : > { %v942_v28 = vrot.slane %v938_v27, %v1373_v29 }
 0x9aa   : > { %v943_v31 = vmul.f32 %v942_v28, %v903_v1 }
 0x9ac   : > { %v949_v33 = vmul.f32 %v1115_v30, %v943_v31 }
 0x9ae   : > { %v955_v35 = vadd.f32 %v1116_v32, %v949_v33 }
 0x9b0   : > { %vm956_vm6 = vcmp.ge.f32.partialorder %v955_v35, 0.0  ;;  %v962_v36 = vmul.f32 %v1117_v34, %v955_v35 }
 0x9b2   : > { %v963_v37 = vsel %vm956_vm6, %v955_v35, %v962_v36 }
 0x9b3   : > { %964 = vst.msk [vmem:[%s411_s18] sm:$0xff] %vm497_vm2, %v963_v37 }
 0x9b4 PF: > { %s18_s27 = sadd.s32 1, %s1275_s27  }
 0x9b5   : > { %p15_p4 = scmp.ge.s32.totalorder %s18_s27, 5  }
 0x9b7   :  { %17 = sbr.rel (!%p15_p4) target bundleno = 1 (0x1), region = 100 }

// kernel: eeg_gat_forward.3
= control target key start
LH: loop header
LB: loop body
LE: loop exit
PB: predicated region body
PF: predicated region fallthrough
CT: control target
= control target key end

     0   :  { %s5048_s0 = inlined_call_operand.vmem [shape: f32[3,8,120], index: 0, kind: input, shape index: {}]   ;;  %s5049_s1 = inlined_call_operand.vmem [shape: f32[3,120,8], index: 1, kind: input, shape index: {}]   ;;  %s5050_s2 = inlined_call_operand.vmem [shape: f32[4], index: 2, kind: input, shape index: {}]   ;;  %s5051_s3 = inlined_call_operand.vmem [shape: f32[8,8], index: 3, kind: input, shape index: {}]   ;;  %s5052_s4 = inlined_call_operand.vmem [shape: f32[8,8], index: 4, kind: input, shape index: {}]   ;;  %s5053_s5 = inlined_call_operand.vmem [shape: f32[8,32], index: 5, kind: input, shape index: {}]   ;;  %s5054_s6 = inlined_call_operand.vmem [shape: f32[3,32,32], index: 6, kind: input, shape index: {}]   ;;  %s5055_s7 = inlined_call_operand.vmem [shape: f32[4,4,8], index: 7, kind: input, shape index: {}]   ;;  %s5056_s8 = inlined_call_operand.vmem [shape: f32[4,4,8], index: 8, kind: input, shape index: {}]   ;;  %s5057_s9 = inlined_call_operand.vmem [shape: f32[4,32], index: 9, kind: input, shape index: {}]   ;;  %s5058_s10 = inlined_call_operand.vmem [shape: f32[4,32], index: 10, kind: input, shape index: {}]   ;;  %s5059_s11 = inlined_call_operand.vmem [shape: f32[4,32], index: 11, kind: input, shape index: {}]   ;;  %s5060_s12 = inlined_call_operand.vmem [shape: f32[4,32], index: 12, kind: input, shape index: {}]   ;;  %s5061_s13 = inlined_call_operand.vmem [shape: f32[4], index: 13, kind: input, shape index: {}]   ;;  %s5062_s14 = inlined_call_operand.vmem [shape: f32[2,8], index: 14, kind: input, shape index: {}]   ;;  %s5063_s15 = inlined_call_operand.vmem [shape: f32[2,1], index: 15, kind: input, shape index: {}]   ;;  %s5064_s16 = inlined_call_operand.vmem [shape: f32[32,16], index: 16, kind: input, shape index: {}]   ;;  %s5065_s17 = inlined_call_operand.vmem [shape: f32[1,16], index: 17, kind: input, shape index: {}]   ;;  %s5066_s18 = inlined_call_operand.vmem [shape: f32[16,8], index: 18, kind: input, shape index: {}]   ;;  %s5067_s19 = inlined_call_operand.vmem [shape: f32[1,8], index: 19, kind: input, shape index: {}]   ;;  %s5068_s20 = inlined_call_operand.vmem [shape: f32[8,3], index: 20, kind: input, shape index: {}]   ;;  %s5069_s21 = inlined_call_operand.vmem [shape: f32[1,3], index: 21, kind: input, shape index: {}]   ;;  %s5070_s22 = inlined_call_operand.hbm [shape: f32[2,3], index: 22, kind: output, shape index: {}]  }
   0x1   :  { %5075 = sst [smem:[#allocation11_spill]] %s5048_s0 }
   0x2   :  { %5076 = sst [smem:[#allocation12_spill]] %s5049_s1 }
   0x3   :  { %5077 = sst [smem:[#allocation13_spill]] %s5050_s2 }
   0x4   :  { %5078 = sst [smem:[#allocation14_spill]] %s5051_s3 }
   0x5   :  { %5079 = sst [smem:[#allocation15_spill]] %s5052_s4 }
   0x6   :  { %5080 = sst [smem:[#allocation16_spill]] %s5053_s5 }
   0x7   :  { %5081 = sst [smem:[#allocation17_spill]] %s5054_s6 }
   0x8   :  { %27 = vsyncpa [#allocation4], 0 }
   0x9   :  { %28 = vsyncpa [#allocation6], 0 }
   0xa   :  { %29 = vsyncpa [#allocation3], 0  ;;  %s5082_s29 = sld [smem:[#allocation13_spill]]  ;;  %s70_s23 = sshll.u32 %s5061_s13, 4  ;;  %s71_s23 = int_to_ptr.vmem [resolvable:$true] %s70_s23 }
  0x10   :  { %s40_s30 = sshll.u32 %s5082_s29, 4  ;;  %s41_s30 = int_to_ptr.vmem [resolvable:$true] %s40_s30 }
  0x11   :  { %s4033_s1 = scalar_lea.vmem %s41_s30, 16  ;;  %p4038_p1 = scmp.lt.s32.totalorder %s41_s30, %s41_s30 }
  0x12   :  { %p4034_p0 = scmp.ne.s32.totalorder %s41_s30, %s4033_s1  ;;  %p4039_p2 = scmp.lt.s32.totalorder %s4033_s1, %s4033_s1 }
  0x14   :  { %p4040_p3 = por %p4039_p2, %p4038_p1 }
  0x16   :  { %p4041_p4 = pnand %p4040_p3, %p4034_p0 }
  0x18   :  { %4044 = shalt.err (!%p4041_p4)
}
  0x19   :  { %s4083_s5 = smov [#allocation2]   ;;  %s4045_s24 = scalar_lea.vmem %s71_s23, 16 }
  0x1a   :  { %43 = dma.vmem_to_smem %s41_s30, 16, %s4083_s5, [#allocation4]  }
  0x1b   :  { %p4046_p5 = scmp.ne.s32.totalorder %s71_s23, %s4045_s24  ;;  %p4050_p6 = scmp.lt.s32.totalorder %s71_s23, %s71_s23 }
  0x1c   :  { %p4051_p7 = scmp.lt.s32.totalorder %s4045_s24, %s4045_s24 }
  0x1e   :  { %p4052_p8 = por %p4051_p7, %p4050_p6 }
  0x20   :  { %p4053_p9 = pnand %p4052_p8, %p4046_p5 }
  0x22   :  { %4056 = shalt.err (!%p4053_p9)
}
  0x23   :  { %s4084_s6 = smov [#allocation5]  }
  0x24   :  { %73 = dma.vmem_to_smem %s71_s23, 16, %s4084_s6, [#allocation6]  }
  0x25   :  { %4077 = dma.done.wait [#allocation4], 16  }
  0x26   :  { %4078 = vsyncadd [#allocation4], 4294967280 }
  0x27   :  { %4079 = dma.done.wait [#allocation6], 16  }
  0x28   :  { %4080 = vsyncadd [#allocation6], 4294967280 }
  0x29   :  { %96 = sfence }
  0x2a   :  { %s5083_s26 = sld [smem:[#allocation12_spill]]  ;;  %v4085_v2 = vmov 0.0   ;;  %vm131_vm0 = vcmask 982016   ;;  %vm4086_vm1 = vmmov 0   ;;  %vm373_vm2 = vcmask 64512   ;;  %s4087_s24 = smov 8  }
  0x2b   :  { %3689 = vmatprep.subr.mxu0 %v4085_v2  ;;  %3722 = vmatprep.subr.mxu1 %v4085_v2  ;;  %s5084_s13 = sld [smem:[#allocation11_spill]]  ;;  %s4088_s3 = smov 24   ;;  %vm1018_vm9 = vcmask 130048   ;;  %vm1020_vm10 = vcmask 195584   ;;  %vm1028_vm11 = vcmask 261120  }
  0x2c   :  { %3719 = vmatprep.mubr.msk.f32.mxu0 %vm4086_vm1, %v4085_v2  ;;  %3752 = vmatprep.mubr.msk.f32.mxu1 %vm4086_vm1, %v4085_v2  ;;  %s5085_s23 = sld [smem:[#allocation16_spill]]  ;;  %s4089_s28 = smov 16  }
  0x2d   :  { %s3469_s1 = sld [smem:[#allocation2 + $0x2]]  ;;  %s4090_s6 = smov 120  }
  0x2e   :  { %s3470_s5 = sld [smem:[#allocation2 + $0x3]]  ;;  %s4091_s25 = smov 112  }
  0x2f   :  { %s4092_s2 = smov 104   ;;  %s5086_s0 = sld [smem:[#allocation15_spill]] }
  0x30   :  { %v3448_v0 = vld [vmem:[%s5083_s26 + $0xe8] sm:$0xff]  ;;  %v112_v1 = vld [vmem:[%s5083_s26 + $0x70] sm:$0xff]  ;;  %v3447_v3 = vld [vmem:[%s5083_s26 + $0xe0] sm:$0xff]  ;;  %s5088_s30 = sld [smem:[#allocation17_spill]] }
  0x31   :  { %v111_v4 = vld [vmem:[%s5083_s26 + $0x68] sm:$0xff]  ;;  %3690 = vmatpush3.msra.mxu0 %v3448_v0  ;;  %3723 = vmatpush3.msra.mxu1 %v112_v1  ;;  %v3446_v5 = vld [vmem:[%s5083_s26 + $0xd8] sm:$0xff]  ;;  %v110_v6 = vld [vmem:[%s5083_s26 + $0x60] sm:$0xff]  ;;  %s1069_s27 = sld [smem:[#allocation5]] }
  0x32   :  { %3691 = vmatprep.subr.mxu0 %v4085_v2  ;;  %3724 = vmatprep.subr.mxu1 %v4085_v2  ;;  %v3445_v7 = vld [vmem:[%s5083_s26 + $0xd0] sm:$0xff]  ;;  %v109_v8 = vld [vmem:[%s5083_s26 + $0x58] sm:$0xff]  ;;  %v3444_v9 = vld [vmem:[%s5083_s26 + $0xc8] sm:$0xff]  ;;  %s3511_s29 = sld [smem:[#allocation5 + $0x1]] }
  0x33   :  { %3692 = vmatpush3.msra.mxu0 %v3447_v3  ;;  %3725 = vmatpush3.msra.mxu1 %v111_v4  ;;  %v108_v10 = vld [vmem:[%s5083_s26 + $0x50] sm:$0xff]  ;;  %v3443_v11 = vld [vmem:[%s5083_s26 + $0xc0] sm:$0xff]  ;;  %v107_v12 = vld [vmem:[%s5083_s26 + $0x48] sm:$0xff] }
  0x34   :  { %3693 = vmatprep.subr.mxu0 %v4085_v2  ;;  %3726 = vmatprep.subr.mxu1 %v4085_v2  ;;  %v3442_v13 = vld [vmem:[%s5083_s26 + $0xb8] sm:$0xff]  ;;  %v106_v14 = vld [vmem:[%s5083_s26 + $0x40] sm:$0xff]  ;;  %v3441_v15 = vld [vmem:[%s5083_s26 + $0xb0] sm:$0xff] }
  0x35   :  { %3694 = vmatpush3.msra.mxu0 %v3446_v5  ;;  %3727 = vmatpush3.msra.mxu1 %v110_v6  ;;  %v105_v16 = vld [vmem:[%s5083_s26 + $0x38] sm:$0xff]  ;;  %v3440_v17 = vld [vmem:[%s5083_s26 + $0xa8] sm:$0xff]  ;;  %v104_v18 = vld [vmem:[%s5083_s26 + $0x30] sm:$0xff] }
  0x36   :  { %3695 = vmatprep.subr.mxu0 %v4085_v2  ;;  %3728 = vmatprep.subr.mxu1 %v4085_v2  ;;  %v3439_v19 = vld [vmem:[%s5083_s26 + $0xa0] sm:$0xff]  ;;  %v103_v20 = vld [vmem:[%s5083_s26 + $0x28] sm:$0xff]  ;;  %v3438_v21 = vld [vmem:[%s5083_s26 + $0x98] sm:$0xff] }
  0x37   :  { %3696 = vmatpush3.msra.mxu0 %v3445_v7  ;;  %3729 = vmatpush3.msra.mxu1 %v109_v8  ;;  %v102_v22 = vld [vmem:[%s5083_s26 + $0x20] sm:$0xff]  ;;  %v3437_v23 = vld [vmem:[%s5083_s26 + $0x90] sm:$0xff]  ;;  %v101_v24 = vld [vmem:[%s5083_s26 + $0x18] sm:$0xff] }
  0x38   :  { %3697 = vmatprep.subr.mxu0 %v4085_v2  ;;  %3730 = vmatprep.subr.mxu1 %v4085_v2  ;;  %v3436_v25 = vld [vmem:[%s5083_s26 + $0x88] sm:$0xff]  ;;  %v100_v26 = vld [vmem:[%s5083_s26 + $0x10] sm:$0xff]  ;;  %v3435_v27 = vld [vmem:[%s5083_s26 + $0x80] sm:$0xff] }
  0x39   :  { %3698 = vmatpush3.msra.mxu0 %v3444_v9  ;;  %3731 = vmatpush3.msra.mxu1 %v108_v10  ;;  %v99_v28 = vld [vmem:[%s5083_s26 + $0x8] sm:$0xff]  ;;  %v3434_v29 = vld [vmem:[%s5083_s26 + $0x78] sm:$0xff]  ;;  %v98_v31 = vld [vmem:[%s5083_s26] sm:$0xff] }
  0x3a   :  { %3699 = vmatprep.subr.mxu0 %v4085_v2  ;;  %3732 = vmatprep.subr.mxu1 %v4085_v2  ;;  %v3433_v30 = vld [vmem:[%s5084_s13 + $0x8] sm:$0xff]  ;;  %v97_v32 = vld [vmem:[%s5084_s13] sm:$0xff]  ;;  %v3465_v34 = vld [vmem:[%s5083_s26 + $0x158] sm:$0xff] }
  0x3b   :  { %3700 = vmatpush3.msra.mxu0 %v3443_v11  ;;  %3733 = vmatpush3.msra.mxu1 %v107_v12  ;;  %v3466_v33 = vld [vmem:[%s5083_s26 + $0x160] sm:$0xff]  ;;  %v3464_v35 = vld [vmem:[%s5083_s26 + $0x150] sm:$0xff]  ;;  %v3463_v36 = vld [vmem:[%s5083_s26 + $0x148] sm:$0xff] }
  0x3c   :  { %3701 = vmatprep.subr.mxu0 %v4085_v2  ;;  %3734 = vmatprep.subr.mxu1 %v4085_v2  ;;  %v3462_v37 = vld [vmem:[%s5083_s26 + $0x140] sm:$0xff]  ;;  %v3461_v38 = vld [vmem:[%s5083_s26 + $0x138] sm:$0xff]  ;;  %v3460_v39 = vld [vmem:[%s5083_s26 + $0x130] sm:$0xff] }
  0x3d   :  { %3702 = vmatpush3.msra.mxu0 %v3442_v13  ;;  %3735 = vmatpush3.msra.mxu1 %v106_v14  ;;  %v3459_v40 = vld [vmem:[%s5083_s26 + $0x128] sm:$0xff]  ;;  %v3458_v41 = vld [vmem:[%s5083_s26 + $0x120] sm:$0xff]  ;;  %v3457_v42 = vld [vmem:[%s5083_s26 + $0x118] sm:$0xff] }
  0x3e   :  { %3703 = vmatprep.subr.mxu0 %v4085_v2  ;;  %3736 = vmatprep.subr.mxu1 %v4085_v2  ;;  %v3456_v43 = vld [vmem:[%s5083_s26 + $0x110] sm:$0xff]  ;;  %v3455_v44 = vld [vmem:[%s5083_s26 + $0x108] sm:$0xff]  ;;  %v3454_v45 = vld [vmem:[%s5083_s26 + $0x100] sm:$0xff] }
  0x3f   :  { %3704 = vmatpush3.msra.mxu0 %v3441_v15  ;;  %3737 = vmatpush3.msra.mxu1 %v105_v16  ;;  %v3453_v46 = vld [vmem:[%s5083_s26 + $0xf8] sm:$0xff]  ;;  %v3452_v47 = vld [vmem:[%s5083_s26 + $0xf0] sm:$0xff]  ;;  %s370_s26 = sld [smem:[#allocation2]]  ;;  %v412_v8 = vld [vmem:[%s5085_s23] sm:$0xff] }
  0x40   :  { %3705 = vmatprep.subr.mxu0 %v4085_v2  ;;  %3738 = vmatprep.subr.mxu1 %v4085_v2  ;;  %v3451_v48 = vld [vmem:[%s5084_s13 + $0x10] sm:$0xff]  ;;  %v3476_v9 = vld [vmem:[%s5055_s7 + $0x1] ss:$0 sm:$0xff]  ;;  %v3479_v10 = vld [vmem:[%s5055_s7 + $0x2] ss:$0 sm:$0xff]  ;;  %s3468_s23 = sld [smem:[#allocation2 + $0x1]] }
  0x41   :  { %3706 = vmatpush3.msra.mxu0 %v3440_v17  ;;  %3739 = vmatpush3.msra.mxu1 %v104_v18  ;;  %v3482_v11 = vld [vmem:[%s5055_s7 + $0x3] ss:$0 sm:$0xff]  ;;  %v3475_v12 = vld [vmem:[%s5056_s8 + $0x1] ss:$0 sm:$0xff]  ;;  %v3478_v13 = vld [vmem:[%s5056_s8 + $0x2] ss:$0 sm:$0xff] }
  0x42   :  { %3707 = vmatprep.subr.mxu0 %v4085_v2  ;;  %3740 = vmatprep.subr.mxu1 %v4085_v2  ;;  %v3481_v14 = vld [vmem:[%s5056_s8 + $0x3] ss:$0 sm:$0xff] }
  0x43   :  { %3708 = vmatpush3.msra.mxu0 %v3439_v19  ;;  %3741 = vmatpush3.msra.mxu1 %v103_v20 }
  0x44   :  { %3709 = vmatprep.subr.mxu0 %v4085_v2  ;;  %3742 = vmatprep.subr.mxu1 %v4085_v2 }
  0x45   :  { %3710 = vmatpush3.msra.mxu0 %v3438_v21  ;;  %3743 = vmatpush3.msra.mxu1 %v102_v22  ;;  %v371_v55 = vstv %s370_s26 }
  0x46   :  { %3711 = vmatprep.subr.mxu0 %v4085_v2  ;;  %3744 = vmatprep.subr.mxu1 %v4085_v2 }
  0x47   :  { %3712 = vmatpush3.msra.mxu0 %v3437_v23  ;;  %3745 = vmatpush3.msra.mxu1 %v101_v24 }
  0x48   :  { %3713 = vmatprep.subr.mxu0 %v4085_v2  ;;  %3746 = vmatprep.subr.mxu1 %v4085_v2 }
  0x49   :  { %3714 = vmatpush3.msra.mxu0 %v3436_v25  ;;  %3747 = vmatpush3.msra.mxu1 %v100_v26  ;;  %v400_v25 = vstv %s3468_s23 }
  0x4a   :  { %3715 = vmatprep.subr.mxu0 %v4085_v2  ;;  %3748 = vmatprep.subr.mxu1 %v4085_v2 }
  0x4b   :  { %3716 = vmatpush3.msra.mxu0 %v3435_v27  ;;  %3749 = vmatpush3.msra.mxu1 %v99_v28  ;;  %v403_v27 = vstv %s3469_s1 }
  0x4c   :  { %3717 = vmatprep.subr.mxu0 %v4085_v2  ;;  %3750 = vmatprep.subr.mxu1 %v4085_v2 }
  0x4d   :  { %3718 = vmatpush3.msra.mxu0 %v3434_v29  ;;  %3751 = vmatpush3.msra.mxu1 %v98_v31  ;;  %v407_v29 = vstv %s3470_s5  ;;  %s5087_s5 = sld [smem:[#allocation14_spill]] }
  0x4e   :  { %3720 = vmatmul.mubr.msk.f32.vlgmr.msra.gmra.mxu0 %vm131_vm0, %v3433_v30  ;;  %3755 = vmatprep.subr.mxu0 %v4085_v2 }
  0x4f   :  { %3753 = vmatmul.mubr.msk.f32.vlgmr.msra.gmra.mxu1 %vm131_vm0, %v97_v32  ;;  %3756 = vmatpush3.msra.mxu0 %v3466_v33 }
  0x50   :  { %3757 = vmatprep.subr.mxu0 %v4085_v2  ;;  %3785 = vmatprep.mubr.msk.f32.mxu0 %vm4086_vm1, %v4085_v2 }
  0x51   :  { %3758 = vmatpush3.msra.mxu0 %v3465_v34  ;;  %3788 = vmatprep.subr.mxu1 %v4085_v2 }
  0x52   :  { %3759 = vmatprep.subr.mxu0 %v4085_v2  ;;  %3790 = vmatprep.mubr.msk.f32.mxu1 %vm4086_vm1, %v4085_v2 }
  0x53   :  { %3760 = vmatpush3.msra.mxu0 %v3464_v35  ;;  %3789 = vmatpush3.msra.mxu1 %v412_v8 }
  0x54   :  { %3761 = vmatprep.subr.mxu0 %v4085_v2  ;;  %3793 = vmatprep.subr.mxu1 %v4085_v2 }
  0x55   :  { %3762 = vmatpush3.msra.mxu0 %v3463_v36  ;;  %625 = vrot.lane.b32.xlu1 %v3476_v9, %s4087_s24 }
  0x56   :  { %3763 = vmatprep.subr.mxu0 %v4085_v2 }
  0x57   :  { %3764 = vmatpush3.msra.mxu0 %v3462_v37 }
  0x58   :  { %3765 = vmatprep.subr.mxu0 %v4085_v2 }
  0x59   :  { %3766 = vmatpush3.msra.mxu0 %v3461_v38  ;;  %760 = vrot.lane.b32.xlu1 %v3479_v10, %s4089_s28 }
  0x5a   :  { %3767 = vmatprep.subr.mxu0 %v4085_v2 }
  0x5b   :  { %3768 = vmatpush3.msra.mxu0 %v3460_v39 }
  0x5c   :  { %3769 = vmatprep.subr.mxu0 %v4085_v2 }
  0x5d   :  { %3770 = vmatpush3.msra.mxu0 %v3459_v40  ;;  %608 = vrot.lane.b32.xlu1 %v3475_v12, %s4087_s24 }
  0x5e   :  { %3771 = vmatprep.subr.mxu0 %v4085_v2 }
  0x5f   :  { %3772 = vmatpush3.msra.mxu0 %v3458_v41 }
  0x60   :  { %3773 = vmatprep.subr.mxu0 %v4085_v2 }
  0x61   :  { %3774 = vmatpush3.msra.mxu0 %v3457_v42  ;;  %743 = vrot.lane.b32.xlu1 %v3478_v13, %s4089_s28 }
  0x62   :  { %3775 = vmatprep.subr.mxu0 %v4085_v2 }
  0x63   :  { %3776 = vmatpush3.msra.mxu0 %v3456_v43 }
  0x64   :  { %3777 = vmatprep.subr.mxu0 %v4085_v2 }
  0x65   :  { %3778 = vmatpush3.msra.mxu0 %v3455_v44  ;;  %877 = vrot.lane.b32.xlu1 %v3481_v14, %s4088_s3 }
  0x66   :  { %3779 = vmatprep.subr.mxu0 %v4085_v2 }
  0x67   :  { %3780 = vmatpush3.msra.mxu0 %v3454_v45 }
  0x68   :  { %3781 = vmatprep.subr.mxu0 %v4085_v2 }
  0x69   :  { %3782 = vmatpush3.msra.mxu0 %v3453_v46 }
  0x6a   :  { %3783 = vmatprep.subr.mxu0 %v4085_v2 }
  0x6b   :  { %3784 = vmatpush3.msra.mxu0 %v3452_v47  ;;  %v3473_v47 = vld [vmem:[%s5055_s7] ss:$0 sm:$0xff] }
  0x6c   :  { %3786 = vmatmul.mubr.msk.f32.vlgmr.msra.gmra.mxu0 %vm131_vm0, %v3451_v48  ;;  %3829 = vmatprep.subr.mxu0 %v4085_v2 }
  0x6d   :  { %3831 = vmatprep.mubr.msk.f32.mxu0 %vm4086_vm1, %v4085_v2 }
  0xc7   :  { %v626_v33 = vpop.permute.xlu1 %625 }
  0xcb   :  { %v761_v34 = vpop.permute.xlu1 %760 }
  0xcf   :  { %v609_v35 = vpop.permute.xlu1 %608 }
  0xd3   :  { %v744_v36 = vpop.permute.xlu1 %743 }
  0xd7   :  { %v878_v40 = vpop.permute.xlu1 %877 }
 0x10e   :  { %v201_v49 = vpop.f32.mrf.mxu0 }
 0x10f   :  { %v274_v50 = vpop.f32.mrf.mxu1 }
 0x110   :  { %v3721_v51 = vpop.f32.mrf.mxu0  ;;  %v275_v53 = vadd.f32 %v274_v50, %v201_v49 }
 0x111   :  { %v3754_v52 = vpop.f32.mrf.mxu1 }
 0x112   :  { %v3472_v52 = vld [vmem:[%s5056_s8] ss:$0 sm:$0xff] }
 0x12c   :  { %v365_v54 = vpop.f32.mrf.mxu0 }
 0x12d   :  { %v369_v56 = vadd.f32 %v365_v54, %v275_v53 }
 0x12e   :  { %v3787_v57 = vpop.f32.mrf.mxu0 }
 0x12f   :  { %v372_v58 = vadd.f32 %v371_v55, %v369_v56 }
 0x131   :  { %v374_v59 = vsel %vm373_vm2, %v372_v58, 0.0 }
 0x132   :  { %375 = vadd.xlane.f32.xlu0 %v374_v59 }
 0x1bb   :  { %v376_v60 = vpop.xlane.xlu0 %375 }
 0x1bc   :  { %v377_v61 = vrot.slane %v376_v60, 4 }
 0x1be   :  { %v378_v62 = vadd.f32 %v377_v61, %v376_v60 }
 0x1c0   :  { %v379_v63 = vrot.slane %v378_v62, 2 }
 0x1c2   :  { %v380_v0 = vadd.f32 %v379_v63, %v378_v62 }
 0x1c4   :  { %v381_v1 = vrot.slane %v380_v0, 1 }
 0x1c6   :  { %v382_v3 = vadd.f32 %v381_v1, %v380_v0  ;;  %v4488_v1 = vld [vmem:[%s5086_s0] sm:$0xff] }
 0x1c8   :  { %v383_v4 = vmul.f32 0.015625, %v382_v3 }
 0x1ca   :  { %v384_v5 = vsub.f32 %v372_v58, %v383_v4 }
 0x1cc   :  { %v385_v6 = vmul.f32 %v384_v5, %v384_v5 }
 0x1ce   :  { %v386_v7 = vsel %vm373_vm2, %v385_v6, 0.0 }
 0x1cf   :  { %387 = vadd.xlane.f32.xlu0 %v386_v7 }
 0x1e5   :  { %894 = vrot.lane.b32.xlu0 %v3482_v11, %s4088_s3 }
 0x258   :  { %v388_v15 = vpop.xlane.xlu0 %387 }
 0x259   :  { %v389_v16 = vrot.slane %v388_v15, 4 }
 0x25b   :  { %v390_v17 = vadd.f32 %v389_v16, %v388_v15 }
 0x25c   :  { %v895_v44 = vpop.permute.xlu0 %894 }
 0x25d   :  { %v391_v18 = vrot.slane %v390_v17, 2 }
 0x25f   :  { %v392_v19 = vadd.f32 %v391_v18, %v390_v17 }
 0x261   :  { %v393_v20 = vrot.slane %v392_v19, 1 }
 0x263   :  { %v394_v21 = vadd.f32 %v393_v20, %v392_v19 }
 0x265   :  { %v395_v22 = vmul.f32 0.015625, %v394_v21 }
 0x267   :  { %v396_v23 = vadd.f32 1e-05, %v395_v22 }
 0x269   :  { %3948 = vrsqrt.f32 %v396_v23 }
 0x276   :  { %v3949_v24 = vpop.eup %3948 }
 0x277   :  { %v398_v26 = vmul.f32 %v3949_v24, %v384_v5  ;;  %v4499_v24 = vld [vmem:[%s5087_s5] sm:$0xff] }
 0x278   :  { %vm516_vm5 = vcmp.gt.f32.partialorder %v4499_v24, 0.0 }
 0x279   :  { %v401_v28 = vmul.f32 %v400_v25, %v398_v26 }
 0x27b   :  { %v404_v30 = vadd.f32 %v403_v27, %v401_v28 }
 0x27d   :  { %vm405_vm3 = vcmp.ge.f32.partialorder %v404_v30, 0.0  ;;  %v408_v31 = vmul.f32 %v407_v29, %v404_v30 }
 0x27f   :  { %v409_v32 = vsel %vm405_vm3, %v404_v30, %v408_v31 }
 0x280   :  { %3791 = vmatmul.mubr.msk.f32.vlgmr.msra.gmra.mxu1 %vm373_vm2, %v409_v32 }
 0x281   :  { %3795 = vmatprep.mubr.msk.f32.mxu1 %vm4086_vm1, %v4085_v2 }
 0x340   :  { %v4453_v37 = vpop.f32.mrf.mxu1 }
 0x341   :  { %3794 = vmatpush3.msra.mxu1 %v4453_v37  ;;  %v628_v38 = vmul.f32 %v626_v33, %v4453_v37  ;;  %v611_v39 = vmul.f32 %v609_v35, %v4453_v37  ;;  %v763_v42 = vmul.f32 %v761_v34, %v4453_v37  ;;  %v880_v43 = vmul.f32 %v878_v40, %v4453_v37 }
 0x342   :  { %v3792_v41 = vpop.f32.mrf.mxu1  ;;  %3798 = vmatprep.subr.mxu1 %v4085_v2  ;;  %v897_v45 = vmul.f32 %v895_v44, %v4453_v37  ;;  %v746_v46 = vmul.f32 %v744_v36, %v4453_v37  ;;  %v500_v48 = vmul.f32 %v3473_v47, %v4453_v37  ;;  %v491_v55 = vmul.f32 %v3472_v52, %v4453_v37 }
 0x343   :  { %630 = vrot.lane.b32.xlu1 %v628_v38, %s4090_s6  ;;  %613 = vrot.lane.b32.xlu0 %v611_v39, %s4090_s6 }
 0x344   :  { %v501_v49 = vsel %vm373_vm2, %v500_v48, 0.0  ;;  %v492_v59 = vsel %vm373_vm2, %v491_v55, 0.0 }
 0x347   :  { %765 = vrot.lane.b32.xlu1 %v763_v42, %s4091_s25  ;;  %882 = vrot.lane.b32.xlu0 %v880_v43, %s4092_s2 }
 0x34b   :  { %899 = vrot.lane.b32.xlu1 %v897_v45, %s4092_s2 }
 0x34f   :  { %748 = vrot.lane.b32.xlu1 %v746_v46, %s4091_s25 }
 0x373   :  { %502 = vadd.xlane.f32.xlu1 %v501_v49 }
 0x3b5   :  { %v631_v50 = vpop.permute.xlu1 %630  ;;  %v614_v56 = vpop.permute.xlu0 %613 }
 0x3b6   :  { %v633_v51 = vsel %vm373_vm2, %v631_v50, 0.0  ;;  %v616_v61 = vsel %vm373_vm2, %v614_v56, 0.0 }
 0x3b7   :  { %634 = vadd.xlane.f32.xlu0 %v633_v51 }
 0x3b9   :  { %v766_v53 = vpop.permute.xlu1 %765  ;;  %v883_v63 = vpop.permute.xlu0 %882 }
 0x3ba   :  { %v768_v54 = vsel %vm373_vm2, %v766_v53, 0.0  ;;  %v885_v0 = vsel %vm373_vm2, %v883_v63, 0.0 }
 0x3bb   :  { %769 = vadd.xlane.f32.xlu0 %v768_v54 }
 0x3bd   :  { %v900_v57 = vpop.permute.xlu1 %899 }
 0x3be   :  { %v902_v58 = vsel %vm373_vm2, %v900_v57, 0.0 }
 0x3bf   :  { %903 = vadd.xlane.f32.xlu1 %v902_v58  ;;  %493 = vadd.xlane.f32.xlu0 %v492_v59 }
 0x3c1   :  { %v749_v60 = vpop.permute.xlu1 %748 }
 0x3c2   :  { %v751_v62 = vsel %vm373_vm2, %v749_v60, 0.0 }
 0x3c3   :  { %617 = vadd.xlane.f32.xlu1 %v616_v61  ;;  %752 = vadd.xlane.f32.xlu0 %v751_v62 }
 0x3c7   :  { %886 = vadd.xlane.f32.xlu1 %v885_v0 }
 0x3fc   :  { %v503_v3 = vpop.xlane.xlu1 %502 }
 0x3fd   :  { %v504_v4 = vmul.f32 %v503_v3, %v4488_v1 }
 0x3ff   :  { %v505_v5 = vsel %vm373_vm2, %v504_v4, 0.0 }
 0x400   :  { %v506_v6 = vrot.slane %v505_v5, 4 }
 0x402   :  { %v507_v7 = vadd.f32 %v506_v6, %v505_v5 }
 0x404   :  { %v508_v8 = vrot.slane %v507_v7, 2 }
 0x406   :  { %v509_v9 = vadd.f32 %v508_v8, %v507_v7 }
 0x408   :  { %v510_v13 = vrot.slane %v509_v9, 1 }
 0x40a   :  { %v511_v19 = vadd.f32 %v510_v13, %v509_v9 }
 0x440   :  { %v635_v10 = vpop.xlane.xlu0 %634 }
 0x441   :  { %v636_v11 = vmul.f32 %v635_v10, %v4488_v1 }
 0x443   :  { %v637_v12 = vsel %vm373_vm2, %v636_v11, 0.0 }
 0x444   :  { %v638_v14 = vrot.slane %v637_v12, 4  ;;  %v770_v15 = vpop.xlane.xlu0 %769 }
 0x445   :  { %v771_v16 = vmul.f32 %v770_v15, %v4488_v1 }
 0x446   :  { %v639_v17 = vadd.f32 %v638_v14, %v637_v12 }
 0x447   :  { %v772_v18 = vsel %vm373_vm2, %v771_v16, 0.0 }
 0x448   :  { %v640_v20 = vrot.slane %v639_v17, 2  ;;  %v773_v21 = vrot.slane %v772_v18, 4  ;;  %v904_v22 = vpop.xlane.xlu1 %903  ;;  %v494_v23 = vpop.xlane.xlu0 %493 }
 0x449   :  { %v905_v25 = vmul.f32 %v904_v22, %v4488_v1  ;;  %v512_v26 = vadd.f32 %v511_v19, %v494_v23 }
 0x44a   :  { %v774_v27 = vadd.f32 %v773_v21, %v772_v18  ;;  %v641_v28 = vadd.f32 %v640_v20, %v639_v17 }
 0x44b   :  { %v906_v29 = vsel %vm373_vm2, %v905_v25, 0.0  ;;  %v514_v30 = vmul.f32 0.2, %v512_v26  ;;  %vm513_vm4 = vcmp.ge.f32.partialorder %v512_v26, 0.0 }
 0x44c   :  { %v775_v31 = vrot.slane %v774_v27, 2  ;;  %v907_v32 = vrot.slane %v906_v29, 4  ;;  %v642_v33 = vrot.slane %v641_v28, 1  ;;  %v618_v40 = vpop.xlane.xlu1 %617  ;;  %v753_v48 = vpop.xlane.xlu0 %752 }
 0x44d   :  { %v515_v34 = vsel %vm513_vm4, %v512_v26, %v514_v30 }
 0x44e   :  { %v908_v35 = vadd.f32 %v907_v32, %v906_v29  ;;  %v643_v36 = vadd.f32 %v642_v33, %v641_v28  ;;  %v776_v38 = vadd.f32 %v775_v31, %v774_v27  ;;  %v517_v39 = vsel %vm516_vm5, %v515_v34, -1e+30 }
 0x44f   :  { %v518_v41 = vsel %vm373_vm2, %v517_v39, -inf }
 0x450   :  { %v909_v42 = vrot.slane %v908_v35, 2  ;;  %v644_v43 = vadd.f32 %v643_v36, %v618_v40  ;;  %v777_v44 = vrot.slane %v776_v38, 1  ;;  %519 = vmax.xlane.f32.xlu0 %v518_v41  ;;  %v887_v56 = vpop.xlane.xlu1 %886 }
 0x452   :  { %v646_v45 = vmul.f32 0.2, %v644_v43  ;;  %v778_v46 = vadd.f32 %v777_v44, %v776_v38  ;;  %v910_v47 = vadd.f32 %v909_v42, %v908_v35  ;;  %vm645_vm6 = vcmp.ge.f32.partialorder %v644_v43, 0.0 }
 0x454   :  { %v779_v49 = vadd.f32 %v778_v46, %v753_v48  ;;  %v911_v50 = vrot.slane %v910_v47, 1  ;;  %v647_v51 = vsel %vm645_vm6, %v644_v43, %v646_v45  ;;  %v1075_v48 = vld [vmem:[%s5088_s30 + $0x10] sm:$0xff] }
 0x455   :  { %v648_v52 = vsel %vm516_vm5, %v647_v51, -1e+30  ;;  %v3496_v51 = vld [vmem:[%s5055_s7 + $0x5] ss:$0 sm:$0xff] }
 0x456   :  { %v781_v53 = vmul.f32 0.2, %v779_v49  ;;  %v912_v54 = vadd.f32 %v911_v50, %v910_v47  ;;  %v649_v55 = vsel %vm373_vm2, %v648_v52, -inf  ;;  %vm780_vm7 = vcmp.ge.f32.partialorder %v779_v49, 0.0  ;;  %v1076_v47 = vld [vmem:[%s5088_s30 + $0x18] sm:$0xff]  ;;  %v1073_v50 = vld [vmem:[%s5088_s30] sm:$0xff] }
 0x457   :  { %650 = vmax.xlane.f32.xlu1 %v649_v55  ;;  %v3499_v55 = vld [vmem:[%s5056_s8 + $0x6] ss:$0 sm:$0xff] }
 0x458   :  { %v913_v57 = vadd.f32 %v912_v54, %v887_v56  ;;  %v782_v58 = vsel %vm780_vm7, %v779_v49, %v781_v53  ;;  %v1074_v49 = vld [vmem:[%s5088_s30 + $0x8] sm:$0xff]  ;;  %v3506_v53 = vld [vmem:[%s5055_s7 + $0x7] ss:$0 sm:$0xff]  ;;  %v3494_v54 = vld [vmem:[%s5056_s8 + $0x5] ss:$0 sm:$0xff] }
 0x459   :  { %v783_v59 = vsel %vm516_vm5, %v782_v58, -1e+30  ;;  %v3504_v56 = vld [vmem:[%s5056_s8 + $0x7] ss:$0 sm:$0xff] }
 0x45a   :  { %v915_v60 = vmul.f32 0.2, %v913_v57  ;;  %v784_v61 = vsel %vm373_vm2, %v783_v59, -inf  ;;  %vm914_vm8 = vcmp.ge.f32.partialorder %v913_v57, 0.0 }
 0x45b   :  { %785 = vmax.xlane.f32.xlu0 %v784_v61 }
 0x45c   :  { %v916_v62 = vsel %vm914_vm8, %v913_v57, %v915_v60  ;;  %v3484_v60 = vld [vmem:[%s5057_s9] ss:$0 sm:$0xff] }
 0x45d   :  { %v917_v63 = vsel %vm516_vm5, %v916_v62, -1e+30 }
 0x45e   :  { %v918_v0 = vsel %vm373_vm2, %v917_v63, -inf }
 0x45f   :  { %919 = vmax.xlane.f32.xlu1 %v918_v0 }
 0x4d9   :  { %v520_v3 = vpop.xlane.xlu0 %519 }
 0x4da   :  { %v521_v4 = vsub.f32 %v517_v39, %v520_v3 }
 0x4dc   :  { %v522_v5 = vmul.f32 1.442695, %v521_v4 }
 0x4de   :  { %3950 = vpow2.f32 %v522_v5 }
 0x4e0   :  { %v651_v6 = vpop.xlane.xlu1 %650 }
 0x4e1   :  { %v652_v7 = vsub.f32 %v648_v52, %v651_v6  ;;  %v3501_v52 = vld [vmem:[%s5055_s7 + $0x6] ss:$0 sm:$0xff]  ;;  %v1039_v6 = vlaneseq }
 0x4e3   :  { %v653_v8 = vmul.f32 1.442695, %v652_v7 }
 0x4e4   :  { %v786_v9 = vpop.xlane.xlu0 %785 }
 0x4e5   :  { %3952 = vpow2.f32 %v653_v8  ;;  %v787_v10 = vsub.f32 %v783_v59, %v786_v9  ;;  %v1040_v9 = vshrl.u32 %v1039_v6, 7 }
 0x4e7   :  { %v788_v11 = vmul.f32 1.442695, %v787_v10 }
 0x4e8   :  { %v920_v18 = vpop.xlane.xlu1 %919 }
 0x4e9   :  { %3954 = vpow2.f32 %v788_v11  ;;  %v921_v19 = vsub.f32 %v917_v63, %v920_v18 }
 0x4eb   :  { %v3951_v12 = vpop.eup %3950  ;;  %v922_v20 = vmul.f32 1.442695, %v921_v19 }
 0x4ec   :  { %v524_v13 = vsel %vm373_vm2, %v3951_v12, 0.0 }
 0x4ed   :  { %525 = vadd.xlane.f32.xlu0 %v524_v13  ;;  %3956 = vpow2.f32 %v922_v20  ;;  %v4594_v13 = vsub.s32 0, %v1040_v9 }
 0x4f2   :  { %v3953_v14 = vpop.eup %3952 }
 0x4f3   :  { %v655_v15 = vsel %vm373_vm2, %v3953_v14, 0.0 }
 0x4f4   :  { %656 = vadd.xlane.f32.xlu1 %v655_v15 }
 0x4f6   :  { %v3955_v16 = vpop.eup %3954 }
 0x4f7   :  { %v790_v17 = vsel %vm373_vm2, %v3955_v16, 0.0 }
 0x4f8   :  { %791 = vadd.xlane.f32.xlu0 %v790_v17 }
 0x4fa   :  { %v3957_v21 = vpop.eup %3956 }
 0x4fb   :  { %v924_v22 = vsel %vm373_vm2, %v3957_v21, 0.0 }
 0x505   :  { %795 = vrot.lane.b32.xlu1 %v4453_v37, %s4091_s25 }
 0x50e   :  { %661 = vrot.lane.b32.xlu0 %v4453_v37, %s4090_s6 }
 0x529   :  { %925 = vadd.xlane.f32.xlu1 %v924_v22 }
 0x53a   :  { %929 = vrot.lane.b32.xlu1 %v4453_v37, %s4092_s2 }
 0x576   :  { %v526_v23 = vpop.xlane.xlu0 %525 }
 0x577   :  { %3958 = vrcp.f32 %v526_v23 }
 0x57d   :  { %v657_v25 = vpop.xlane.xlu1 %656 }
 0x57e   :  { %3960 = vrcp.f32 %v657_v25 }
 0x581   :  { %v792_v26 = vpop.xlane.xlu0 %791  ;;  %v796_v37 = vpop.permute.xlu1 %795 }
 0x582   :  { %3962 = vrcp.f32 %v792_v26 }
 0x584   :  { %v3959_v27 = vpop.eup %3958 }
 0x585   :  { %v662_v28 = vpop.permute.xlu0 %661  ;;  %v528_v29 = vmul.f32 %v3959_v27, %v3951_v12  ;;  %v1037_v12 = vld [vmem:[%s5060_s12] sm:$0x1] }
 0x587   :  { %3796 = vmatmul.mubr.msk.f32.vlgmr.msra.gmra.mxu1 %vm373_vm2, %v528_v29  ;;  %v3485_v29 = vld [vmem:[%s5058_s10] ss:$0 sm:$0xff] }
 0x588   :  { %3799 = vmatpush3.msra.mxu1 %v662_v28  ;;  %3800 = vmatprep.mubr.msk.f32.mxu1 %vm4086_vm1, %v4085_v2 }
 0x589   :  { %3803 = vmatprep.subr.mxu1 %v4085_v2 }
 0x58b   :  { %v3961_v30 = vpop.eup %3960 }
 0x58c   :  { %v659_v31 = vmul.f32 %v3961_v30, %v3953_v14 }
 0x58e   :  { %3801 = vmatmul.mubr.msk.f32.vlgmr.msra.gmra.mxu1 %vm373_vm2, %v659_v31 }
 0x58f   :  { %v3963_v32 = vpop.eup %3962  ;;  %3804 = vmatpush3.msra.mxu1 %v796_v37  ;;  %3805 = vmatprep.mubr.msk.f32.mxu1 %vm4086_vm1, %v4085_v2  ;;  %v3486_v37 = vld [vmem:[%s5059_s11] ss:$0 sm:$0xff] }
 0x590   :  { %v794_v33 = vmul.f32 %v3963_v32, %v3955_v16  ;;  %3808 = vmatprep.subr.mxu1 %v4085_v2 }
 0x592   :  { %3806 = vmatmul.mubr.msk.f32.vlgmr.msra.gmra.mxu1 %vm373_vm2, %v794_v33  ;;  %v1070_v33 = vstv %s1069_s27 }
 0x593   :  { %3810 = vmatprep.mubr.msk.f32.mxu1 %vm4086_vm1, %v4085_v2 }
 0x5b2   :  { %v926_v34 = vpop.xlane.xlu1 %925 }
 0x5b3   :  { %3964 = vrcp.f32 %v926_v34 }
 0x5b6   :  { %v930_v35 = vpop.permute.xlu1 %929 }
 0x5b7   :  { %3809 = vmatpush3.msra.mxu1 %v930_v35 }
 0x5b8   :  { %3813 = vmatprep.subr.mxu1 %v4085_v2 }
 0x5c0   :  { %v3965_v36 = vpop.eup %3964 }
 0x5c1   :  { %v928_v38 = vmul.f32 %v3965_v36, %v3957_v21 }
 0x5c3   :  { %3811 = vmatmul.mubr.msk.f32.vlgmr.msra.gmra.mxu1 %vm373_vm2, %v928_v38 }
 0x5c4   :  { %3821 = vmatprep.mubr.msk.f32.mxu1 %vm4086_vm1, %v4085_v2  ;;  %3814 = vmatpush3.msra.mxu1 %v1076_v47 }
 0x5c5   :  { %3815 = vmatprep.subr.mxu1 %v4085_v2 }
 0x5c6   :  { %3816 = vmatpush3.msra.mxu1 %v1075_v48 }
 0x5c7   :  { %3817 = vmatprep.subr.mxu1 %v4085_v2 }
 0x5c8   :  { %3818 = vmatpush3.msra.mxu1 %v1074_v49 }
 0x5c9   :  { %3819 = vmatprep.subr.mxu1 %v4085_v2 }
 0x5ca   :  { %3820 = vmatpush3.msra.mxu1 %v1073_v50 }
 0x5cb   :  { %3824 = vmatprep.subr.mxu1 %v4085_v2 }
 0x647   :  { %v598_v39 = vpop.f32.mrf.mxu1 }
 0x649   :  { %v3797_v40 = vpop.f32.mrf.mxu1 }
 0x64e   :  { %v733_v41 = vpop.f32.mrf.mxu1 }
 0x64f   :  { %1006 = vrot.lane.b32.xlu0 %v733_v41, %s4087_s24 }
 0x650   :  { %v3802_v42 = vpop.f32.mrf.mxu1 }
 0x652   :  { %v867_v43 = vpop.f32.mrf.mxu1 }
 0x653   :  { %1010 = vrot.lane.b32.xlu1 %v867_v43, %s4089_s28 }
 0x654   :  { %v3807_v44 = vpop.f32.mrf.mxu1 }
 0x657   :  { %1290 = vrot.lane.b32.xlu1 %v3496_v51, %s4087_s24 }
 0x65b   :  { %1559 = vrot.lane.b32.xlu1 %v3506_v53, %s4088_s3 }
 0x65f   :  { %1408 = vrot.lane.b32.xlu1 %v3499_v55, %s4089_s28 }
 0x683   :  { %v1001_v45 = vpop.f32.mrf.mxu1 }
 0x684   :  { %1014 = vrot.lane.b32.xlu0 %v1001_v45, %s4088_s3 }
 0x685   :  { %v3812_v46 = vpop.f32.mrf.mxu1 }
 0x688   :  { %1425 = vrot.lane.b32.xlu0 %v3501_v52, %s4089_s28  ;;  %v3491_v52 = vld [vmem:[%s5055_s7 + $0x4] ss:$0 sm:$0xff] }
 0x68c   :  { %1273 = vrot.lane.b32.xlu0 %v3494_v54, %s4087_s24 }
 0x690   :  { %1542 = vrot.lane.b32.xlu0 %v3504_v56, %s4088_s3 }
 0x6c1   :  { %v1007_v57 = vpop.permute.xlu0 %1006 }
 0x6c2   :  { %v1017_v59 = vsel %vm373_vm2, %v598_v39, %v1007_v57 }
 0x6c5   :  { %v1011_v58 = vpop.permute.xlu1 %1010 }
 0x6c6   :  { %v1019_v61 = vsel %vm1018_vm9, %v1017_v59, %v1011_v58  ;;  %v3489_v58 = vld [vmem:[%s5056_s8 + $0x4] ss:$0 sm:$0xff] }
 0x6c9   :  { %v1291_v38 = vpop.permute.xlu1 %1290 }
 0x6cd   :  { %v1560_v40 = vpop.permute.xlu1 %1559 }
 0x6d1   :  { %v1409_v48 = vpop.permute.xlu1 %1408 }
 0x6f6   :  { %v1015_v62 = vpop.permute.xlu0 %1014 }
 0x6f7   :  { %v1021_v63 = vsel %vm1020_vm10, %v1019_v61, %v1015_v62 }
 0x6f8   :  { %v1027_v0 = vadd.f32 %v3484_v60, %v1021_v63 }
 0x6fa   :  { %v1029_v3 = vsel %vm1028_vm11, %v1027_v0, 0.0  ;;  %v1426_v39 = vpop.permute.xlu0 %1425 }
 0x6fb   :  { %v1030_v4 = vrot.slane %v1029_v3, 4 }
 0x6fd   :  { %v1031_v5 = vadd.f32 %v1030_v4, %v1029_v3 }
 0x6fe   :  { %v1274_v41 = vpop.permute.xlu0 %1273 }
 0x6ff   :  { %v1032_v7 = vrot.slane %v1031_v5, 2 }
 0x701   :  { %v1033_v8 = vadd.f32 %v1032_v7, %v1031_v5 }
 0x702   :  { %v1543_v49 = vpop.permute.xlu0 %1542 }
 0x703   :  { %v1034_v10 = vrot.slane %v1033_v8, 1 }
 0x705   :  { %v1035_v11 = vadd.f32 %v1034_v10, %v1033_v8 }
 0x707   :  { %v1036_v14 = vmul.f32 0.125, %v1035_v11 }
 0x709   :  { %v1038_v15 = vmul.f32 %v1037_v12, %v1036_v14 }
 0x70b   :  { %v1042_v16 = vrot.slane %v1038_v15, %v4594_v13 }
 0x70d   :  { %v1043_v17 = vsub.f32 %v1027_v0, %v1042_v16 }
 0x70f   :  { %v1044_v18 = vmul.f32 %v1043_v17, %v1043_v17  ;;  %v1058_v30 = vmul.f32 %v3485_v29, %v1043_v17 }
 0x711   :  { %v1045_v19 = vsel %vm1028_vm11, %v1044_v18, 0.0 }
 0x712   :  { %v1046_v20 = vrot.slane %v1045_v19, 4 }
 0x714   :  { %v1047_v21 = vadd.f32 %v1046_v20, %v1045_v19 }
 0x716   :  { %v1048_v22 = vrot.slane %v1047_v21, 2 }
 0x718   :  { %v1049_v23 = vadd.f32 %v1048_v22, %v1047_v21 }
 0x71a   :  { %v1050_v25 = vrot.slane %v1049_v23, 1 }
 0x71c   :  { %v1051_v26 = vadd.f32 %v1050_v25, %v1049_v23 }
 0x71e   :  { %v1052_v27 = vmul.f32 0.125, %v1051_v26 }
 0x720   :  { %v1059_v28 = vadd.f32 1e-05, %v1052_v27 }
 0x722   :  { %3966 = vrsqrt.f32 %v1059_v28 }
 0x72f   :  { %v3967_v31 = vpop.eup %3966 }
 0x730   :  { %v1061_v32 = vmul.f32 %v3967_v31, %v1058_v30 }
 0x732   :  { %v1067_v34 = vadd.f32 %v3486_v37, %v1061_v32 }
 0x734   :  { %vm1068_vm12 = vcmp.ge.f32.partialorder %v1067_v34, 0.0  ;;  %v1071_v35 = vmul.f32 %v1070_v33, %v1067_v34 }
 0x736   :  { %v1072_v36 = vsel %vm1068_vm12, %v1067_v34, %v1071_v35 }
 0x737   :  { %3822 = vmatmul.mubr.msk.f32.vlgmr.msra.gmra.mxu1 %vm1028_vm11, %v1072_v36 }
 0x738   :  { %3826 = vmatprep.mubr.msk.f32.mxu1 %vm4086_vm1, %v4085_v2 }
 0x7f7   :  { %v4607_v42 = vpop.f32.mrf.mxu1 }
 0x7f8   :  { %3825 = vmatpush3.msra.mxu1 %v4607_v42  ;;  %v1428_v43 = vmul.f32 %v1426_v39, %v4607_v42  ;;  %v1293_v44 = vmul.f32 %v1291_v38, %v4607_v42  ;;  %v1562_v46 = vmul.f32 %v1560_v40, %v4607_v42  ;;  %v1276_v47 = vmul.f32 %v1274_v41, %v4607_v42 }
 0x7f9   :  { %v3823_v45 = vpop.f32.mrf.mxu1  ;;  %3834 = vmatprep.subr.mxu1 %v4085_v2  ;;  %v1411_v50 = vmul.f32 %v1409_v48, %v4607_v42  ;;  %v1545_v51 = vmul.f32 %v1543_v49, %v4607_v42  ;;  %v1166_v53 = vmul.f32 %v3491_v52, %v4607_v42  ;;  %v1156_v63 = vmul.f32 %v3489_v58, %v4607_v42 }
 0x7fa   :  { %1430 = vrot.lane.b32.xlu0 %v1428_v43, %s4091_s25  ;;  %1295 = vrot.lane.b32.xlu1 %v1293_v44, %s4090_s6 }
 0x7fb   :  { %v1167_v54 = vsel %vm373_vm2, %v1166_v53, 0.0  ;;  %v1157_v3 = vsel %vm373_vm2, %v1156_v63, 0.0 }
 0x7fe   :  { %1564 = vrot.lane.b32.xlu1 %v1562_v46, %s4092_s2  ;;  %1278 = vrot.lane.b32.xlu0 %v1276_v47, %s4090_s6 }
 0x802   :  { %1413 = vrot.lane.b32.xlu1 %v1411_v50, %s4091_s25  ;;  %1547 = vrot.lane.b32.xlu0 %v1545_v51, %s4092_s2 }
 0x826   :  { %1168 = vadd.xlane.f32.xlu1 %v1167_v54 }
 0x86c   :  { %v1431_v55 = vpop.permute.xlu0 %1430  ;;  %v1296_v56 = vpop.permute.xlu1 %1295 }
 0x86d   :  { %v1298_v57 = vsel %vm373_vm2, %v1296_v56, 0.0  ;;  %v1433_v61 = vsel %vm373_vm2, %v1431_v55, 0.0 }
 0x86e   :  { %1299 = vadd.xlane.f32.xlu0 %v1298_v57 }
 0x870   :  { %v1565_v59 = vpop.permute.xlu1 %1564  ;;  %v1279_v60 = vpop.permute.xlu0 %1278 }
 0x871   :  { %v1567_v62 = vsel %vm373_vm2, %v1565_v59, 0.0  ;;  %v1281_v0 = vsel %vm373_vm2, %v1279_v60, 0.0 }
 0x872   :  { %1434 = vadd.xlane.f32.xlu0 %v1433_v61  ;;  %1568 = vadd.xlane.f32.xlu1 %v1567_v62 }
 0x874   :  { %v1414_v4 = vpop.permute.xlu1 %1413  ;;  %v1548_v5 = vpop.permute.xlu0 %1547 }
 0x875   :  { %v1550_v6 = vsel %vm373_vm2, %v1548_v5, 0.0  ;;  %v1416_v7 = vsel %vm373_vm2, %v1414_v4, 0.0 }
 0x876   :  { %1282 = vadd.xlane.f32.xlu1 %v1281_v0  ;;  %1158 = vadd.xlane.f32.xlu0 %v1157_v3 }
 0x87a   :  { %1551 = vadd.xlane.f32.xlu1 %v1550_v6  ;;  %1417 = vadd.xlane.f32.xlu0 %v1416_v7 }
 0x8af   :  { %v1169_v8 = vpop.xlane.xlu1 %1168 }
 0x8b0   :  { %v1170_v9 = vmul.f32 %v1169_v8, %v4488_v1 }
 0x8b2   :  { %v1171_v10 = vsel %vm373_vm2, %v1170_v9, 0.0 }
 0x8b3   :  { %v1172_v11 = vrot.slane %v1171_v10, 4 }
 0x8b5   :  { %v1173_v12 = vadd.f32 %v1172_v11, %v1171_v10 }
 0x8b7   :  { %v1174_v14 = vrot.slane %v1173_v12, 2 }
 0x8b9   :  { %v1175_v15 = vadd.f32 %v1174_v14, %v1173_v12 }
 0x8bb   :  { %v1176_v19 = vrot.slane %v1175_v15, 1 }
 0x8bd   :  { %v1177_v29 = vadd.f32 %v1176_v19, %v1175_v15 }
 0x8f7   :  { %v1300_v16 = vpop.xlane.xlu0 %1299 }
 0x8f8   :  { %v1301_v17 = vmul.f32 %v1300_v16, %v4488_v1 }
 0x8fa   :  { %v1302_v18 = vsel %vm373_vm2, %v1301_v17, 0.0 }
 0x8fb   :  { %v1303_v20 = vrot.slane %v1302_v18, 4  ;;  %v1435_v21 = vpop.xlane.xlu0 %1434  ;;  %v1569_v22 = vpop.xlane.xlu1 %1568 }
 0x8fc   :  { %v1436_v23 = vmul.f32 %v1435_v21, %v4488_v1  ;;  %v1570_v25 = vmul.f32 %v1569_v22, %v4488_v1 }
 0x8fd   :  { %v1304_v26 = vadd.f32 %v1303_v20, %v1302_v18 }
 0x8fe   :  { %v1437_v27 = vsel %vm373_vm2, %v1436_v23, 0.0  ;;  %v1571_v28 = vsel %vm373_vm2, %v1570_v25, 0.0 }
 0x8ff   :  { %v1305_v30 = vrot.slane %v1304_v26, 2  ;;  %v1438_v31 = vrot.slane %v1437_v27, 4  ;;  %v1572_v37 = vrot.slane %v1571_v28, 4  ;;  %v1159_v32 = vpop.xlane.xlu0 %1158  ;;  %v1283_v1 = vpop.xlane.xlu1 %1282 }
 0x900   :  { %v1178_v33 = vadd.f32 %v1177_v29, %v1159_v32 }
 0x901   :  { %v1439_v34 = vadd.f32 %v1438_v31, %v1437_v27  ;;  %v1573_v35 = vadd.f32 %v1572_v37, %v1571_v28  ;;  %v1306_v36 = vadd.f32 %v1305_v30, %v1304_v26 }
 0x902   :  { %v1180_v38 = vmul.f32 0.2, %v1178_v33  ;;  %vm1179_vm13 = vcmp.ge.f32.partialorder %v1178_v33, 0.0 }
 0x903   :  { %v1440_v39 = vrot.slane %v1439_v34, 2  ;;  %v1574_v40 = vrot.slane %v1573_v35, 2  ;;  %v1307_v41 = vrot.slane %v1306_v36, 1  ;;  %v1552_v55 = vpop.xlane.xlu1 %1551  ;;  %v1418_v56 = vpop.xlane.xlu0 %1417 }
 0x904   :  { %v1181_v43 = vsel %vm1179_vm13, %v1178_v33, %v1180_v38 }
 0x905   :  { %v1308_v44 = vadd.f32 %v1307_v41, %v1306_v36  ;;  %v1575_v45 = vadd.f32 %v1574_v40, %v1573_v35  ;;  %v1441_v46 = vadd.f32 %v1440_v39, %v1439_v34  ;;  %v1182_v47 = vsel %vm516_vm5, %v1181_v43, -1e+30 }
 0x906   :  { %v1183_v48 = vsel %vm373_vm2, %v1182_v47, -inf }
 0x907   :  { %v1309_v49 = vadd.f32 %v1308_v44, %v1283_v1  ;;  %v1576_v50 = vrot.slane %v1575_v45, 1  ;;  %v1442_v51 = vrot.slane %v1441_v46, 1  ;;  %1184 = vmax.xlane.f32.xlu0 %v1183_v48 }
 0x909   :  { %v1311_v52 = vmul.f32 0.2, %v1309_v49  ;;  %v1577_v53 = vadd.f32 %v1576_v50, %v1575_v45  ;;  %v1443_v54 = vadd.f32 %v1442_v51, %v1441_v46  ;;  %vm1310_vm14 = vcmp.ge.f32.partialorder %v1309_v49, 0.0 }
 0x90b   :  { %v1578_v57 = vadd.f32 %v1577_v53, %v1552_v55  ;;  %v1444_v58 = vadd.f32 %v1443_v54, %v1418_v56  ;;  %v1312_v59 = vsel %vm1310_vm14, %v1309_v49, %v1311_v52  ;;  %v3515_v52 = vld [vmem:[%s5088_s30 + $0x38] sm:$0xff]  ;;  %v3514_v53 = vld [vmem:[%s5088_s30 + $0x30] sm:$0xff]  ;;  %v3513_v54 = vld [vmem:[%s5088_s30 + $0x28] sm:$0xff] }
 0x90c   :  { %v1313_v60 = vsel %vm516_vm5, %v1312_v59, -1e+30  ;;  %v3512_v55 = vld [vmem:[%s5088_s30 + $0x20] sm:$0xff]  ;;  %v3530_v56 = vld [vmem:[%s5055_s7 + $0xa] ss:$0 sm:$0xff] }
 0x90d   :  { %v1580_v61 = vmul.f32 0.2, %v1578_v57  ;;  %v1446_v62 = vmul.f32 0.2, %v1444_v58  ;;  %v1314_v63 = vsel %vm373_vm2, %v1313_v60, -inf  ;;  %vm1579_vm15 = vcmp.ge.f32.partialorder %v1578_v57, 0.0 }
 0x90e   :  { %1315 = vmax.xlane.f32.xlu1 %v1314_v63  ;;  %vm1445_vm0 = vcmp.ge.f32.partialorder %v1444_v58, 0.0  ;;  %v3535_v59 = vld [vmem:[%s5055_s7 + $0xb] ss:$0 sm:$0xff] }
 0x90f   :  { %v1581_v0 = vsel %vm1579_vm15, %v1578_v57, %v1580_v61  ;;  %v1447_v3 = vsel %vm1445_vm0, %v1444_v58, %v1446_v62  ;;  %v3525_v57 = vld [vmem:[%s5055_s7 + $0x9] ss:$0 sm:$0xff]  ;;  %v3528_v61 = vld [vmem:[%s5056_s8 + $0xa] ss:$0 sm:$0xff] }
 0x910   :  { %v1582_v4 = vsel %vm516_vm5, %v1581_v0, -1e+30  ;;  %v1448_v5 = vsel %vm516_vm5, %v1447_v3, -1e+30  ;;  %v3523_v58 = vld [vmem:[%s5056_s8 + $0x9] ss:$0 sm:$0xff] }
 0x911   :  { %v1583_v6 = vsel %vm373_vm2, %v1582_v4, -inf  ;;  %v1449_v7 = vsel %vm373_vm2, %v1448_v5, -inf  ;;  %v3508_v3 = vld [vmem:[%s5057_s9 + $0x1] ss:$0 sm:$0xff] }
 0x912   :  { %1584 = vmax.xlane.f32.xlu1 %v1583_v6  ;;  %1450 = vmax.xlane.f32.xlu0 %v1449_v7 }
 0x990   :  { %v1185_v8 = vpop.xlane.xlu0 %1184 }
 0x991   :  { %v1186_v9 = vsub.f32 %v1182_v47, %v1185_v8 }
 0x993   :  { %v1187_v10 = vmul.f32 1.442695, %v1186_v9 }
 0x995   :  { %3968 = vpow2.f32 %v1187_v10 }
 0x997   :  { %v1316_v11 = vpop.xlane.xlu1 %1315 }
 0x998   :  { %v1317_v12 = vsub.f32 %v1313_v60, %v1316_v11  ;;  %v3533_v60 = vld [vmem:[%s5056_s8 + $0xb] ss:$0 sm:$0xff] }
 0x99a   :  { %v1318_v14 = vmul.f32 1.442695, %v1317_v12 }
 0x99b   :  { %v1451_v15 = vpop.xlane.xlu0 %1450  ;;  %v1585_v25 = vpop.xlane.xlu1 %1584 }
 0x99c   :  { %3970 = vpow2.f32 %v1318_v14  ;;  %v1452_v16 = vsub.f32 %v1448_v5, %v1451_v15  ;;  %v1586_v26 = vsub.f32 %v1582_v4, %v1585_v25 }
 0x99e   :  { %v1453_v17 = vmul.f32 1.442695, %v1452_v16  ;;  %v1587_v27 = vmul.f32 1.442695, %v1586_v26  ;;  %v1699_v16 = vld [vmem:[%s5060_s12 + $0x1] sm:$0x1] }
 0x9a0   :  { %3972 = vpow2.f32 %v1453_v17 }
 0x9a1   :  { %3974 = vpow2.f32 %v1587_v27 }
 0x9a2   :  { %v3969_v18 = vpop.eup %3968 }
 0x9a3   :  { %v1189_v19 = vsel %vm373_vm2, %v3969_v18, 0.0 }
 0x9a4   :  { %1190 = vadd.xlane.f32.xlu0 %v1189_v19 }
 0x9a9   :  { %v3971_v20 = vpop.eup %3970 }
 0x9aa   :  { %v1320_v21 = vsel %vm373_vm2, %v3971_v20, 0.0 }
 0x9ab   :  { %1321 = vadd.xlane.f32.xlu1 %v1320_v21 }
 0x9ad   :  { %v3973_v22 = vpop.eup %3972 }
 0x9ae   :  { %v1455_v23 = vsel %vm373_vm2, %v3973_v22, 0.0  ;;  %v3975_v28 = vpop.eup %3974 }
 0x9af   :  { %1456 = vadd.xlane.f32.xlu0 %v1455_v23  ;;  %v1589_v29 = vsel %vm373_vm2, %v3975_v28, 0.0 }
 0x9bc   :  { %1460 = vrot.lane.b32.xlu1 %v4607_v42, %s4091_s25 }
 0x9c5   :  { %1326 = vrot.lane.b32.xlu0 %v4607_v42, %s4090_s6 }
 0x9e0   :  { %1590 = vadd.xlane.f32.xlu1 %v1589_v29 }
 0x9f1   :  { %1594 = vrot.lane.b32.xlu1 %v4607_v42, %s4092_s2 }
 0xa2d   :  { %v1191_v30 = vpop.xlane.xlu0 %1190 }
 0xa2e   :  { %3976 = vrcp.f32 %v1191_v30 }
 0xa34   :  { %v1322_v31 = vpop.xlane.xlu1 %1321 }
 0xa35   :  { %3978 = vrcp.f32 %v1322_v31 }
 0xa38   :  { %v1457_v37 = vpop.xlane.xlu0 %1456  ;;  %v1461_v35 = vpop.permute.xlu1 %1460 }
 0xa39   :  { %3980 = vrcp.f32 %v1457_v37  ;;  %v3509_v37 = vld [vmem:[%s5058_s10 + $0x1] ss:$0 sm:$0xff] }
 0xa3b   :  { %v3977_v32 = vpop.eup %3976 }
 0xa3c   :  { %v1193_v33 = vmul.f32 %v3977_v32, %v3969_v18  ;;  %v1327_v34 = vpop.permute.xlu0 %1326 }
 0xa3d   :  { %3830 = vmatpush3.msra.mxu0 %v1327_v34  ;;  %v3510_v34 = vld [vmem:[%s5059_s11 + $0x1] ss:$0 sm:$0xff] }
 0xa3e   :  { %3827 = vmatmul.mubr.msk.f32.vlgmr.msra.gmra.mxu1 %vm373_vm2, %v1193_v33  ;;  %3839 = vmatprep.subr.mxu0 %v4085_v2 }
 0xa3f   :  { %3835 = vmatpush3.msra.mxu1 %v1461_v35  ;;  %3836 = vmatprep.mubr.msk.f32.mxu1 %vm4086_vm1, %v4085_v2 }
 0xa40   :  { %3844 = vmatprep.subr.mxu1 %v4085_v2 }
 0xa42   :  { %v3979_v42 = vpop.eup %3978 }
 0xa43   :  { %v1324_v36 = vmul.f32 %v3979_v42, %v3971_v20  ;;  %v1732_v42 = vstv %s3511_s29 }
 0xa45   :  { %3832 = vmatmul.mubr.msk.f32.vlgmr.msra.gmra.mxu0 %vm373_vm2, %v1324_v36 }
 0xa46   :  { %3841 = vmatprep.mubr.msk.f32.mxu0 %vm4086_vm1, %v4085_v2  ;;  %v3981_v38 = vpop.eup %3980 }
 0xa47   :  { %v1459_v39 = vmul.f32 %v3981_v38, %v3973_v22 }
 0xa49   :  { %3837 = vmatmul.mubr.msk.f32.vlgmr.msra.gmra.mxu1 %vm373_vm2, %v1459_v39 }
 0xa4a   :  { %3852 = vmatprep.mubr.msk.f32.mxu1 %vm4086_vm1, %v4085_v2  ;;  %3845 = vmatpush3.msra.mxu1 %v3515_v52 }
 0xa4b   :  { %3846 = vmatprep.subr.mxu1 %v4085_v2 }
 0xa4c   :  { %3847 = vmatpush3.msra.mxu1 %v3514_v53 }
 0xa4d   :  { %3848 = vmatprep.subr.mxu1 %v4085_v2 }
 0xa4e   :  { %3849 = vmatpush3.msra.mxu1 %v3513_v54  ;;  %v3520_v54 = vld [vmem:[%s5055_s7 + $0x8] ss:$0 sm:$0xff] }
 0xa4f   :  { %3850 = vmatprep.subr.mxu1 %v4085_v2 }
 0xa50   :  { %3851 = vmatpush3.msra.mxu1 %v3512_v55 }
 0xa51   :  { %3865 = vmatprep.subr.mxu1 %v4085_v2 }
 0xa69   :  { %v1591_v40 = vpop.xlane.xlu1 %1590 }
 0xa6a   :  { %3982 = vrcp.f32 %v1591_v40 }
 0xa6d   :  { %v1595_v41 = vpop.permute.xlu1 %1594 }
 0xa6e   :  { %3840 = vmatpush3.msra.mxu0 %v1595_v41 }
 0xa6f   :  { %3855 = vmatprep.subr.mxu0 %v4085_v2 }
 0xa77   :  { %v3983_v1 = vpop.eup %3982 }
 0xa78   :  { %v1593_v43 = vmul.f32 %v3983_v1, %v3975_v28 }
 0xa7a   :  { %3842 = vmatmul.mubr.msk.f32.vlgmr.msra.gmra.mxu0 %vm373_vm2, %v1593_v43 }
 0xa7b   :  { %3857 = vmatprep.mubr.msk.f32.mxu0 %vm4086_vm1, %v4085_v2 }
 0xafe   :  { %v1263_v44 = vpop.f32.mrf.mxu1 }
 0xb00   :  { %v3828_v45 = vpop.f32.mrf.mxu1 }
 0xb05   :  { %v1398_v46 = vpop.f32.mrf.mxu0 }
 0xb06   :  { %1671 = vrot.lane.b32.xlu0 %v1398_v46, %s4087_s24 }
 0xb07   :  { %v3833_v47 = vpop.f32.mrf.mxu0 }
 0xb09   :  { %v1532_v48 = vpop.f32.mrf.mxu1 }
 0xb0a   :  { %1675 = vrot.lane.b32.xlu1 %v1532_v48, %s4089_s28 }
 0xb0b   :  { %v3838_v49 = vpop.f32.mrf.mxu1 }
 0xb0e   :  { %1953 = vrot.lane.b32.xlu1 %v3525_v57, %s4087_s24 }
 0xb12   :  { %2222 = vrot.lane.b32.xlu1 %v3535_v59, %s4088_s3 }
 0xb16   :  { %2071 = vrot.lane.b32.xlu1 %v3528_v61, %s4089_s28 }
 0xb3a   :  { %v1666_v50 = vpop.f32.mrf.mxu0 }
 0xb3b   :  { %1679 = vrot.lane.b32.xlu0 %v1666_v50, %s4088_s3 }
 0xb3c   :  { %v3843_v51 = vpop.f32.mrf.mxu0 }
 0xb3f   :  { %2088 = vrot.lane.b32.xlu0 %v3530_v56, %s4089_s28 }
 0xb43   :  { %1936 = vrot.lane.b32.xlu0 %v3523_v58, %s4087_s24 }
 0xb47   :  { %2205 = vrot.lane.b32.xlu0 %v3533_v60, %s4088_s3  ;;  %v3518_v60 = vld [vmem:[%s5056_s8 + $0x8] ss:$0 sm:$0xff] }
 0xb78   :  { %v1672_v62 = vpop.permute.xlu0 %1671 }
 0xb79   :  { %v1682_v0 = vsel %vm373_vm2, %v1263_v44, %v1672_v62 }
 0xb7c   :  { %v1676_v63 = vpop.permute.xlu1 %1675 }
 0xb7d   :  { %v1683_v4 = vsel %vm1018_vm9, %v1682_v0, %v1676_v63 }
 0xb80   :  { %v1954_v41 = vpop.permute.xlu1 %1953 }
 0xb84   :  { %v2223_v43 = vpop.permute.xlu1 %2222 }
 0xb88   :  { %v2072_v51 = vpop.permute.xlu1 %2071 }
 0xbad   :  { %v1680_v5 = vpop.permute.xlu0 %1679 }
 0xbae   :  { %v1684_v6 = vsel %vm1020_vm10, %v1683_v4, %v1680_v5 }
 0xbaf   :  { %v1690_v7 = vadd.f32 %v3508_v3, %v1684_v6 }
 0xbb1   :  { %v1691_v8 = vsel %vm1028_vm11, %v1690_v7, 0.0  ;;  %v2089_v40 = vpop.permute.xlu0 %2088 }
 0xbb2   :  { %v1692_v9 = vrot.slane %v1691_v8, 4 }
 0xbb4   :  { %v1693_v10 = vadd.f32 %v1692_v9, %v1691_v8 }
 0xbb5   :  { %v1937_v1 = vpop.permute.xlu0 %1936 }
 0xbb6   :  { %v1694_v11 = vrot.slane %v1693_v10, 2 }
 0xbb8   :  { %v1695_v12 = vadd.f32 %v1694_v11, %v1693_v10  ;;  %v4783_v11 = vld [vmem:[%s5086_s0] sm:$0xff] }
 0xbb9   :  { %v2206_v50 = vpop.permute.xlu0 %2205 }
 0xbba   :  { %v1696_v14 = vrot.slane %v1695_v12, 1 }
 0xbbc   :  { %v1697_v15 = vadd.f32 %v1696_v14, %v1695_v12 }
 0xbbe   :  { %v1698_v17 = vmul.f32 0.125, %v1697_v15 }
 0xbc0   :  { %v1700_v18 = vmul.f32 %v1699_v16, %v1698_v17 }
 0xbc2   :  { %v1704_v19 = vrot.slane %v1700_v18, %v4594_v13 }
 0xbc4   :  { %v1705_v20 = vsub.f32 %v1690_v7, %v1704_v19 }
 0xbc6   :  { %v1706_v21 = vmul.f32 %v1705_v20, %v1705_v20  ;;  %v1720_v32 = vmul.f32 %v3509_v37, %v1705_v20 }
 0xbc8   :  { %v1707_v22 = vsel %vm1028_vm11, %v1706_v21, 0.0 }
 0xbc9   :  { %v1708_v23 = vrot.slane %v1707_v22, 4 }
 0xbcb   :  { %v1709_v25 = vadd.f32 %v1708_v23, %v1707_v22 }
 0xbcd   :  { %v1710_v26 = vrot.slane %v1709_v25, 2 }
 0xbcf   :  { %v1711_v27 = vadd.f32 %v1710_v26, %v1709_v25 }
 0xbd1   :  { %v1712_v28 = vrot.slane %v1711_v27, 1 }
 0xbd3   :  { %v1713_v29 = vadd.f32 %v1712_v28, %v1711_v27 }
 0xbd5   :  { %v1714_v30 = vmul.f32 0.125, %v1713_v29 }
 0xbd7   :  { %v1721_v31 = vadd.f32 1e-05, %v1714_v30 }
 0xbd9   :  { %3984 = vrsqrt.f32 %v1721_v31 }
 0xbe6   :  { %v3985_v33 = vpop.eup %3984 }
 0xbe7   :  { %v1723_v35 = vmul.f32 %v3985_v33, %v1720_v32 }
 0xbe9   :  { %v1729_v36 = vadd.f32 %v3510_v34, %v1723_v35 }
 0xbeb   :  { %vm1730_vm3 = vcmp.ge.f32.partialorder %v1729_v36, 0.0  ;;  %v1733_v38 = vmul.f32 %v1732_v42, %v1729_v36 }
 0xbed   :  { %v1734_v39 = vsel %vm1730_vm3, %v1729_v36, %v1733_v38 }
 0xbee   :  { %3853 = vmatmul.mubr.msk.f32.vlgmr.msra.gmra.mxu1 %vm1028_vm11, %v1734_v39 }
 0xbef   :  { %3867 = vmatprep.mubr.msk.f32.mxu1 %vm4086_vm1, %v4085_v2 }
 0xcae   :  { %v4748_v44 = vpop.f32.mrf.mxu1 }
 0xcaf   :  { %3856 = vmatpush3.msra.mxu0 %v4748_v44  ;;  %v2091_v45 = vmul.f32 %v2089_v40, %v4748_v44  ;;  %v1956_v46 = vmul.f32 %v1954_v41, %v4748_v44  ;;  %v2225_v48 = vmul.f32 %v2223_v43, %v4748_v44  ;;  %v1939_v49 = vmul.f32 %v1937_v1, %v4748_v44 }
 0xcb0   :  { %v3854_v47 = vpop.f32.mrf.mxu1  ;;  %3860 = vmatprep.subr.mxu0 %v4085_v2  ;;  %v2074_v52 = vmul.f32 %v2072_v51, %v4748_v44  ;;  %v2208_v53 = vmul.f32 %v2206_v50, %v4748_v44  ;;  %v1829_v55 = vmul.f32 %v3520_v54, %v4748_v44  ;;  %v1819_v3 = vmul.f32 %v3518_v60, %v4748_v44 }
 0xcb1   :  { %2093 = vrot.lane.b32.xlu0 %v2091_v45, %s4091_s25  ;;  %1958 = vrot.lane.b32.xlu1 %v1956_v46, %s4090_s6 }
 0xcb2   :  { %v1830_v56 = vsel %vm373_vm2, %v1829_v55, 0.0  ;;  %v1820_v5 = vsel %vm373_vm2, %v1819_v3, 0.0 }
 0xcb5   :  { %2227 = vrot.lane.b32.xlu1 %v2225_v48, %s4092_s2  ;;  %1941 = vrot.lane.b32.xlu0 %v1939_v49, %s4090_s6 }
 0xcb9   :  { %2076 = vrot.lane.b32.xlu1 %v2074_v52, %s4091_s25  ;;  %2210 = vrot.lane.b32.xlu0 %v2208_v53, %s4092_s2 }
 0xcdd   :  { %1831 = vadd.xlane.f32.xlu1 %v1830_v56 }
 0xd23   :  { %v2094_v57 = vpop.permute.xlu0 %2093  ;;  %v1959_v58 = vpop.permute.xlu1 %1958 }
 0xd24   :  { %v1961_v59 = vsel %vm373_vm2, %v1959_v58, 0.0  ;;  %v2096_v63 = vsel %vm373_vm2, %v2094_v57, 0.0 }
 0xd25   :  { %1962 = vadd.xlane.f32.xlu0 %v1961_v59 }
 0xd27   :  { %v2228_v61 = vpop.permute.xlu1 %2227  ;;  %v1942_v62 = vpop.permute.xlu0 %1941 }
 0xd28   :  { %v2230_v0 = vsel %vm373_vm2, %v2228_v61, 0.0  ;;  %v1944_v4 = vsel %vm373_vm2, %v1942_v62, 0.0 }
 0xd29   :  { %2097 = vadd.xlane.f32.xlu0 %v2096_v63  ;;  %2231 = vadd.xlane.f32.xlu1 %v2230_v0 }
 0xd2b   :  { %v2077_v6 = vpop.permute.xlu1 %2076  ;;  %v2211_v7 = vpop.permute.xlu0 %2210 }
 0xd2c   :  { %v2213_v8 = vsel %vm373_vm2, %v2211_v7, 0.0  ;;  %v2079_v9 = vsel %vm373_vm2, %v2077_v6, 0.0 }
 0xd2d   :  { %1945 = vadd.xlane.f32.xlu1 %v1944_v4  ;;  %1821 = vadd.xlane.f32.xlu0 %v1820_v5 }
 0xd31   :  { %2214 = vadd.xlane.f32.xlu1 %v2213_v8  ;;  %2080 = vadd.xlane.f32.xlu0 %v2079_v9 }
 0xd66   :  { %v1832_v10 = vpop.xlane.xlu1 %1831 }
 0xd67   :  { %v1833_v12 = vmul.f32 %v4783_v11, %v1832_v10 }
 0xd69   :  { %v1834_v14 = vsel %vm373_vm2, %v1833_v12, 0.0 }
 0xd6a   :  { %v1835_v15 = vrot.slane %v1834_v14, 4 }
 0xd6c   :  { %v1836_v16 = vadd.f32 %v1835_v15, %v1834_v14 }
 0xd6e   :  { %v1837_v17 = vrot.slane %v1836_v16, 2 }
 0xd70   :  { %v1838_v18 = vadd.f32 %v1837_v17, %v1836_v16 }
 0xd72   :  { %v1839_v22 = vrot.slane %v1838_v18, 1 }
 0xd74   :  { %v1840_v37 = vadd.f32 %v1839_v22, %v1838_v18 }
 0xdae   :  { %v1963_v19 = vpop.xlane.xlu0 %1962 }
 0xdaf   :  { %v1964_v20 = vmul.f32 %v4783_v11, %v1963_v19 }
 0xdb1   :  { %v1965_v21 = vsel %vm373_vm2, %v1964_v20, 0.0 }
 0xdb2   :  { %v1966_v23 = vrot.slane %v1965_v21, 4  ;;  %v2098_v25 = vpop.xlane.xlu0 %2097  ;;  %v2232_v26 = vpop.xlane.xlu1 %2231 }
 0xdb3   :  { %v2099_v27 = vmul.f32 %v4783_v11, %v2098_v25  ;;  %v2233_v28 = vmul.f32 %v4783_v11, %v2232_v26 }
 0xdb4   :  { %v1967_v29 = vadd.f32 %v1966_v23, %v1965_v21 }
 0xdb5   :  { %v2100_v30 = vsel %vm373_vm2, %v2099_v27, 0.0  ;;  %v2234_v31 = vsel %vm373_vm2, %v2233_v28, 0.0 }
 0xdb6   :  { %v1968_v32 = vrot.slane %v1967_v29, 2  ;;  %v2101_v33 = vrot.slane %v2100_v30, 4  ;;  %v2235_v34 = vrot.slane %v2234_v31, 4  ;;  %v1822_v35 = vpop.xlane.xlu0 %1821  ;;  %v1946_v45 = vpop.xlane.xlu1 %1945 }
 0xdb7   :  { %v1841_v42 = vadd.f32 %v1840_v37, %v1822_v35 }
 0xdb8   :  { %v2102_v36 = vadd.f32 %v2101_v33, %v2100_v30  ;;  %v2236_v38 = vadd.f32 %v2235_v34, %v2234_v31  ;;  %v1969_v39 = vadd.f32 %v1968_v32, %v1967_v29 }
 0xdb9   :  { %v1843_v40 = vmul.f32 0.2, %v1841_v42  ;;  %vm1842_vm4 = vcmp.ge.f32.partialorder %v1841_v42, 0.0 }
 0xdba   :  { %v2103_v41 = vrot.slane %v2102_v36, 2  ;;  %v2237_v1 = vrot.slane %v2236_v38, 2  ;;  %v1970_v43 = vrot.slane %v1969_v39, 1  ;;  %v2215_v58 = vpop.xlane.xlu1 %2214  ;;  %v2081_v59 = vpop.xlane.xlu0 %2080 }
 0xdbb   :  { %v1844_v46 = vsel %vm1842_vm4, %v1841_v42, %v1843_v40 }
 0xdbc   :  { %v1971_v47 = vadd.f32 %v1970_v43, %v1969_v39  ;;  %v2238_v48 = vadd.f32 %v2237_v1, %v2236_v38  ;;  %v2104_v49 = vadd.f32 %v2103_v41, %v2102_v36  ;;  %v1845_v50 = vsel %vm516_vm5, %v1844_v46, -1e+30 }
 0xdbd   :  { %v1846_v51 = vsel %vm373_vm2, %v1845_v50, -inf }
 0xdbe   :  { %v1972_v52 = vadd.f32 %v1971_v47, %v1946_v45  ;;  %v2239_v53 = vrot.slane %v2238_v48, 1  ;;  %v2105_v54 = vrot.slane %v2104_v49, 1  ;;  %1847 = vmax.xlane.f32.xlu0 %v1846_v51 }
 0xdc0   :  { %v1974_v55 = vmul.f32 0.2, %v1972_v52  ;;  %v2240_v56 = vadd.f32 %v2239_v53, %v2238_v48  ;;  %v2106_v57 = vadd.f32 %v2105_v54, %v2104_v49  ;;  %vm1973_vm6 = vcmp.ge.f32.partialorder %v1972_v52, 0.0 }
 0xdc2   :  { %v2241_v60 = vadd.f32 %v2240_v56, %v2215_v58  ;;  %v2107_v61 = vadd.f32 %v2106_v57, %v2081_v59  ;;  %v1975_v62 = vsel %vm1973_vm6, %v1972_v52, %v1974_v55  ;;  %v3544_v56 = vld [vmem:[%s5088_s30 + $0x58] sm:$0xff]  ;;  %v3543_v57 = vld [vmem:[%s5088_s30 + $0x50] sm:$0xff]  ;;  %v3542_v58 = vld [vmem:[%s5088_s30 + $0x48] sm:$0xff] }
 0xdc3   :  { %v1976_v63 = vsel %vm516_vm5, %v1975_v62, -1e+30  ;;  %v3541_v59 = vld [vmem:[%s5088_s30 + $0x40] sm:$0xff]  ;;  %v3552_v62 = vld [vmem:[%s5056_s8 + $0xd] ss:$0 sm:$0xff]  ;;  %s3540_s30 = sld [smem:[#allocation5 + $0x2]] }
 0xdc4   :  { %v2243_v0 = vmul.f32 0.2, %v2241_v60  ;;  %v2109_v3 = vmul.f32 0.2, %v2107_v61  ;;  %v1977_v4 = vsel %vm373_vm2, %v1976_v63, -inf  ;;  %vm2242_vm7 = vcmp.ge.f32.partialorder %v2241_v60, 0.0 }
 0xdc5   :  { %1978 = vmax.xlane.f32.xlu1 %v1977_v4  ;;  %vm2108_vm8 = vcmp.ge.f32.partialorder %v2107_v61, 0.0 }
 0xdc6   :  { %v2244_v5 = vsel %vm2242_vm7, %v2241_v60, %v2243_v0  ;;  %v2110_v6 = vsel %vm2108_vm8, %v2107_v61, %v2109_v3  ;;  %v3559_v60 = vld [vmem:[%s5055_s7 + $0xe] ss:$0 sm:$0xff]  ;;  %v3554_v61 = vld [vmem:[%s5055_s7 + $0xd] ss:$0 sm:$0xff]  ;;  %v3562_v0 = vld [vmem:[%s5056_s8 + $0xf] ss:$0 sm:$0xff] }
 0xdc7   :  { %v2245_v7 = vsel %vm516_vm5, %v2244_v5, -1e+30  ;;  %v2111_v8 = vsel %vm516_vm5, %v2110_v6, -1e+30  ;;  %v3557_v3 = vld [vmem:[%s5056_s8 + $0xe] ss:$0 sm:$0xff] }
 0xdc8   :  { %v2246_v9 = vsel %vm373_vm2, %v2245_v7, -inf  ;;  %v2112_v10 = vsel %vm373_vm2, %v2111_v8, -inf }
 0xdc9   :  { %2247 = vmax.xlane.f32.xlu1 %v2246_v9  ;;  %2113 = vmax.xlane.f32.xlu0 %v2112_v10 }
 0xe47   :  { %v1848_v12 = vpop.xlane.xlu0 %1847 }
 0xe48   :  { %v1849_v14 = vsub.f32 %v1845_v50, %v1848_v12 }
 0xe4a   :  { %v1850_v15 = vmul.f32 1.442695, %v1849_v14 }
 0xe4c   :  { %3986 = vpow2.f32 %v1850_v15 }
 0xe4e   :  { %v1979_v16 = vpop.xlane.xlu1 %1978 }
 0xe4f   :  { %v1980_v17 = vsub.f32 %v1976_v63, %v1979_v16  ;;  %v3564_v63 = vld [vmem:[%s5055_s7 + $0xf] ss:$0 sm:$0xff] }
 0xe51   :  { %v1981_v18 = vmul.f32 1.442695, %v1980_v17 }
 0xe52   :  { %v2114_v19 = vpop.xlane.xlu0 %2113  ;;  %v2248_v29 = vpop.xlane.xlu1 %2247 }
 0xe53   :  { %3988 = vpow2.f32 %v1981_v18  ;;  %v2115_v20 = vsub.f32 %v2111_v8, %v2114_v19  ;;  %v2249_v30 = vsub.f32 %v2245_v7, %v2248_v29  ;;  %v3537_v7 = vld [vmem:[%s5057_s9 + $0x2] ss:$0 sm:$0xff] }
 0xe55   :  { %v2116_v21 = vmul.f32 1.442695, %v2115_v20  ;;  %v2250_v31 = vmul.f32 1.442695, %v2249_v30 }
 0xe57   :  { %3990 = vpow2.f32 %v2116_v21  ;;  %v2362_v21 = vld [vmem:[%s5060_s12 + $0x2] sm:$0x1] }
 0xe58   :  { %3992 = vpow2.f32 %v2250_v31 }
 0xe59   :  { %v3987_v22 = vpop.eup %3986 }
 0xe5a   :  { %v1852_v23 = vsel %vm373_vm2, %v3987_v22, 0.0 }
 0xe5b   :  { %1853 = vadd.xlane.f32.xlu0 %v1852_v23 }
 0xe60   :  { %v3989_v25 = vpop.eup %3988 }
 0xe61   :  { %v1983_v26 = vsel %vm373_vm2, %v3989_v25, 0.0 }
 0xe62   :  { %1984 = vadd.xlane.f32.xlu1 %v1983_v26 }
 0xe64   :  { %v3991_v27 = vpop.eup %3990 }
 0xe65   :  { %v2118_v28 = vsel %vm373_vm2, %v3991_v27, 0.0  ;;  %v3993_v37 = vpop.eup %3992 }
 0xe66   :  { %2119 = vadd.xlane.f32.xlu0 %v2118_v28  ;;  %v2252_v32 = vsel %vm373_vm2, %v3993_v37, 0.0 }
 0xe73   :  { %2123 = vrot.lane.b32.xlu1 %v4748_v44, %s4091_s25 }
 0xe7c   :  { %1989 = vrot.lane.b32.xlu0 %v4748_v44, %s4090_s6 }
 0xe97   :  { %2253 = vadd.xlane.f32.xlu1 %v2252_v32 }
 0xea8   :  { %2257 = vrot.lane.b32.xlu1 %v4748_v44, %s4092_s2 }
 0xee4   :  { %v1854_v33 = vpop.xlane.xlu0 %1853 }
 0xee5   :  { %3994 = vrcp.f32 %v1854_v33 }
 0xeeb   :  { %v1985_v34 = vpop.xlane.xlu1 %1984 }
 0xeec   :  { %3996 = vrcp.f32 %v1985_v34 }
 0xeef   :  { %v2124_v35 = vpop.permute.xlu1 %2123  ;;  %v2120_v42 = vpop.xlane.xlu0 %2119 }
 0xef0   :  { %3866 = vmatpush3.msra.mxu1 %v2124_v35  ;;  %3998 = vrcp.f32 %v2120_v42  ;;  %v3538_v42 = vld [vmem:[%s5058_s10 + $0x2] ss:$0 sm:$0xff] }
 0xef1   :  { %3875 = vmatprep.subr.mxu1 %v4085_v2 }
 0xef2   :  { %v3995_v36 = vpop.eup %3994 }
 0xef3   :  { %v1856_v38 = vmul.f32 %v3995_v36, %v3987_v22  ;;  %v1990_v39 = vpop.permute.xlu0 %1989 }
 0xef5   :  { %3858 = vmatmul.mubr.msk.f32.vlgmr.msra.gmra.mxu0 %vm373_vm2, %v1856_v38 }
 0xef6   :  { %3861 = vmatpush3.msra.mxu0 %v1990_v39  ;;  %3862 = vmatprep.mubr.msk.f32.mxu0 %vm4086_vm1, %v4085_v2  ;;  %v3539_v39 = vld [vmem:[%s5059_s11 + $0x2] ss:$0 sm:$0xff] }
 0xef7   :  { %3870 = vmatprep.subr.mxu0 %v4085_v2 }
 0xef9   :  { %v3997_v44 = vpop.eup %3996 }
 0xefa   :  { %v1987_v40 = vmul.f32 %v3997_v44, %v3989_v25 }
 0xefc   :  { %3863 = vmatmul.mubr.msk.f32.vlgmr.msra.gmra.mxu0 %vm373_vm2, %v1987_v40  ;;  %v2395_v40 = vstv %s3540_s30 }
 0xefd   :  { %3872 = vmatprep.mubr.msk.f32.mxu0 %vm4086_vm1, %v4085_v2  ;;  %v3999_v41 = vpop.eup %3998 }
 0xefe   :  { %v2122_v1 = vmul.f32 %v3999_v41, %v3991_v27 }
 0xf00   :  { %3868 = vmatmul.mubr.msk.f32.vlgmr.msra.gmra.mxu1 %vm373_vm2, %v2122_v1 }
 0xf01   :  { %3883 = vmatprep.mubr.msk.f32.mxu1 %vm4086_vm1, %v4085_v2  ;;  %3876 = vmatpush3.msra.mxu1 %v3544_v56 }
 0xf02   :  { %3877 = vmatprep.subr.mxu1 %v4085_v2 }
 0xf03   :  { %3878 = vmatpush3.msra.mxu1 %v3543_v57 }
 0xf04   :  { %3879 = vmatprep.subr.mxu1 %v4085_v2 }
 0xf05   :  { %3880 = vmatpush3.msra.mxu1 %v3542_v58 }
 0xf06   :  { %3881 = vmatprep.subr.mxu1 %v4085_v2 }
 0xf07   :  { %3882 = vmatpush3.msra.mxu1 %v3541_v59  ;;  %v3549_v59 = vld [vmem:[%s5055_s7 + $0xc] ss:$0 sm:$0xff] }
 0xf08   :  { %3896 = vmatprep.subr.mxu1 %v4085_v2 }
 0xf20   :  { %v2254_v43 = vpop.xlane.xlu1 %2253 }
 0xf21   :  { %4000 = vrcp.f32 %v2254_v43 }
 0xf24   :  { %v2258_v45 = vpop.permute.xlu1 %2257 }
 0xf25   :  { %3871 = vmatpush3.msra.mxu0 %v2258_v45 }
 0xf26   :  { %3886 = vmatprep.subr.mxu0 %v4085_v2 }
 0xf2e   :  { %v4001_v46 = vpop.eup %4000 }
 0xf2f   :  { %v2256_v47 = vmul.f32 %v4001_v46, %v3993_v37 }
 0xf31   :  { %3873 = vmatmul.mubr.msk.f32.vlgmr.msra.gmra.mxu0 %vm373_vm2, %v2256_v47 }
 0xf32   :  { %3888 = vmatprep.mubr.msk.f32.mxu0 %vm4086_vm1, %v4085_v2 }
 0xfb5   :  { %v1926_v48 = vpop.f32.mrf.mxu0 }
 0xfb7   :  { %v3859_v49 = vpop.f32.mrf.mxu0 }
 0xfbc   :  { %v2061_v50 = vpop.f32.mrf.mxu0 }
 0xfbd   :  { %2334 = vrot.lane.b32.xlu0 %v2061_v50, %s4087_s24 }
 0xfbe   :  { %v3864_v51 = vpop.f32.mrf.mxu0 }
 0xfc0   :  { %v2195_v52 = vpop.f32.mrf.mxu1 }
 0xfc1   :  { %2338 = vrot.lane.b32.xlu1 %v2195_v52, %s4089_s28 }
 0xfc2   :  { %v3869_v53 = vpop.f32.mrf.mxu1 }
 0xfc5   :  { %2616 = vrot.lane.b32.xlu1 %v3554_v61, %s4087_s24 }
 0xfc9   :  { %2885 = vrot.lane.b32.xlu1 %v3564_v63, %s4088_s3 }
 0xfcd   :  { %2734 = vrot.lane.b32.xlu1 %v3557_v3, %s4089_s28  ;;  %v3547_v3 = vld [vmem:[%s5056_s8 + $0xc] ss:$0 sm:$0xff] }
 0xff1   :  { %v2329_v54 = vpop.f32.mrf.mxu0 }
 0xff2   :  { %2342 = vrot.lane.b32.xlu0 %v2329_v54, %s4088_s3 }
 0xff3   :  { %v3874_v55 = vpop.f32.mrf.mxu0 }
 0xff6   :  { %2751 = vrot.lane.b32.xlu0 %v3559_v60, %s4089_s28 }
 0xffa   :  { %2599 = vrot.lane.b32.xlu0 %v3552_v62, %s4087_s24 }
 0xffe   :  { %2868 = vrot.lane.b32.xlu0 %v3562_v0, %s4088_s3 }
0x102f   :  { %v2335_v4 = vpop.permute.xlu0 %2334 }
0x1030   :  { %v2345_v6 = vsel %vm373_vm2, %v1926_v48, %v2335_v4 }
0x1033   :  { %v2339_v5 = vpop.permute.xlu1 %2338 }
0x1034   :  { %v2346_v8 = vsel %vm1018_vm9, %v2345_v6, %v2339_v5 }
0x1037   :  { %v2617_v46 = vpop.permute.xlu1 %2616 }
0x103b   :  { %v2886_v48 = vpop.permute.xlu1 %2885 }
0x103f   :  { %v2735_v56 = vpop.permute.xlu1 %2734 }
0x1064   :  { %v2343_v9 = vpop.permute.xlu0 %2342 }
0x1065   :  { %v2347_v10 = vsel %vm1020_vm10, %v2346_v8, %v2343_v9 }
0x1066   :  { %v2353_v12 = vadd.f32 %v3537_v7, %v2347_v10 }
0x1068   :  { %v2354_v14 = vsel %vm1028_vm11, %v2353_v12, 0.0  ;;  %v2752_v45 = vpop.permute.xlu0 %2751 }
0x1069   :  { %v2355_v15 = vrot.slane %v2354_v14, 4 }
0x106b   :  { %v2356_v16 = vadd.f32 %v2355_v15, %v2354_v14 }
0x106c   :  { %v2600_v47 = vpop.permute.xlu0 %2599 }
0x106d   :  { %v2357_v17 = vrot.slane %v2356_v16, 2 }
0x106f   :  { %v2358_v18 = vadd.f32 %v2357_v17, %v2356_v16 }
0x1070   :  { %v2869_v55 = vpop.permute.xlu0 %2868 }
0x1071   :  { %v2359_v19 = vrot.slane %v2358_v18, 1 }
0x1073   :  { %v2360_v20 = vadd.f32 %v2359_v19, %v2358_v18 }
0x1075   :  { %v2361_v22 = vmul.f32 0.125, %v2360_v20 }
0x1077   :  { %v2363_v23 = vmul.f32 %v2362_v21, %v2361_v22 }
0x1079   :  { %v2367_v25 = vrot.slane %v2363_v23, %v4594_v13 }
0x107b   :  { %v2368_v26 = vsub.f32 %v2353_v12, %v2367_v25 }
0x107d   :  { %v2369_v27 = vmul.f32 %v2368_v26, %v2368_v26  ;;  %v2383_v36 = vmul.f32 %v3538_v42, %v2368_v26 }
0x107f   :  { %v2370_v28 = vsel %vm1028_vm11, %v2369_v27, 0.0 }
0x1080   :  { %v2371_v29 = vrot.slane %v2370_v28, 4 }
0x1082   :  { %v2372_v30 = vadd.f32 %v2371_v29, %v2370_v28 }
0x1084   :  { %v2373_v31 = vrot.slane %v2372_v30, 2 }
0x1086   :  { %v2374_v37 = vadd.f32 %v2373_v31, %v2372_v30 }
0x1088   :  { %v2375_v32 = vrot.slane %v2374_v37, 1 }
0x108a   :  { %v2376_v33 = vadd.f32 %v2375_v32, %v2374_v37 }
0x108c   :  { %v2377_v34 = vmul.f32 0.125, %v2376_v33 }
0x108e   :  { %v2384_v35 = vadd.f32 1e-05, %v2377_v34 }
0x1090   :  { %4002 = vrsqrt.f32 %v2384_v35 }
0x109d   :  { %v4003_v38 = vpop.eup %4002 }
0x109e   :  { %v2386_v44 = vmul.f32 %v4003_v38, %v2383_v36 }
0x10a0   :  { %v2392_v41 = vadd.f32 %v3539_v39, %v2386_v44 }
0x10a2   :  { %vm2393_vm12 = vcmp.ge.f32.partialorder %v2392_v41, 0.0  ;;  %v2396_v1 = vmul.f32 %v2395_v40, %v2392_v41 }
0x10a4   :  { %v2397_v43 = vsel %vm2393_vm12, %v2392_v41, %v2396_v1 }
0x10a5   :  { %3884 = vmatmul.mubr.msk.f32.vlgmr.msra.gmra.mxu1 %vm1028_vm11, %v2397_v43 }
0x10a6   :  { %3898 = vmatprep.mubr.msk.f32.mxu1 %vm4086_vm1, %v4085_v2 }
0x1165   :  { %v4894_v49 = vpop.f32.mrf.mxu1 }
0x1166   :  { %3887 = vmatpush3.msra.mxu0 %v4894_v49  ;;  %v2754_v50 = vmul.f32 %v2752_v45, %v4894_v49  ;;  %v2619_v51 = vmul.f32 %v2617_v46, %v4894_v49  ;;  %v2888_v53 = vmul.f32 %v2886_v48, %v4894_v49  ;;  %v2602_v54 = vmul.f32 %v2600_v47, %v4894_v49 }
0x1167   :  { %v3885_v52 = vpop.f32.mrf.mxu1  ;;  %3891 = vmatprep.subr.mxu0 %v4085_v2  ;;  %v2737_v57 = vmul.f32 %v2735_v56, %v4894_v49  ;;  %v2871_v58 = vmul.f32 %v2869_v55, %v4894_v49  ;;  %v2492_v60 = vmul.f32 %v3549_v59, %v4894_v49  ;;  %v2482_v8 = vmul.f32 %v3547_v3, %v4894_v49 }
0x1168   :  { %2756 = vrot.lane.b32.xlu0 %v2754_v50, %s4091_s25  ;;  %2621 = vrot.lane.b32.xlu1 %v2619_v51, %s4090_s6 }
0x1169   :  { %v2493_v61 = vsel %vm373_vm2, %v2492_v60, 0.0  ;;  %v2483_v10 = vsel %vm373_vm2, %v2482_v8, 0.0 }
0x116c   :  { %2890 = vrot.lane.b32.xlu1 %v2888_v53, %s4092_s2  ;;  %2604 = vrot.lane.b32.xlu0 %v2602_v54, %s4090_s6 }
0x1170   :  { %2739 = vrot.lane.b32.xlu1 %v2737_v57, %s4091_s25  ;;  %2873 = vrot.lane.b32.xlu0 %v2871_v58, %s4092_s2 }
0x1194   :  { %2494 = vadd.xlane.f32.xlu1 %v2493_v61 }
0x11da   :  { %v2757_v62 = vpop.permute.xlu0 %2756  ;;  %v2622_v63 = vpop.permute.xlu1 %2621 }
0x11db   :  { %v2624_v0 = vsel %vm373_vm2, %v2622_v63, 0.0  ;;  %v2759_v6 = vsel %vm373_vm2, %v2757_v62, 0.0 }
0x11dc   :  { %2625 = vadd.xlane.f32.xlu0 %v2624_v0 }
0x11de   :  { %v2891_v4 = vpop.permute.xlu1 %2890  ;;  %v2605_v5 = vpop.permute.xlu0 %2604 }
0x11df   :  { %v2893_v7 = vsel %vm373_vm2, %v2891_v4, 0.0  ;;  %v2607_v9 = vsel %vm373_vm2, %v2605_v5, 0.0 }
0x11e0   :  { %2760 = vadd.xlane.f32.xlu0 %v2759_v6  ;;  %2894 = vadd.xlane.f32.xlu1 %v2893_v7 }
0x11e2   :  { %v2740_v12 = vpop.permute.xlu1 %2739  ;;  %v2874_v14 = vpop.permute.xlu0 %2873 }
0x11e3   :  { %v2742_v15 = vsel %vm373_vm2, %v2740_v12, 0.0  ;;  %v2876_v16 = vsel %vm373_vm2, %v2874_v14, 0.0 }
0x11e4   :  { %2608 = vadd.xlane.f32.xlu1 %v2607_v9  ;;  %2484 = vadd.xlane.f32.xlu0 %v2483_v10 }
0x11e8   :  { %2877 = vadd.xlane.f32.xlu1 %v2876_v16  ;;  %2743 = vadd.xlane.f32.xlu0 %v2742_v15 }
0x121d   :  { %v2495_v17 = vpop.xlane.xlu1 %2494 }
0x121e   :  { %v2496_v18 = vmul.f32 %v4783_v11, %v2495_v17 }
0x1220   :  { %v2497_v19 = vsel %vm373_vm2, %v2496_v18, 0.0 }
0x1221   :  { %v2498_v20 = vrot.slane %v2497_v19, 4 }
0x1223   :  { %v2499_v21 = vadd.f32 %v2498_v20, %v2497_v19 }
0x1225   :  { %v2500_v22 = vrot.slane %v2499_v21, 2 }
0x1227   :  { %v2501_v23 = vadd.f32 %v2500_v22, %v2499_v21 }
0x1229   :  { %v2502_v28 = vrot.slane %v2501_v23, 1 }
0x122b   :  { %v2503_v42 = vadd.f32 %v2502_v28, %v2501_v23 }
0x1265   :  { %v2626_v25 = vpop.xlane.xlu0 %2625 }
0x1266   :  { %v2627_v26 = vmul.f32 %v4783_v11, %v2626_v25 }
0x1268   :  { %v2628_v27 = vsel %vm373_vm2, %v2627_v26, 0.0 }
0x1269   :  { %v2629_v29 = vrot.slane %v2628_v27, 4  ;;  %v2761_v30 = vpop.xlane.xlu0 %2760  ;;  %v2895_v31 = vpop.xlane.xlu1 %2894 }
0x126a   :  { %v2762_v37 = vmul.f32 %v4783_v11, %v2761_v30  ;;  %v2896_v32 = vmul.f32 %v4783_v11, %v2895_v31 }
0x126b   :  { %v2630_v33 = vadd.f32 %v2629_v29, %v2628_v27 }
0x126c   :  { %v2763_v34 = vsel %vm373_vm2, %v2762_v37, 0.0  ;;  %v2897_v35 = vsel %vm373_vm2, %v2896_v32, 0.0 }
0x126d   :  { %v2631_v36 = vrot.slane %v2630_v33, 2  ;;  %v2764_v38 = vrot.slane %v2763_v34, 4  ;;  %v2898_v39 = vrot.slane %v2897_v35, 4  ;;  %v2485_v44 = vpop.xlane.xlu0 %2484  ;;  %v2609_v11 = vpop.xlane.xlu1 %2608 }
0x126e   :  { %v2504_v40 = vadd.f32 %v2503_v42, %v2485_v44 }
0x126f   :  { %v2765_v41 = vadd.f32 %v2764_v38, %v2763_v34  ;;  %v2899_v1 = vadd.f32 %v2898_v39, %v2897_v35  ;;  %v2632_v43 = vadd.f32 %v2631_v36, %v2630_v33 }
0x1270   :  { %vm2505_vm13 = vcmp.ge.f32.partialorder %v2504_v40, 0.0  ;;  %v2506_v45 = vmul.f32 0.2, %v2504_v40 }
0x1271   :  { %v2766_v46 = vrot.slane %v2765_v41, 2  ;;  %v2900_v47 = vrot.slane %v2899_v1, 2  ;;  %v2633_v48 = vrot.slane %v2632_v43, 1  ;;  %v2878_v62 = vpop.xlane.xlu1 %2877  ;;  %v2744_v63 = vpop.xlane.xlu0 %2743 }
0x1272   :  { %v2507_v50 = vsel %vm2505_vm13, %v2504_v40, %v2506_v45 }
0x1273   :  { %v2634_v51 = vadd.f32 %v2633_v48, %v2632_v43  ;;  %v2901_v52 = vadd.f32 %v2900_v47, %v2899_v1  ;;  %v2767_v53 = vadd.f32 %v2766_v46, %v2765_v41  ;;  %v2508_v54 = vsel %vm516_vm5, %v2507_v50, -1e+30 }
0x1274   :  { %v2509_v55 = vsel %vm373_vm2, %v2508_v54, -inf }
0x1275   :  { %v2635_v56 = vadd.f32 %v2634_v51, %v2609_v11  ;;  %v2902_v57 = vrot.slane %v2901_v52, 1  ;;  %v2768_v58 = vrot.slane %v2767_v53, 1  ;;  %2510 = vmax.xlane.f32.xlu0 %v2509_v55 }
0x1277   :  { %vm2636_vm14 = vcmp.ge.f32.partialorder %v2635_v56, 0.0  ;;  %v2637_v59 = vmul.f32 0.2, %v2635_v56  ;;  %v2903_v60 = vadd.f32 %v2902_v57, %v2901_v52  ;;  %v2769_v61 = vadd.f32 %v2768_v58, %v2767_v53  ;;  %v3135_v58 = vld [vmem:[%s5063_s15] sm:$0x3] }
0x1279   :  { %v2904_v0 = vadd.f32 %v2903_v60, %v2878_v62  ;;  %v2770_v3 = vadd.f32 %v2769_v61, %v2744_v63  ;;  %v2638_v4 = vsel %vm2636_vm14, %v2635_v56, %v2637_v59  ;;  %v3145_v59 = vld [vmem:[%s5064_s16 + $0x18] sm:$0xff]  ;;  %v3144_v60 = vld [vmem:[%s5064_s16 + $0x10] sm:$0xff]  ;;  %v4093_v61 = vmov 0   ;;  %v3143_v62 = vld [vmem:[%s5064_s16 + $0x8] sm:$0xff] }
0x127a   :  { %v2639_v5 = vsel %vm516_vm5, %v2638_v4, -1e+30  ;;  %3946 = vset.pattern.permute.xlu1 %v4093_v61  ;;  %3947 = vset.pattern.permute.xlu0 %v4093_v61  ;;  %v3566_v4 = vld [vmem:[%s5057_s9 + $0x3] ss:$0 sm:$0xff]  ;;  %s3569_s9 = sld [smem:[#allocation5 + $0x3]] }
0x127b   :  { %vm2905_vm15 = vcmp.ge.f32.partialorder %v2904_v0, 0.0  ;;  %v2906_v6 = vmul.f32 0.2, %v2904_v0  ;;  %vm2771_vm0 = vcmp.ge.f32.partialorder %v2770_v3, 0.0  ;;  %v2772_v7 = vmul.f32 0.2, %v2770_v3 }
0x127c   :  { %v2640_v8 = vsel %vm373_vm2, %v2639_v5, -inf }
0x127d   :  { %2641 = vmax.xlane.f32.xlu1 %v2640_v8  ;;  %v2907_v9 = vsel %vm2905_vm15, %v2904_v0, %v2906_v6  ;;  %v2773_v10 = vsel %vm2771_vm0, %v2770_v3, %v2772_v7 }
0x127e   :  { %v2908_v12 = vsel %vm516_vm5, %v2907_v9, -1e+30  ;;  %v2774_v14 = vsel %vm516_vm5, %v2773_v10, -1e+30 }
0x127f   :  { %v2909_v15 = vsel %vm373_vm2, %v2908_v12, -inf  ;;  %v2775_v16 = vsel %vm373_vm2, %v2774_v14, -inf }
0x1280   :  { %2776 = vmax.xlane.f32.xlu0 %v2775_v16 }
0x1281   :  { %2910 = vmax.xlane.f32.xlu1 %v2909_v15 }
0x12fe   :  { %v2511_v17 = vpop.xlane.xlu0 %2510 }
0x12ff   :  { %v2512_v18 = vsub.f32 %v2508_v54, %v2511_v17 }
0x1301   :  { %v2513_v19 = vmul.f32 1.442695, %v2512_v18  ;;  %v3025_v18 = vld [vmem:[%s5060_s12 + $0x3] sm:$0x1] }
0x1303   :  { %4004 = vpow2.f32 %v2513_v19 }
0x1306   :  { %v2642_v20 = vpop.xlane.xlu1 %2641 }
0x1307   :  { %v2643_v21 = vsub.f32 %v2639_v5, %v2642_v20 }
0x1309   :  { %v2644_v22 = vmul.f32 1.442695, %v2643_v21  ;;  %v2777_v23 = vpop.xlane.xlu0 %2776 }
0x130a   :  { %v2778_v25 = vsub.f32 %v2774_v14, %v2777_v23  ;;  %v2911_v37 = vpop.xlane.xlu1 %2910 }
0x130b   :  { %4006 = vpow2.f32 %v2644_v22  ;;  %v2912_v32 = vsub.f32 %v2908_v12, %v2911_v37 }
0x130c   :  { %v2779_v26 = vmul.f32 1.442695, %v2778_v25 }
0x130d   :  { %v2913_v33 = vmul.f32 1.442695, %v2912_v32  ;;  %v3567_v32 = vld [vmem:[%s5058_s10 + $0x3] ss:$0 sm:$0xff] }
0x130e   :  { %4008 = vpow2.f32 %v2779_v26 }
0x130f   :  { %4010 = vpow2.f32 %v2913_v33 }
0x1310   :  { %v4005_v24 = vpop.eup %4004 }
0x1311   :  { %v2515_v27 = vsel %vm373_vm2, %v4005_v24, 0.0 }
0x1312   :  { %2516 = vadd.xlane.f32.xlu0 %v2515_v27 }
0x1318   :  { %v4007_v28 = vpop.eup %4006 }
0x1319   :  { %v2646_v29 = vsel %vm373_vm2, %v4007_v28, 0.0 }
0x131a   :  { %2647 = vadd.xlane.f32.xlu1 %v2646_v29 }
0x131b   :  { %v4009_v30 = vpop.eup %4008 }
0x131c   :  { %v2781_v31 = vsel %vm373_vm2, %v4009_v30, 0.0  ;;  %v4011_v34 = vpop.eup %4010 }
0x131d   :  { %2782 = vadd.xlane.f32.xlu0 %v2781_v31  ;;  %v2915_v35 = vsel %vm373_vm2, %v4011_v34, 0.0 }
0x132b   :  { %2786 = vrot.lane.b32.xlu1 %v4894_v49, %s4091_s25 }
0x1333   :  { %2652 = vrot.lane.b32.xlu0 %v4894_v49, %s4090_s6 }
0x134f   :  { %2916 = vadd.xlane.f32.xlu1 %v2915_v35 }
0x1360   :  { %2920 = vrot.lane.b32.xlu1 %v4894_v49, %s4092_s2 }
0x139b   :  { %v2517_v42 = vpop.xlane.xlu0 %2516 }
0x139c   :  { %4012 = vrcp.f32 %v2517_v42  ;;  %v3058_v42 = vstv %s3569_s9 }
0x13a3   :  { %v2648_v36 = vpop.xlane.xlu1 %2647 }
0x13a4   :  { %4014 = vrcp.f32 %v2648_v36 }
0x13a6   :  { %v2783_v38 = vpop.xlane.xlu0 %2782 }
0x13a7   :  { %v2787_v39 = vpop.permute.xlu1 %2786  ;;  %4016 = vrcp.f32 %v2783_v38 }
0x13a8   :  { %3897 = vmatpush3.msra.mxu1 %v2787_v39  ;;  %v3061_v39 = vld [vmem:[%s5062_s14] sm:$0x3] }
0x13a9   :  { %v4013_v44 = vpop.eup %4012  ;;  %3906 = vmatprep.subr.mxu1 %v4085_v2 }
0x13aa   :  { %v2653_v40 = vpop.permute.xlu0 %2652  ;;  %v2519_v41 = vmul.f32 %v4013_v44, %v4005_v24 }
0x13ac   :  { %3889 = vmatmul.mubr.msk.f32.vlgmr.msra.gmra.mxu0 %vm373_vm2, %v2519_v41 }
0x13ad   :  { %3892 = vmatpush3.msra.mxu0 %v2653_v40  ;;  %3893 = vmatprep.mubr.msk.f32.mxu0 %vm4086_vm1, %v4085_v2  ;;  %v3142_v40 = vld [vmem:[%s5064_s16] sm:$0xff] }
0x13ae   :  { %3901 = vmatprep.subr.mxu0 %v4085_v2 }
0x13b1   :  { %v4015_v49 = vpop.eup %4014 }
0x13b2   :  { %v2650_v1 = vmul.f32 %v4015_v49, %v4007_v28 }
0x13b4   :  { %v4017_v43 = vpop.eup %4016  ;;  %3894 = vmatmul.mubr.msk.f32.vlgmr.msra.gmra.mxu0 %vm373_vm2, %v2650_v1 }
0x13b5   :  { %v2785_v45 = vmul.f32 %v4017_v43, %v4009_v30  ;;  %3903 = vmatprep.mubr.msk.f32.mxu0 %vm4086_vm1, %v4085_v2 }
0x13b7   :  { %3899 = vmatmul.mubr.msk.f32.vlgmr.msra.gmra.mxu1 %vm373_vm2, %v2785_v45  ;;  %v3232_v45 = vld [vmem:[%s5066_s18 + $0x8] sm:$0xff] }
0x13b8   :  { %3908 = vmatprep.mubr.msk.f32.mxu1 %vm4086_vm1, %v4085_v2 }
0x13d8   :  { %v2917_v46 = vpop.xlane.xlu1 %2916 }
0x13d9   :  { %4018 = vrcp.f32 %v2917_v46  ;;  %v3231_v46 = vld [vmem:[%s5066_s18] sm:$0xff] }
0x13dc   :  { %v2921_v47 = vpop.permute.xlu1 %2920 }
0x13dd   :  { %3902 = vmatpush3.msra.mxu0 %v2921_v47  ;;  %v3571_v47 = vld [vmem:[%s5065_s17] ss:$0 sm:$0xff] }
0x13de   :  { %3911 = vmatprep.subr.mxu0 %v4085_v2 }
0x13e6   :  { %v4019_v48 = vpop.eup %4018 }
0x13e7   :  { %v2919_v11 = vmul.f32 %v4019_v48, %v4011_v34  ;;  %v3568_v34 = vld [vmem:[%s5059_s11 + $0x3] ss:$0 sm:$0xff] }
0x13e9   :  { %3904 = vmatmul.mubr.msk.f32.vlgmr.msra.gmra.mxu0 %vm373_vm2, %v2919_v11 }
0x13ea   :  { %3919 = vmatprep.mubr.msk.f32.mxu0 %vm4086_vm1, %v4085_v2  ;;  %3912 = vmatpush3.msra.mxu0 %v3145_v59 }
0x13eb   :  { %3913 = vmatprep.subr.mxu0 %v4085_v2 }
0x13ec   :  { %3914 = vmatpush3.msra.mxu0 %v3144_v60 }
0x13ed   :  { %3915 = vmatprep.subr.mxu0 %v4085_v2 }
0x13ee   :  { %3916 = vmatpush3.msra.mxu0 %v3143_v62 }
0x13ef   :  { %3917 = vmatprep.subr.mxu0 %v4085_v2 }
0x13f0   :  { %3918 = vmatpush3.msra.mxu0 %v3142_v40 }
0x146c   :  { %v2589_v50 = vpop.f32.mrf.mxu0 }
0x146e   :  { %v3890_v51 = vpop.f32.mrf.mxu0 }
0x1474   :  { %v2724_v52 = vpop.f32.mrf.mxu0 }
0x1475   :  { %2997 = vrot.lane.b32.xlu0 %v2724_v52, %s4087_s24 }
0x1476   :  { %v3895_v53 = vpop.f32.mrf.mxu0 }
0x1477   :  { %v2858_v54 = vpop.f32.mrf.mxu1 }
0x1478   :  { %3001 = vrot.lane.b32.xlu1 %v2858_v54, %s4089_s28 }
0x1479   :  { %v3900_v55 = vpop.f32.mrf.mxu1 }
0x147a   :  { %v3318_v55 = vld [vmem:[%s5068_s20] sm:$0xff] }
0x147c   :  { %3138 = vperm.xlu1 %3946, %v3135_v58  }
0x14a9   :  { %v2992_v56 = vpop.f32.mrf.mxu0 }
0x14aa   :  { %3005 = vrot.lane.b32.xlu0 %v2992_v56, %s4088_s3  ;;  %v3574_v56 = vld [vmem:[%s5067_s19] ss:$0 sm:$0xff]  ;;  %s4094_s19 = smov [#allocation7]  }
0x14ab   :  { %v3905_v57 = vpop.f32.mrf.mxu0  ;;  %s3423_s20 = sshll.u32 %s4094_s19, 4  ;;  %s3424_s20 = int_to_ptr.vmem [resolvable:$true] %s3423_s20 }
0x14ac   :  { %p4062_p11 = scmp.lt.s32.totalorder %s3424_s20, %s3424_s20 }
0x14e7   :  { %v2998_v63 = vpop.permute.xlu0 %2997 }
0x14e8   :  { %v3008_v3 = vsel %vm373_vm2, %v2589_v50, %v2998_v63 }
0x14ea   :  { %v3002_v0 = vpop.permute.xlu1 %3001 }
0x14eb   :  { %v3009_v5 = vsel %vm1018_vm9, %v3008_v3, %v3002_v0 }
0x14f7   :  { %v3139_v41 = vpop.permute.xlu1 %3138 }
0x151c   :  { %v3006_v6 = vpop.permute.xlu0 %3005 }
0x151d   :  { %v3010_v7 = vsel %vm1020_vm10, %v3009_v5, %v3006_v6 }
0x151e   :  { %v3016_v8 = vadd.f32 %v3566_v4, %v3010_v7 }
0x1520   :  { %v3017_v9 = vsel %vm1028_vm11, %v3016_v8, 0.0 }
0x1521   :  { %v3018_v10 = vrot.slane %v3017_v9, 4 }
0x1523   :  { %v3019_v12 = vadd.f32 %v3018_v10, %v3017_v9 }
0x1525   :  { %v3020_v14 = vrot.slane %v3019_v12, 2 }
0x1527   :  { %v3021_v15 = vadd.f32 %v3020_v14, %v3019_v12 }
0x1529   :  { %v3022_v16 = vrot.slane %v3021_v15, 1 }
0x152b   :  { %v3023_v17 = vadd.f32 %v3022_v16, %v3021_v15 }
0x152d   :  { %v3024_v19 = vmul.f32 0.125, %v3023_v17 }
0x152f   :  { %v3026_v20 = vmul.f32 %v3025_v18, %v3024_v19 }
0x1531   :  { %v3030_v21 = vrot.slane %v3026_v20, %v4594_v13 }
0x1533   :  { %v3031_v22 = vsub.f32 %v3016_v8, %v3030_v21 }
0x1535   :  { %v3032_v23 = vmul.f32 %v3031_v22, %v3031_v22  ;;  %v3046_v33 = vmul.f32 %v3567_v32, %v3031_v22 }
0x1537   :  { %v3033_v25 = vsel %vm1028_vm11, %v3032_v23, 0.0 }
0x1538   :  { %v3034_v26 = vrot.slane %v3033_v25, 4 }
0x153a   :  { %v3035_v24 = vadd.f32 %v3034_v26, %v3033_v25 }
0x153c   :  { %v3036_v27 = vrot.slane %v3035_v24, 2 }
0x153e   :  { %v3037_v28 = vadd.f32 %v3036_v27, %v3035_v24 }
0x1540   :  { %v3038_v29 = vrot.slane %v3037_v28, 1 }
0x1542   :  { %v3039_v30 = vadd.f32 %v3038_v29, %v3037_v28 }
0x1544   :  { %v3040_v31 = vmul.f32 0.125, %v3039_v30 }
0x1546   :  { %v3047_v37 = vadd.f32 1e-05, %v3040_v31 }
0x1548   :  { %4020 = vrsqrt.f32 %v3047_v37 }
0x1555   :  { %v4021_v13 = vpop.eup %4020 }
0x1556   :  { %v3049_v35 = vmul.f32 %v4021_v13, %v3046_v33 }
0x1558   :  { %v3055_v36 = vadd.f32 %v3568_v34, %v3049_v35 }
0x155a   :  { %vm3056_vm5 = vcmp.ge.f32.partialorder %v3055_v36, 0.0  ;;  %v3059_v38 = vmul.f32 %v3058_v42, %v3055_v36 }
0x155c   :  { %v3060_v44 = vsel %vm3056_vm5, %v3055_v36, %v3059_v38 }
0x155d   :  { %3907 = vmatpush3.msra.mxu1 %v3060_v44 }
0x155e   :  { %3909 = vmatmul.mubr.msk.f32.vlgmr.msra.gmra.mxu1 %vm373_vm2, %v3061_v39  ;;  %3922 = vmatprep.subr.mxu1 %v4085_v2 }
0x155f   :  { %3926 = vmatprep.mubr.msk.f32.mxu1 %vm4086_vm1, %v4085_v2  ;;  %3923 = vmatpush3.msra.mxu1 %v3232_v45 }
0x1560   :  { %3924 = vmatprep.subr.mxu1 %v4085_v2 }
0x1561   :  { %3925 = vmatpush3.msra.mxu1 %v3231_v46 }
0x1562   :  { %3929 = vmatprep.subr.mxu1 %v4085_v2 }
0x161e   :  { %v3131_v49 = vpop.f32.mrf.mxu1 }
0x161f   :  { %v3141_v1 = vmul.f32 %v3139_v41, %v3131_v49 }
0x1620   :  { %v3910_v43 = vpop.f32.mrf.mxu1 }
0x1621   :  { %3920 = vmatmul.mubr.msk.f32.vlgmr.msra.gmra.mxu0 %vm1028_vm11, %v3141_v1 }
0x16e1   :  { %v3222_v48 = vpop.f32.mrf.mxu0 }
0x16e2   :  { %v3223_v11 = vadd.f32 %v3571_v47, %v3222_v48 }
0x16e3   :  { %v3921_v50 = vpop.f32.mrf.mxu0 }
0x16e4   :  { %v3227_v51 = vmul.f32 1.442695, %v3223_v11  ;;  %vm3226_vm10 = vcmp.gt.f32.partialorder %v3223_v11, 0.0 }
0x16e6   :  { %4022 = vpow2.f32 %v3227_v51 }
0x16f3   :  { %v4023_v52 = vpop.eup %4022 }
0x16f4   :  { %v3573_v53 = vadd.f32 -1.0, %v4023_v52 }
0x16f6   :  { %v3230_v54 = vsel %vm3226_vm10, %v3223_v11, %v3573_v53 }
0x16f7   :  { %3927 = vmatmul.mubr.msk.f32.vlgmr.msra.gmra.mxu1 %vm1018_vm9, %v3230_v54 }
0x16f8   :  { %3931 = vmatprep.mubr.msk.f32.mxu1 %vm4086_vm1, %v4085_v2  ;;  %3930 = vmatpush3.msra.mxu1 %v3318_v55  ;;  %v3577_v2 = vld [vmem:[%s5069_s21] ss:$0 sm:$0xff]  ;;  %vm3404_vm1 = vcmask 17408   ;;  %s4057_s21 = scalar_lea.vmem %s3424_s20, 32 }
0x16f9   :  { %p4058_p10 = scmp.ne.s32.totalorder %s3424_s20, %s4057_s21  ;;  %p4063_p12 = scmp.lt.s32.totalorder %s4057_s21, %s4057_s21 }
0x16fb   :  { %p4064_p13 = por %p4063_p12, %p4062_p11 }
0x16fd   :  { %p4065_p0 = pnand %p4064_p13, %p4058_p10 }
0x17b7   :  { %v3309_v57 = vpop.f32.mrf.mxu1 }
0x17b8   :  { %v3310_v58 = vadd.f32 %v3574_v56, %v3309_v57 }
0x17b9   :  { %v3928_v59 = vpop.f32.mrf.mxu1 }
0x17ba   :  { %v3314_v60 = vmul.f32 1.442695, %v3310_v58  ;;  %vm3313_vm9 = vcmp.gt.f32.partialorder %v3310_v58, 0.0 }
0x17bc   :  { %4024 = vpow2.f32 %v3314_v60 }
0x17c9   :  { %v4025_v61 = vpop.eup %4024 }
0x17ca   :  { %v3576_v62 = vadd.f32 -1.0, %v4025_v61 }
0x17cc   :  { %v3317_v63 = vsel %vm3313_vm9, %v3310_v58, %v3576_v62 }
0x17cd   :  { %3932 = vmatmul.mubr.msk.f32.vlgmr.msra.gmra.mxu1 %vm373_vm2, %v3317_v63 }
0x188d   :  { %v3395_v0 = vpop.f32.mrf.mxu1 }
0x188e   :  { %v3396_v3 = vadd.f32 %v3577_v2, %v3395_v0 }
0x188f   :  { %v3933_v4 = vpop.f32.mrf.mxu1 }
0x1890   :  { %v3400_v5 = vmul.f32 1.442695, %v3396_v3  ;;  %vm3399_vm11 = vcmp.gt.f32.partialorder %v3396_v3, 0.0 }
0x1892   :  { %4026 = vpow2.f32 %v3400_v5 }
0x189f   :  { %v4027_v6 = vpop.eup %4026 }
0x18a0   :  { %v3579_v7 = vadd.f32 -1.0, %v4027_v6 }
0x18a2   :  { %v3403_v8 = vsel %vm3399_vm11, %v3396_v3, %v3579_v7 }
0x18a3   :  { %v3405_v9 = vsel %vm3404_vm1, %v3403_v8, -inf }
0x18a4   :  { %3406 = vmax.xlane.f32.xlu0 %v3405_v9 }
0x192d   :  { %v3407_v10 = vpop.xlane.xlu0 %3406 }
0x192e   :  { %v3408_v12 = vsub.f32 %v3403_v8, %v3407_v10 }
0x1930   :  { %v3409_v14 = vmul.f32 1.442695, %v3408_v12 }
0x1932   :  { %4028 = vpow2.f32 %v3409_v14 }
0x193f   :  { %v4029_v15 = vpop.eup %4028 }
0x1940   :  { %v3411_v16 = vsel %vm3404_vm1, %v4029_v15, 0.0 }
0x1941   :  { %3412 = vadd.xlane.f32.xlu1 %v3411_v16 }
0x19ca   :  { %v3413_v17 = vpop.xlane.xlu1 %3412 }
0x19cb   :  { %4030 = vrcp.f32 %v3413_v17 }
0x19d8   :  { %v4031_v18 = vpop.eup %4030 }
0x19d9   :  { %v3415_v19 = vmul.f32 %v4031_v18, %v4029_v15 }
0x19db   :  { %3416 = vst.msk [vmem:[#allocation7] sm:$0x3] %vm3404_vm1, %v3415_v19 }
0x19dc   :  { %4068 = shalt.err (!%p4065_p0)
}
0x19dd   :  { %3426 = dma.vmem_to_hbm [thread:$0]  %s3424_s20, 32, %s5070_s22, [#allocation3]  }
0x19de   :  { %4081 = dma.done.wait [#allocation3], 32  }
0x19df   :  { %4082 = vsyncadd [#allocation3], 4294967264 }
0x19e0   :  { %3430 = vsyncpa [#allocation3], 1 }
0x19e1   :  { %3431 = vsyncpa [#allocation4], 1 }
0x19e2   :  { %3432 = vsyncpa [#allocation6], 1 }

</bundles_post_ra>
